<compile_context>
chip_gen: v7x
topology: tpu7x:2x2x1
jax: 0.10.0
libtpu: 0.0.40
codegen_flags: <defaults>
</compile_context>

<pallas_src>
import functools

import jax
import jax.numpy as jnp
from jax import lax
from jax.experimental import pallas as pl
from jax.experimental.pallas import tpu as pltpu

HIDDEN = 32
VOCAB = 64
VOCAB_PAD = 128          # vocab axis padded to one full 128-lane vreg
GATE_PAD = 128           # 3*HIDDEN = 96 packed GRU gate lanes, padded to 128
OUT_PAD = 128            # lane-dense token/score output width (>= max_length)
SEQ = 8
MAX_LENGTH = 6
SOS_TOKEN = 1
N_LAYERS = 1             # decoder.n_layers

# A @ B^T contraction (contract last dim of both operands).
_NT_DIMS = (((1,), (1,)), ((), ()))

_VMEM = pl.BlockSpec(memory_space=pltpu.MemorySpace.VMEM)
_SMEM = pl.BlockSpec(memory_space=pltpu.MemorySpace.SMEM)


# ----------------------------------------------------------------------------
# Fused encoder + greedy-decode kernel.
# ----------------------------------------------------------------------------
def _make_fused_kernel(max_length):
    def kernel(len_ref, seq_ref, emb_tab_ref,
               ew_ih_ref, ew_hh_ref, eb_ih_ref, eb_hh_ref,
               dw_ih_ref, dw_hh_ref, db_ih_ref, db_hh_ref,
               w_cat_ref, b_cat_ref, w_out_ref, b_out_ref,
               tok_ref, score_ref,
               enc_scratch):
        H = HIDDEN
        length = len_ref[0]                                    # SMEM scalar

        # Reused 128-lane iota (vocab argmax, feedback one-hot, output lanes).
        lane_ids = lax.broadcasted_iota(jnp.int32, (1, VOCAB_PAD), 1)

        # ---------------- encoder embedding gather (in-kernel) -------------
        vocab_ids = lax.broadcasted_iota(jnp.int32, (SEQ, VOCAB_PAD), 1)
        onehot_in = (vocab_ids == seq_ref[...]).astype(jnp.float32)
        emb_seq = jnp.dot(onehot_in, emb_tab_ref[...],
                          preferred_element_type=jnp.float32)  # (SEQ, H)

        # ---------------- encoder: 1-layer GRU over the sequence -----------
        # Whole-sequence input projection hoisted off the recurrent chain:
        # ONE (SEQ,H)x(H,128) matmul; lanes 0..95 hold the r|z|n gates.
        gi_all = (jnp.dot(emb_seq, ew_ih_ref[...],
                          preferred_element_type=jnp.float32)
                  + eb_ih_ref[...])                            # (SEQ, 128)

        # pack_padded_sequence mask, built once (JAX does not CSE broadcasts).
        mask_mat = (lax.broadcasted_iota(jnp.int32, (SEQ, H), 0)
                    < length).astype(jnp.float32)              # (SEQ, H)

        h = jnp.zeros((1, H), jnp.float32)
        for t in range(SEQ):                                   # static unroll
            gi = gi_all[t:t + 1, :]                            # (1, 128)
            gh = (jnp.dot(h, ew_hh_ref[...],
                          preferred_element_type=jnp.float32)
                  + eb_hh_ref[...])                            # (1, 128)
            r = jax.nn.sigmoid(gi[:, 0:H] + gh[:, 0:H])
            z = jax.nn.sigmoid(gi[:, H:2 * H] + gh[:, H:2 * H])
            n = jnp.tanh(gi[:, 2 * H:3 * H] + r * gh[:, 2 * H:3 * H])
            h_new = (1.0 - z) * n + z * h
            # zero outputs / frozen hidden past input_length
            m_t = mask_mat[t:t + 1, :]                         # (1, H) static
            h_out = m_t * h_new
            enc_scratch[t:t + 1, :] = h_out
            h = h_out + (1.0 - m_t) * h

        enc = enc_scratch[...]                                 # (SEQ, H)
        # decoder_hidden = encoder_hidden[:n_layers] -> final (frozen) hidden.
        h0 = h
        x0 = emb_tab_ref[pl.ds(SOS_TOKEN, 1), :]               # (1, H)

        # ---------------- greedy decode loop --------------------------------
        def decode_step(t, carry):
            h_dec, x, tok_vec, score_vec = carry

            # Decoder GRU step: two packed-gate matmuls (x path + h path).
            gi = (jnp.dot(x, dw_ih_ref[...],
                          preferred_element_type=jnp.float32)
                  + db_ih_ref[...])                            # (1, 128)
            gh = (jnp.dot(h_dec, dw_hh_ref[...],
                          preferred_element_type=jnp.float32)
                  + db_hh_ref[...])                            # (1, 128)
            r = jax.nn.sigmoid(gi[:, 0:H] + gh[:, 0:H])
            z = jax.nn.sigmoid(gi[:, H:2 * H] + gh[:, H:2 * H])
            n = jnp.tanh(gi[:, 2 * H:3 * H] + r * gh[:, 2 * H:3 * H])
            h_new = (1.0 - z) * n + z * h_dec

            # Luong "dot" attention: h_new @ enc^T, softmax (exact), context.
            att = lax.dot_general(h_new, enc, _NT_DIMS,
                                  preferred_element_type=jnp.float32)  # (1,S)
            att = att - jnp.max(att, axis=-1, keepdims=True)
            e = jnp.exp(att)
            attn = e / jnp.sum(e, axis=-1, keepdims=True)
            ctx = jnp.dot(attn, enc,
                          preferred_element_type=jnp.float32)          # (1,H)

            # concat([h, ctx]) @ W_cat == h @ W_cat[0] + ctx @ W_cat[1]
            cat = jnp.tanh(
                jnp.dot(h_new, w_cat_ref[0],
                        preferred_element_type=jnp.float32)
                + jnp.dot(ctx, w_cat_ref[1],
                          preferred_element_type=jnp.float32)
                + b_cat_ref[...])

            logits = (jnp.dot(cat, w_out_ref[...],
                              preferred_element_type=jnp.float32)
                      + b_out_ref[...])                        # (1, VOCAB_PAD)

            # torch.max(softmax(logits), dim=1):
            #   value = 1 / sum(exp(logits - max)) (exact), index = argmax.
            m = jnp.max(logits, axis=-1, keepdims=True)
            e_l = jnp.exp(logits - m)
            score = 1.0 / jnp.sum(e_l, axis=-1, keepdims=True)  # (1,1) f32
            idx = jnp.min(jnp.where(logits == m, lane_ids, VOCAB_PAD),
                          axis=-1, keepdims=True)               # (1,1) i32

            # Lane-dense accumulation of the outputs (single store at the end).
            upd = lane_ids == t
            tok_vec = jnp.where(upd, idx, tok_vec)
            score_vec = jnp.where(upd, score, score_vec)

            # Feed argmax back in: one-hot @ embedding table (MXU), no scalar
            # extraction / host round-trip.
            onehot = (lane_ids == idx).astype(jnp.float32)
            x_next = jnp.dot(onehot, emb_tab_ref[...],
                             preferred_element_type=jnp.float32)        # (1,H)
            return h_new, x_next, tok_vec, score_vec

        init = (h0, x0,
                jnp.zeros((1, OUT_PAD), jnp.int32),
                jnp.zeros((1, OUT_PAD), jnp.float32))
        _, _, tok_vec, score_vec = lax.fori_loop(
            0, max_length, decode_step, init, unroll=True)

        tok_ref[...] = tok_vec                                 # one full store
        score_ref[...] = score_vec

    return kernel


# ----------------------------------------------------------------------------
# Wrapper (jitted; everything inside is a single pallas_call).
# ----------------------------------------------------------------------------
@functools.partial(jax.jit, static_argnames=("max_length",))
def greedy_search_decoder(input_seq, input_length, max_length, params):
    # max_length must fit the lane-dense output vector (128 lanes).
    seq_col = input_seq.reshape(SEQ, 1).astype(jnp.int32)

    tok, score = pl.pallas_call(
        _make_fused_kernel(max_length),
        out_shape=(jax.ShapeDtypeStruct((1, OUT_PAD), jnp.int32),
                   jax.ShapeDtypeStruct((1, OUT_PAD), jnp.float32)),
        in_specs=[_SMEM] + [_VMEM] * 14,
        out_specs=(_VMEM, _VMEM),
        scratch_shapes=[pltpu.VMEM((SEQ, HIDDEN), jnp.float32)],
    )(input_length, seq_col, params["emb_pad"],
      params["enc_w_ih"], params["enc_w_hh"],
      params["enc_b_ih"], params["enc_b_hh"],
      params["dec_w_ih"], params["dec_w_hh"],
      params["dec_b_ih"], params["dec_b_hh"],
      params["w_cat"], params["b_cat"],
      params["w_out"], params["b_out"])

    return tok[0, :max_length], score[0, :max_length]


# ----------------------------------------------------------------------------
# Deterministic parameters (lane-packed gates, lane-padded vocab) + example.
# ----------------------------------------------------------------------------
def make_params(key):
    ks = jax.random.split(key, 13)

    def init(k, shape):
        return (jax.random.normal(k, shape, jnp.float32) * 0.1).astype(jnp.float32)

    def pack_gates(w3, b3):
        # (3,H,H)/(3,1,H), PyTorch gate order r,z,n -> lane-packed (H,128)/(1,128)
        w = jnp.concatenate([w3[0], w3[1], w3[2]], axis=1)          # (H, 3H)
        b = jnp.concatenate([b3[0], b3[1], b3[2]], axis=1)          # (1, 3H)
        wp = jnp.zeros((HIDDEN, GATE_PAD), jnp.float32).at[:, :3 * HIDDEN].set(w)
        bp = jnp.zeros((1, GATE_PAD), jnp.float32).at[:, :3 * HIDDEN].set(b)
        return wp, bp

    emb = init(ks[0], (VOCAB, HIDDEN))
    emb_pad = jnp.zeros((VOCAB_PAD, HIDDEN), jnp.float32).at[:VOCAB].set(emb)

    enc_w_ih, enc_b_ih = pack_gates(init(ks[1], (3, HIDDEN, HIDDEN)),
                                    init(ks[3], (3, 1, HIDDEN)))
    enc_w_hh, enc_b_hh = pack_gates(init(ks[2], (3, HIDDEN, HIDDEN)),
                                    init(ks[4], (3, 1, HIDDEN)))
    dec_w_ih, dec_b_ih = pack_gates(init(ks[5], (3, HIDDEN, HIDDEN)),
                                    init(ks[7], (3, 1, HIDDEN)))
    dec_w_hh, dec_b_hh = pack_gates(init(ks[6], (3, HIDDEN, HIDDEN)),
                                    init(ks[8], (3, 1, HIDDEN)))

    w_out = init(ks[11], (HIDDEN, VOCAB))
    b_out = init(ks[12], (1, VOCAB))
    # Padded vocab lanes get a huge negative bias so softmax/argmax ignore them.
    w_out_pad = jnp.zeros((HIDDEN, VOCAB_PAD), jnp.float32).at[:, :VOCAB].set(w_out)
    b_out_pad = jnp.full((1, VOCAB_PAD), -1e30, jnp.float32).at[:, :VOCAB].set(b_out)

    return dict(
        emb_pad=emb_pad,              # (VOCAB_PAD, H) — shared embedding table
        enc_w_ih=enc_w_ih, enc_w_hh=enc_w_hh,
        enc_b_ih=enc_b_ih, enc_b_hh=enc_b_hh,
        dec_w_ih=dec_w_ih, dec_w_hh=dec_w_hh,
        dec_b_ih=dec_b_ih, dec_b_hh=dec_b_hh,
        w_cat=init(ks[9], (2, HIDDEN, HIDDEN)),      # [h-half, ctx-half]
        b_cat=init(ks[10], (1, HIDDEN)),
        w_out=w_out_pad,
        b_out=b_out_pad,
    )


if __name__ == "__main__":
    key = jax.random.PRNGKey(0)
    pkey, skey = jax.random.split(key)
    params = make_params(pkey)

    input_seq = jax.random.randint(skey, (SEQ,), 0, VOCAB, dtype=jnp.int32)
    input_length = jnp.array([SEQ], dtype=jnp.int32)

    all_tokens, all_scores = greedy_search_decoder(
        input_seq, input_length, MAX_LENGTH, params)
    jax.block_until_ready((all_tokens, all_scores))

    assert all_tokens.shape == (MAX_LENGTH,) and all_tokens.dtype == jnp.int32
    assert all_scores.shape == (MAX_LENGTH,) and all_scores.dtype == jnp.float32
    assert bool(jnp.all((all_tokens >= 0) & (all_tokens < VOCAB)))
    assert bool(jnp.all(jnp.isfinite(all_scores)))
    print("KERNEL_OK")
</pallas_src>

<mosaic_0001>
module attributes {stable_mosaic.version = 11 : i64} {
  func.func @kernel(%arg0: memref<1xi32, #tpu.memory_space<smem>>, %arg1: memref<8x1xi32, #tpu.memory_space<vmem>>, %arg2: memref<128x32xf32, #tpu.memory_space<vmem>>, %arg3: memref<32x128xf32, #tpu.memory_space<vmem>>, %arg4: memref<32x128xf32, #tpu.memory_space<vmem>>, %arg5: memref<1x128xf32, #tpu.memory_space<vmem>>, %arg6: memref<1x128xf32, #tpu.memory_space<vmem>>, %arg7: memref<32x128xf32, #tpu.memory_space<vmem>>, %arg8: memref<32x128xf32, #tpu.memory_space<vmem>>, %arg9: memref<1x128xf32, #tpu.memory_space<vmem>>, %arg10: memref<1x128xf32, #tpu.memory_space<vmem>>, %arg11: memref<2x32x32xf32, #tpu.memory_space<vmem>>, %arg12: memref<1x32xf32, #tpu.memory_space<vmem>>, %arg13: memref<32x128xf32, #tpu.memory_space<vmem>>, %arg14: memref<1x128xf32, #tpu.memory_space<vmem>>, %arg15: memref<1x128xi32, #tpu.memory_space<vmem>>, %arg16: memref<1x128xf32, #tpu.memory_space<vmem>>, %arg17: memref<8x32xf32, #tpu.memory_space<vmem>>) attributes {dimension_semantics = [], scalar_prefetch = 0 : i64, scratch_operands = 1 : i64, tpu.core_type = #tpu.core_type<tc>} {
    %c0 = arith.constant 0 : index
    %0 = memref.load %arg0[%c0] : memref<1xi32, #tpu.memory_space<smem>>
    %1 = tpu.iota {dimensions = array<i32: 1>} : vector<1x128xi32>
    %2 = tpu.iota {dimensions = array<i32: 1>} : vector<8x128xi32>
    %c0_0 = arith.constant 0 : index
    %c0_1 = arith.constant 0 : index
    %3 = vector.load %arg1[%c0_0, %c0_1] : memref<8x1xi32, #tpu.memory_space<vmem>>, vector<8x1xi32>
    %4 = vector.broadcast %3 : vector<8x1xi32> to vector<8x128xi32>
    %5 = arith.cmpi eq, %2, %4 : vector<8x128xi32>
    %6 = arith.extui %5 : vector<8x128xi1> to vector<8x128xi32>
    %7 = arith.sitofp %6 : vector<8x128xi32> to vector<8x128xf32>
    %c0_2 = arith.constant 0 : index
    %c0_3 = arith.constant 0 : index
    %8 = vector.load %arg2[%c0_2, %c0_3] : memref<128x32xf32, #tpu.memory_space<vmem>>, vector<128x32xf32>
    %cst = arith.constant dense<0.000000e+00> : vector<8x32xf32>
    %9 = tpu.matmul %7, %8, %cst {dimension_numbers = #tpu.dot_dimension_numbers<[1], [0], [0], [1], [0, 0, 1, 1], [], []>} : vector<8x128xf32>, vector<128x32xf32>, vector<8x32xf32> -> vector<8x32xf32>
    %c0_4 = arith.constant 0 : index
    %c0_5 = arith.constant 0 : index
    %10 = vector.load %arg3[%c0_4, %c0_5] : memref<32x128xf32, #tpu.memory_space<vmem>>, vector<32x128xf32>
    %cst_6 = arith.constant dense<0.000000e+00> : vector<8x128xf32>
    %11 = tpu.matmul %9, %10, %cst_6 {dimension_numbers = #tpu.dot_dimension_numbers<[1], [0], [0], [1], [0, 0, 1, 1], [], []>} : vector<8x32xf32>, vector<32x128xf32>, vector<8x128xf32> -> vector<8x128xf32>
    %c0_7 = arith.constant 0 : index
    %c0_8 = arith.constant 0 : index
    %12 = vector.load %arg5[%c0_7, %c0_8] : memref<1x128xf32, #tpu.memory_space<vmem>>, vector<1x128xf32>
    %13 = vector.broadcast %12 : vector<1x128xf32> to vector<8x128xf32>
    %14 = arith.addf %11, %13 : vector<8x128xf32>
    %15 = tpu.iota {dimensions = array<i32: 0>} : vector<8x32xi32>
    %16 = vector.broadcast %0 : i32 to vector<8x32xi32>
    %17 = arith.cmpi slt, %15, %16 : vector<8x32xi32>
    %18 = arith.extui %17 : vector<8x32xi1> to vector<8x32xi32>
    %19 = arith.sitofp %18 : vector<8x32xi32> to vector<8x32xf32>
    %cst_9 = arith.constant 0.000000e+00 : f32
    %20 = vector.broadcast %cst_9 : f32 to vector<1x32xf32>
    %21 = vector.extract_strided_slice %14 {offsets = [0, 0], sizes = [1, 128], strides = [1, 1]} : vector<8x128xf32> to vector<1x128xf32>
    %c0_10 = arith.constant 0 : index
    %c0_11 = arith.constant 0 : index
    %22 = vector.load %arg4[%c0_10, %c0_11] : memref<32x128xf32, #tpu.memory_space<vmem>>, vector<32x128xf32>
    %cst_12 = arith.constant dense<0.000000e+00> : vector<1x128xf32>
    %23 = tpu.matmul %20, %22, %cst_12 {dimension_numbers = #tpu.dot_dimension_numbers<[1], [0], [0], [1], [0, 0, 1, 1], [], []>} : vector<1x32xf32>, vector<32x128xf32>, vector<1x128xf32> -> vector<1x128xf32>
    %c0_13 = arith.constant 0 : index
    %c0_14 = arith.constant 0 : index
    %24 = vector.load %arg6[%c0_13, %c0_14] : memref<1x128xf32, #tpu.memory_space<vmem>>, vector<1x128xf32>
    %25 = arith.addf %23, %24 : vector<1x128xf32>
    %26 = vector.extract_strided_slice %21 {offsets = [0, 0], sizes = [1, 32], strides = [1, 1]} : vector<1x128xf32> to vector<1x32xf32>
    %27 = vector.extract_strided_slice %25 {offsets = [0, 0], sizes = [1, 32], strides = [1, 1]} : vector<1x128xf32> to vector<1x32xf32>
    %28 = arith.addf %26, %27 : vector<1x32xf32>
    %29 = arith.negf %28 : vector<1x32xf32>
    %30 = math.exp %29 : vector<1x32xf32>
    %cst_15 = arith.constant 1.000000e+00 : f32
    %31 = vector.broadcast %cst_15 : f32 to vector<1x32xf32>
    %32 = arith.addf %31, %30 : vector<1x32xf32>
    %33 = arith.divf %31, %32 : vector<1x32xf32>
    %34 = vector.extract_strided_slice %21 {offsets = [0, 32], sizes = [1, 32], strides = [1, 1]} : vector<1x128xf32> to vector<1x32xf32>
    %35 = vector.extract_strided_slice %25 {offsets = [0, 32], sizes = [1, 32], strides = [1, 1]} : vector<1x128xf32> to vector<1x32xf32>
    %36 = arith.addf %34, %35 : vector<1x32xf32>
    %37 = arith.negf %36 : vector<1x32xf32>
    %38 = math.exp %37 : vector<1x32xf32>
    %cst_16 = arith.constant 1.000000e+00 : f32
    %39 = vector.broadcast %cst_16 : f32 to vector<1x32xf32>
    %40 = arith.addf %39, %38 : vector<1x32xf32>
    %41 = arith.divf %39, %40 : vector<1x32xf32>
    %42 = vector.extract_strided_slice %21 {offsets = [0, 64], sizes = [1, 32], strides = [1, 1]} : vector<1x128xf32> to vector<1x32xf32>
    %43 = vector.extract_strided_slice %25 {offsets = [0, 64], sizes = [1, 32], strides = [1, 1]} : vector<1x128xf32> to vector<1x32xf32>
    %44 = arith.mulf %33, %43 : vector<1x32xf32>
    %45 = arith.addf %42, %44 : vector<1x32xf32>
    %46 = math.tanh %45 : vector<1x32xf32>
    %cst_17 = arith.constant 1.000000e+00 : f32
    %47 = vector.broadcast %cst_17 : f32 to vector<1x32xf32>
    %48 = arith.subf %47, %41 : vector<1x32xf32>
    %49 = arith.mulf %48, %46 : vector<1x32xf32>
    %50 = arith.mulf %41, %20 : vector<1x32xf32>
    %51 = arith.addf %49, %50 : vector<1x32xf32>
    %52 = vector.extract_strided_slice %19 {offsets = [0, 0], sizes = [1, 32], strides = [1, 1]} : vector<8x32xf32> to vector<1x32xf32>
    %53 = arith.mulf %52, %51 : vector<1x32xf32>
    %c0_18 = arith.constant 0 : index
    %c0_19 = arith.constant 0 : index
    %54 = vector.load %arg17[%c0_18, %c0_19] : memref<8x32xf32, #tpu.memory_space<vmem>>, vector<1x32xf32>
    tpu.vector_store %arg17[%c0_18, %c0_19], %53 {strides = array<i32>} : memref<8x32xf32, #tpu.memory_space<vmem>>, vector<1x32xf32>,
    %cst_20 = arith.constant 1.000000e+00 : f32
    %55 = vector.broadcast %cst_20 : f32 to vector<1x32xf32>
    %56 = arith.subf %55, %52 : vector<1x32xf32>
    %57 = arith.mulf %56, %20 : vector<1x32xf32>
    %58 = arith.addf %53, %57 : vector<1x32xf32>
    %59 = vector.extract_strided_slice %14 {offsets = [1, 0], sizes = [1, 128], strides = [1, 1]} : vector<8x128xf32> to vector<1x128xf32>
    %c0_21 = arith.constant 0 : index
    %c0_22 = arith.constant 0 : index
    %60 = vector.load %arg4[%c0_21, %c0_22] : memref<32x128xf32, #tpu.memory_space<vmem>>, vector<32x128xf32>
    %cst_23 = arith.constant dense<0.000000e+00> : vector<1x128xf32>
    %61 = tpu.matmul %58, %60, %cst_23 {dimension_numbers = #tpu.dot_dimension_numbers<[1], [0], [0], [1], [0, 0, 1, 1], [], []>} : vector<1x32xf32>, vector<32x128xf32>, vector<1x128xf32> -> vector<1x128xf32>
    %c0_24 = arith.constant 0 : index
    %c0_25 = arith.constant 0 : index
    %62 = vector.load %arg6[%c0_24, %c0_25] : memref<1x128xf32, #tpu.memory_space<vmem>>, vector<1x128xf32>
    %63 = arith.addf %61, %62 : vector<1x128xf32>
    %64 = vector.extract_strided_slice %59 {offsets = [0, 0], sizes = [1, 32], strides = [1, 1]} : vector<1x128xf32> to vector<1x32xf32>
    %65 = vector.extract_strided_slice %63 {offsets = [0, 0], sizes = [1, 32], strides = [1, 1]} : vector<1x128xf32> to vector<1x32xf32>
    %66 = arith.addf %64, %65 : vector<1x32xf32>
    %67 = arith.negf %66 : vector<1x32xf32>
    %68 = math.exp %67 : vector<1x32xf32>
    %cst_26 = arith.constant 1.000000e+00 : f32
    %69 = vector.broadcast %cst_26 : f32 to vector<1x32xf32>
    %70 = arith.addf %69, %68 : vector<1x32xf32>
    %71 = arith.divf %69, %70 : vector<1x32xf32>
    %72 = vector.extract_strided_slice %59 {offsets = [0, 32], sizes = [1, 32], strides = [1, 1]} : vector<1x128xf32> to vector<1x32xf32>
    %73 = vector.extract_strided_slice %63 {offsets = [0, 32], sizes = [1, 32], strides = [1, 1]} : vector<1x128xf32> to vector<1x32xf32>
    %74 = arith.addf %72, %73 : vector<1x32xf32>
    %75 = arith.negf %74 : vector<1x32xf32>
    %76 = math.exp %75 : vector<1x32xf32>
    %cst_27 = arith.constant 1.000000e+00 : f32
    %77 = vector.broadcast %cst_27 : f32 to vector<1x32xf32>
    %78 = arith.addf %77, %76 : vector<1x32xf32>
    %79 = arith.divf %77, %78 : vector<1x32xf32>
    %80 = vector.extract_strided_slice %59 {offsets = [0, 64], sizes = [1, 32], strides = [1, 1]} : vector<1x128xf32> to vector<1x32xf32>
    %81 = vector.extract_strided_slice %63 {offsets = [0, 64], sizes = [1, 32], strides = [1, 1]} : vector<1x128xf32> to vector<1x32xf32>
    %82 = arith.mulf %71, %81 : vector<1x32xf32>
    %83 = arith.addf %80, %82 : vector<1x32xf32>
    %84 = math.tanh %83 : vector<1x32xf32>
    %cst_28 = arith.constant 1.000000e+00 : f32
    %85 = vector.broadcast %cst_28 : f32 to vector<1x32xf32>
    %86 = arith.subf %85, %79 : vector<1x32xf32>
    %87 = arith.mulf %86, %84 : vector<1x32xf32>
    %88 = arith.mulf %79, %58 : vector<1x32xf32>
    %89 = arith.addf %87, %88 : vector<1x32xf32>
    %90 = vector.extract_strided_slice %19 {offsets = [1, 0], sizes = [1, 32], strides = [1, 1]} : vector<8x32xf32> to vector<1x32xf32>
    %91 = arith.mulf %90, %89 : vector<1x32xf32>
    %c1 = arith.constant 1 : index
    %c0_29 = arith.constant 0 : index
    %92 = vector.load %arg17[%c1, %c0_29] : memref<8x32xf32, #tpu.memory_space<vmem>>, vector<1x32xf32>
    tpu.vector_store %arg17[%c1, %c0_29], %91 {strides = array<i32>} : memref<8x32xf32, #tpu.memory_space<vmem>>, vector<1x32xf32>,
    %cst_30 = arith.constant 1.000000e+00 : f32
    %93 = vector.broadcast %cst_30 : f32 to vector<1x32xf32>
    %94 = arith.subf %93, %90 : vector<1x32xf32>
    %95 = arith.mulf %94, %58 : vector<1x32xf32>
    %96 = arith.addf %91, %95 : vector<1x32xf32>
    %97 = vector.extract_strided_slice %14 {offsets = [2, 0], sizes = [1, 128], strides = [1, 1]} : vector<8x128xf32> to vector<1x128xf32>
    %c0_31 = arith.constant 0 : index
    %c0_32 = arith.constant 0 : index
    %98 = vector.load %arg4[%c0_31, %c0_32] : memref<32x128xf32, #tpu.memory_space<vmem>>, vector<32x128xf32>
    %cst_33 = arith.constant dense<0.000000e+00> : vector<1x128xf32>
    %99 = tpu.matmul %96, %98, %cst_33 {dimension_numbers = #tpu.dot_dimension_numbers<[1], [0], [0], [1], [0, 0, 1, 1], [], []>} : vector<1x32xf32>, vector<32x128xf32>, vector<1x128xf32> -> vector<1x128xf32>
    %c0_34 = arith.constant 0 : index
    %c0_35 = arith.constant 0 : index
    %100 = vector.load %arg6[%c0_34, %c0_35] : memref<1x128xf32, #tpu.memory_space<vmem>>, vector<1x128xf32>
    %101 = arith.addf %99, %100 : vector<1x128xf32>
    %102 = vector.extract_strided_slice %97 {offsets = [0, 0], sizes = [1, 32], strides = [1, 1]} : vector<1x128xf32> to vector<1x32xf32>
    %103 = vector.extract_strided_slice %101 {offsets = [0, 0], sizes = [1, 32], strides = [1, 1]} : vector<1x128xf32> to vector<1x32xf32>
    %104 = arith.addf %102, %103 : vector<1x32xf32>
    %105 = arith.negf %104 : vector<1x32xf32>
    %106 = math.exp %105 : vector<1x32xf32>
    %cst_36 = arith.constant 1.000000e+00 : f32
    %107 = vector.broadcast %cst_36 : f32 to vector<1x32xf32>
    %108 = arith.addf %107, %106 : vector<1x32xf32>
    %109 = arith.divf %107, %108 : vector<1x32xf32>
    %110 = vector.extract_strided_slice %97 {offsets = [0, 32], sizes = [1, 32], strides = [1, 1]} : vector<1x128xf32> to vector<1x32xf32>
    %111 = vector.extract_strided_slice %101 {offsets = [0, 32], sizes = [1, 32], strides = [1, 1]} : vector<1x128xf32> to vector<1x32xf32>
    %112 = arith.addf %110, %111 : vector<1x32xf32>
    %113 = arith.negf %112 : vector<1x32xf32>
    %114 = math.exp %113 : vector<1x32xf32>
    %cst_37 = arith.constant 1.000000e+00 : f32
    %115 = vector.broadcast %cst_37 : f32 to vector<1x32xf32>
    %116 = arith.addf %115, %114 : vector<1x32xf32>
    %117 = arith.divf %115, %116 : vector<1x32xf32>
    %118 = vector.extract_strided_slice %97 {offsets = [0, 64], sizes = [1, 32], strides = [1, 1]} : vector<1x128xf32> to vector<1x32xf32>
    %119 = vector.extract_strided_slice %101 {offsets = [0, 64], sizes = [1, 32], strides = [1, 1]} : vector<1x128xf32> to vector<1x32xf32>
    %120 = arith.mulf %109, %119 : vector<1x32xf32>
    %121 = arith.addf %118, %120 : vector<1x32xf32>
    %122 = math.tanh %121 : vector<1x32xf32>
    %cst_38 = arith.constant 1.000000e+00 : f32
    %123 = vector.broadcast %cst_38 : f32 to vector<1x32xf32>
    %124 = arith.subf %123, %117 : vector<1x32xf32>
    %125 = arith.mulf %124, %122 : vector<1x32xf32>
    %126 = arith.mulf %117, %96 : vector<1x32xf32>
    %127 = arith.addf %125, %126 : vector<1x32xf32>
    %128 = vector.extract_strided_slice %19 {offsets = [2, 0], sizes = [1, 32], strides = [1, 1]} : vector<8x32xf32> to vector<1x32xf32>
    %129 = arith.mulf %128, %127 : vector<1x32xf32>
    %c2 = arith.constant 2 : index
    %c0_39 = arith.constant 0 : index
    %130 = vector.load %arg17[%c2, %c0_39] : memref<8x32xf32, #tpu.memory_space<vmem>>, vector<1x32xf32>
    tpu.vector_store %arg17[%c2, %c0_39], %129 {strides = array<i32>} : memref<8x32xf32, #tpu.memory_space<vmem>>, vector<1x32xf32>,
    %cst_40 = arith.constant 1.000000e+00 : f32
    %131 = vector.broadcast %cst_40 : f32 to vector<1x32xf32>
    %132 = arith.subf %131, %128 : vector<1x32xf32>
    %133 = arith.mulf %132, %96 : vector<1x32xf32>
    %134 = arith.addf %129, %133 : vector<1x32xf32>
    %135 = vector.extract_strided_slice %14 {offsets = [3, 0], sizes = [1, 128], strides = [1, 1]} : vector<8x128xf32> to vector<1x128xf32>
    %c0_41 = arith.constant 0 : index
    %c0_42 = arith.constant 0 : index
    %136 = vector.load %arg4[%c0_41, %c0_42] : memref<32x128xf32, #tpu.memory_space<vmem>>, vector<32x128xf32>
    %cst_43 = arith.constant dense<0.000000e+00> : vector<1x128xf32>
    %137 = tpu.matmul %134, %136, %cst_43 {dimension_numbers = #tpu.dot_dimension_numbers<[1], [0], [0], [1], [0, 0, 1, 1], [], []>} : vector<1x32xf32>, vector<32x128xf32>, vector<1x128xf32> -> vector<1x128xf32>
    %c0_44 = arith.constant 0 : index
    %c0_45 = arith.constant 0 : index
    %138 = vector.load %arg6[%c0_44, %c0_45] : memref<1x128xf32, #tpu.memory_space<vmem>>, vector<1x128xf32>
    %139 = arith.addf %137, %138 : vector<1x128xf32>
    %140 = vector.extract_strided_slice %135 {offsets = [0, 0], sizes = [1, 32], strides = [1, 1]} : vector<1x128xf32> to vector<1x32xf32>
    %141 = vector.extract_strided_slice %139 {offsets = [0, 0], sizes = [1, 32], strides = [1, 1]} : vector<1x128xf32> to vector<1x32xf32>
    %142 = arith.addf %140, %141 : vector<1x32xf32>
    %143 = arith.negf %142 : vector<1x32xf32>
    %144 = math.exp %143 : vector<1x32xf32>
    %cst_46 = arith.constant 1.000000e+00 : f32
    %145 = vector.broadcast %cst_46 : f32 to vector<1x32xf32>
    %146 = arith.addf %145, %144 : vector<1x32xf32>
    %147 = arith.divf %145, %146 : vector<1x32xf32>
    %148 = vector.extract_strided_slice %135 {offsets = [0, 32], sizes = [1, 32], strides = [1, 1]} : vector<1x128xf32> to vector<1x32xf32>
    %149 = vector.extract_strided_slice %139 {offsets = [0, 32], sizes = [1, 32], strides = [1, 1]} : vector<1x128xf32> to vector<1x32xf32>
    %150 = arith.addf %148, %149 : vector<1x32xf32>
    %151 = arith.negf %150 : vector<1x32xf32>
    %152 = math.exp %151 : vector<1x32xf32>
    %cst_47 = arith.constant 1.000000e+00 : f32
    %153 = vector.broadcast %cst_47 : f32 to vector<1x32xf32>
    %154 = arith.addf %153, %152 : vector<1x32xf32>
    %155 = arith.divf %153, %154 : vector<1x32xf32>
    %156 = vector.extract_strided_slice %135 {offsets = [0, 64], sizes = [1, 32], strides = [1, 1]} : vector<1x128xf32> to vector<1x32xf32>
    %157 = vector.extract_strided_slice %139 {offsets = [0, 64], sizes = [1, 32], strides = [1, 1]} : vector<1x128xf32> to vector<1x32xf32>
    %158 = arith.mulf %147, %157 : vector<1x32xf32>
    %159 = arith.addf %156, %158 : vector<1x32xf32>
    %160 = math.tanh %159 : vector<1x32xf32>
    %cst_48 = arith.constant 1.000000e+00 : f32
    %161 = vector.broadcast %cst_48 : f32 to vector<1x32xf32>
    %162 = arith.subf %161, %155 : vector<1x32xf32>
    %163 = arith.mulf %162, %160 : vector<1x32xf32>
    %164 = arith.mulf %155, %134 : vector<1x32xf32>
    %165 = arith.addf %163, %164 : vector<1x32xf32>
    %166 = vector.extract_strided_slice %19 {offsets = [3, 0], sizes = [1, 32], strides = [1, 1]} : vector<8x32xf32> to vector<1x32xf32>
    %167 = arith.mulf %166, %165 : vector<1x32xf32>
    %c3 = arith.constant 3 : index
    %c0_49 = arith.constant 0 : index
    %168 = vector.load %arg17[%c3, %c0_49] : memref<8x32xf32, #tpu.memory_space<vmem>>, vector<1x32xf32>
    tpu.vector_store %arg17[%c3, %c0_49], %167 {strides = array<i32>} : memref<8x32xf32, #tpu.memory_space<vmem>>, vector<1x32xf32>,
    %cst_50 = arith.constant 1.000000e+00 : f32
    %169 = vector.broadcast %cst_50 : f32 to vector<1x32xf32>
    %170 = arith.subf %169, %166 : vector<1x32xf32>
    %171 = arith.mulf %170, %134 : vector<1x32xf32>
    %172 = arith.addf %167, %171 : vector<1x32xf32>
    %173 = vector.extract_strided_slice %14 {offsets = [4, 0], sizes = [1, 128], strides = [1, 1]} : vector<8x128xf32> to vector<1x128xf32>
    %c0_51 = arith.constant 0 : index
    %c0_52 = arith.constant 0 : index
    %174 = vector.load %arg4[%c0_51, %c0_52] : memref<32x128xf32, #tpu.memory_space<vmem>>, vector<32x128xf32>
    %cst_53 = arith.constant dense<0.000000e+00> : vector<1x128xf32>
    %175 = tpu.matmul %172, %174, %cst_53 {dimension_numbers = #tpu.dot_dimension_numbers<[1], [0], [0], [1], [0, 0, 1, 1], [], []>} : vector<1x32xf32>, vector<32x128xf32>, vector<1x128xf32> -> vector<1x128xf32>
    %c0_54 = arith.constant 0 : index
    %c0_55 = arith.constant 0 : index
    %176 = vector.load %arg6[%c0_54, %c0_55] : memref<1x128xf32, #tpu.memory_space<vmem>>, vector<1x128xf32>
    %177 = arith.addf %175, %176 : vector<1x128xf32>
    %178 = vector.extract_strided_slice %173 {offsets = [0, 0], sizes = [1, 32], strides = [1, 1]} : vector<1x128xf32> to vector<1x32xf32>
    %179 = vector.extract_strided_slice %177 {offsets = [0, 0], sizes = [1, 32], strides = [1, 1]} : vector<1x128xf32> to vector<1x32xf32>
    %180 = arith.addf %178, %179 : vector<1x32xf32>
    %181 = arith.negf %180 : vector<1x32xf32>
    %182 = math.exp %181 : vector<1x32xf32>
    %cst_56 = arith.constant 1.000000e+00 : f32
    %183 = vector.broadcast %cst_56 : f32 to vector<1x32xf32>
    %184 = arith.addf %183, %182 : vector<1x32xf32>
    %185 = arith.divf %183, %184 : vector<1x32xf32>
    %186 = vector.extract_strided_slice %173 {offsets = [0, 32], sizes = [1, 32], strides = [1, 1]} : vector<1x128xf32> to vector<1x32xf32>
    %187 = vector.extract_strided_slice %177 {offsets = [0, 32], sizes = [1, 32], strides = [1, 1]} : vector<1x128xf32> to vector<1x32xf32>
    %188 = arith.addf %186, %187 : vector<1x32xf32>
    %189 = arith.negf %188 : vector<1x32xf32>
    %190 = math.exp %189 : vector<1x32xf32>
    %cst_57 = arith.constant 1.000000e+00 : f32
    %191 = vector.broadcast %cst_57 : f32 to vector<1x32xf32>
    %192 = arith.addf %191, %190 : vector<1x32xf32>
    %193 = arith.divf %191, %192 : vector<1x32xf32>
    %194 = vector.extract_strided_slice %173 {offsets = [0, 64], sizes = [1, 32], strides = [1, 1]} : vector<1x128xf32> to vector<1x32xf32>
    %195 = vector.extract_strided_slice %177 {offsets = [0, 64], sizes = [1, 32], strides = [1, 1]} : vector<1x128xf32> to vector<1x32xf32>
    %196 = arith.mulf %185, %195 : vector<1x32xf32>
    %197 = arith.addf %194, %196 : vector<1x32xf32>
    %198 = math.tanh %197 : vector<1x32xf32>
    %cst_58 = arith.constant 1.000000e+00 : f32
    %199 = vector.broadcast %cst_58 : f32 to vector<1x32xf32>
    %200 = arith.subf %199, %193 : vector<1x32xf32>
    %201 = arith.mulf %200, %198 : vector<1x32xf32>
    %202 = arith.mulf %193, %172 : vector<1x32xf32>
    %203 = arith.addf %201, %202 : vector<1x32xf32>
    %204 = vector.extract_strided_slice %19 {offsets = [4, 0], sizes = [1, 32], strides = [1, 1]} : vector<8x32xf32> to vector<1x32xf32>
    %205 = arith.mulf %204, %203 : vector<1x32xf32>
    %c4 = arith.constant 4 : index
    %c0_59 = arith.constant 0 : index
    %206 = vector.load %arg17[%c4, %c0_59] : memref<8x32xf32, #tpu.memory_space<vmem>>, vector<1x32xf32>
    tpu.vector_store %arg17[%c4, %c0_59], %205 {strides = array<i32>} : memref<8x32xf32, #tpu.memory_space<vmem>>, vector<1x32xf32>,
    %cst_60 = arith.constant 1.000000e+00 : f32
    %207 = vector.broadcast %cst_60 : f32 to vector<1x32xf32>
    %208 = arith.subf %207, %204 : vector<1x32xf32>
    %209 = arith.mulf %208, %172 : vector<1x32xf32>
    %210 = arith.addf %205, %209 : vector<1x32xf32>
    %211 = vector.extract_strided_slice %14 {offsets = [5, 0], sizes = [1, 128], strides = [1, 1]} : vector<8x128xf32> to vector<1x128xf32>
    %c0_61 = arith.constant 0 : index
    %c0_62 = arith.constant 0 : index
    %212 = vector.load %arg4[%c0_61, %c0_62] : memref<32x128xf32, #tpu.memory_space<vmem>>, vector<32x128xf32>
    %cst_63 = arith.constant dense<0.000000e+00> : vector<1x128xf32>
    %213 = tpu.matmul %210, %212, %cst_63 {dimension_numbers = #tpu.dot_dimension_numbers<[1], [0], [0], [1], [0, 0, 1, 1], [], []>} : vector<1x32xf32>, vector<32x128xf32>, vector<1x128xf32> -> vector<1x128xf32>
    %c0_64 = arith.constant 0 : index
    %c0_65 = arith.constant 0 : index
    %214 = vector.load %arg6[%c0_64, %c0_65] : memref<1x128xf32, #tpu.memory_space<vmem>>, vector<1x128xf32>
    %215 = arith.addf %213, %214 : vector<1x128xf32>
    %216 = vector.extract_strided_slice %211 {offsets = [0, 0], sizes = [1, 32], strides = [1, 1]} : vector<1x128xf32> to vector<1x32xf32>
    %217 = vector.extract_strided_slice %215 {offsets = [0, 0], sizes = [1, 32], strides = [1, 1]} : vector<1x128xf32> to vector<1x32xf32>
    %218 = arith.addf %216, %217 : vector<1x32xf32>
    %219 = arith.negf %218 : vector<1x32xf32>
    %220 = math.exp %219 : vector<1x32xf32>
    %cst_66 = arith.constant 1.000000e+00 : f32
    %221 = vector.broadcast %cst_66 : f32 to vector<1x32xf32>
    %222 = arith.addf %221, %220 : vector<1x32xf32>
    %223 = arith.divf %221, %222 : vector<1x32xf32>
    %224 = vector.extract_strided_slice %211 {offsets = [0, 32], sizes = [1, 32], strides = [1, 1]} : vector<1x128xf32> to vector<1x32xf32>
    %225 = vector.extract_strided_slice %215 {offsets = [0, 32], sizes = [1, 32], strides = [1, 1]} : vector<1x128xf32> to vector<1x32xf32>
    %226 = arith.addf %224, %225 : vector<1x32xf32>
    %227 = arith.negf %226 : vector<1x32xf32>
    %228 = math.exp %227 : vector<1x32xf32>
    %cst_67 = arith.constant 1.000000e+00 : f32
    %229 = vector.broadcast %cst_67 : f32 to vector<1x32xf32>
    %230 = arith.addf %229, %228 : vector<1x32xf32>
    %231 = arith.divf %229, %230 : vector<1x32xf32>
    %232 = vector.extract_strided_slice %211 {offsets = [0, 64], sizes = [1, 32], strides = [1, 1]} : vector<1x128xf32> to vector<1x32xf32>
    %233 = vector.extract_strided_slice %215 {offsets = [0, 64], sizes = [1, 32], strides = [1, 1]} : vector<1x128xf32> to vector<1x32xf32>
    %234 = arith.mulf %223, %233 : vector<1x32xf32>
    %235 = arith.addf %232, %234 : vector<1x32xf32>
    %236 = math.tanh %235 : vector<1x32xf32>
    %cst_68 = arith.constant 1.000000e+00 : f32
    %237 = vector.broadcast %cst_68 : f32 to vector<1x32xf32>
    %238 = arith.subf %237, %231 : vector<1x32xf32>
    %239 = arith.mulf %238, %236 : vector<1x32xf32>
    %240 = arith.mulf %231, %210 : vector<1x32xf32>
    %241 = arith.addf %239, %240 : vector<1x32xf32>
    %242 = vector.extract_strided_slice %19 {offsets = [5, 0], sizes = [1, 32], strides = [1, 1]} : vector<8x32xf32> to vector<1x32xf32>
    %243 = arith.mulf %242, %241 : vector<1x32xf32>
    %c5 = arith.constant 5 : index
    %c0_69 = arith.constant 0 : index
    %244 = vector.load %arg17[%c5, %c0_69] : memref<8x32xf32, #tpu.memory_space<vmem>>, vector<1x32xf32>
    tpu.vector_store %arg17[%c5, %c0_69], %243 {strides = array<i32>} : memref<8x32xf32, #tpu.memory_space<vmem>>, vector<1x32xf32>,
    %cst_70 = arith.constant 1.000000e+00 : f32
    %245 = vector.broadcast %cst_70 : f32 to vector<1x32xf32>
    %246 = arith.subf %245, %242 : vector<1x32xf32>
    %247 = arith.mulf %246, %210 : vector<1x32xf32>
    %248 = arith.addf %243, %247 : vector<1x32xf32>
    %249 = vector.extract_strided_slice %14 {offsets = [6, 0], sizes = [1, 128], strides = [1, 1]} : vector<8x128xf32> to vector<1x128xf32>
    %c0_71 = arith.constant 0 : index
    %c0_72 = arith.constant 0 : index
    %250 = vector.load %arg4[%c0_71, %c0_72] : memref<32x128xf32, #tpu.memory_space<vmem>>, vector<32x128xf32>
    %cst_73 = arith.constant dense<0.000000e+00> : vector<1x128xf32>
    %251 = tpu.matmul %248, %250, %cst_73 {dimension_numbers = #tpu.dot_dimension_numbers<[1], [0], [0], [1], [0, 0, 1, 1], [], []>} : vector<1x32xf32>, vector<32x128xf32>, vector<1x128xf32> -> vector<1x128xf32>
    %c0_74 = arith.constant 0 : index
    %c0_75 = arith.constant 0 : index
    %252 = vector.load %arg6[%c0_74, %c0_75] : memref<1x128xf32, #tpu.memory_space<vmem>>, vector<1x128xf32>
    %253 = arith.addf %251, %252 : vector<1x128xf32>
    %254 = vector.extract_strided_slice %249 {offsets = [0, 0], sizes = [1, 32], strides = [1, 1]} : vector<1x128xf32> to vector<1x32xf32>
    %255 = vector.extract_strided_slice %253 {offsets = [0, 0], sizes = [1, 32], strides = [1, 1]} : vector<1x128xf32> to vector<1x32xf32>
    %256 = arith.addf %254, %255 : vector<1x32xf32>
    %257 = arith.negf %256 : vector<1x32xf32>
    %258 = math.exp %257 : vector<1x32xf32>
    %cst_76 = arith.constant 1.000000e+00 : f32
    %259 = vector.broadcast %cst_76 : f32 to vector<1x32xf32>
    %260 = arith.addf %259, %258 : vector<1x32xf32>
    %261 = arith.divf %259, %260 : vector<1x32xf32>
    %262 = vector.extract_strided_slice %249 {offsets = [0, 32], sizes = [1, 32], strides = [1, 1]} : vector<1x128xf32> to vector<1x32xf32>
    %263 = vector.extract_strided_slice %253 {offsets = [0, 32], sizes = [1, 32], strides = [1, 1]} : vector<1x128xf32> to vector<1x32xf32>
    %264 = arith.addf %262, %263 : vector<1x32xf32>
    %265 = arith.negf %264 : vector<1x32xf32>
    %266 = math.exp %265 : vector<1x32xf32>
    %cst_77 = arith.constant 1.000000e+00 : f32
    %267 = vector.broadcast %cst_77 : f32 to vector<1x32xf32>
    %268 = arith.addf %267, %266 : vector<1x32xf32>
    %269 = arith.divf %267, %268 : vector<1x32xf32>
    %270 = vector.extract_strided_slice %249 {offsets = [0, 64], sizes = [1, 32], strides = [1, 1]} : vector<1x128xf32> to vector<1x32xf32>
    %271 = vector.extract_strided_slice %253 {offsets = [0, 64], sizes = [1, 32], strides = [1, 1]} : vector<1x128xf32> to vector<1x32xf32>
    %272 = arith.mulf %261, %271 : vector<1x32xf32>
    %273 = arith.addf %270, %272 : vector<1x32xf32>
    %274 = math.tanh %273 : vector<1x32xf32>
    %cst_78 = arith.constant 1.000000e+00 : f32
    %275 = vector.broadcast %cst_78 : f32 to vector<1x32xf32>
    %276 = arith.subf %275, %269 : vector<1x32xf32>
    %277 = arith.mulf %276, %274 : vector<1x32xf32>
    %278 = arith.mulf %269, %248 : vector<1x32xf32>
    %279 = arith.addf %277, %278 : vector<1x32xf32>
    %280 = vector.extract_strided_slice %19 {offsets = [6, 0], sizes = [1, 32], strides = [1, 1]} : vector<8x32xf32> to vector<1x32xf32>
    %281 = arith.mulf %280, %279 : vector<1x32xf32>
    %c6 = arith.constant 6 : index
    %c0_79 = arith.constant 0 : index
    %282 = vector.load %arg17[%c6, %c0_79] : memref<8x32xf32, #tpu.memory_space<vmem>>, vector<1x32xf32>
    tpu.vector_store %arg17[%c6, %c0_79], %281 {strides = array<i32>} : memref<8x32xf32, #tpu.memory_space<vmem>>, vector<1x32xf32>,
    %cst_80 = arith.constant 1.000000e+00 : f32
    %283 = vector.broadcast %cst_80 : f32 to vector<1x32xf32>
    %284 = arith.subf %283, %280 : vector<1x32xf32>
    %285 = arith.mulf %284, %248 : vector<1x32xf32>
    %286 = arith.addf %281, %285 : vector<1x32xf32>
    %287 = vector.extract_strided_slice %14 {offsets = [7, 0], sizes = [1, 128], strides = [1, 1]} : vector<8x128xf32> to vector<1x128xf32>
    %c0_81 = arith.constant 0 : index
    %c0_82 = arith.constant 0 : index
    %288 = vector.load %arg4[%c0_81, %c0_82] : memref<32x128xf32, #tpu.memory_space<vmem>>, vector<32x128xf32>
    %cst_83 = arith.constant dense<0.000000e+00> : vector<1x128xf32>
    %289 = tpu.matmul %286, %288, %cst_83 {dimension_numbers = #tpu.dot_dimension_numbers<[1], [0], [0], [1], [0, 0, 1, 1], [], []>} : vector<1x32xf32>, vector<32x128xf32>, vector<1x128xf32> -> vector<1x128xf32>
    %c0_84 = arith.constant 0 : index
    %c0_85 = arith.constant 0 : index
    %290 = vector.load %arg6[%c0_84, %c0_85] : memref<1x128xf32, #tpu.memory_space<vmem>>, vector<1x128xf32>
    %291 = arith.addf %289, %290 : vector<1x128xf32>
    %292 = vector.extract_strided_slice %287 {offsets = [0, 0], sizes = [1, 32], strides = [1, 1]} : vector<1x128xf32> to vector<1x32xf32>
    %293 = vector.extract_strided_slice %291 {offsets = [0, 0], sizes = [1, 32], strides = [1, 1]} : vector<1x128xf32> to vector<1x32xf32>
    %294 = arith.addf %292, %293 : vector<1x32xf32>
    %295 = arith.negf %294 : vector<1x32xf32>
    %296 = math.exp %295 : vector<1x32xf32>
    %cst_86 = arith.constant 1.000000e+00 : f32
    %297 = vector.broadcast %cst_86 : f32 to vector<1x32xf32>
    %298 = arith.addf %297, %296 : vector<1x32xf32>
    %299 = arith.divf %297, %298 : vector<1x32xf32>
    %300 = vector.extract_strided_slice %287 {offsets = [0, 32], sizes = [1, 32], strides = [1, 1]} : vector<1x128xf32> to vector<1x32xf32>
    %301 = vector.extract_strided_slice %291 {offsets = [0, 32], sizes = [1, 32], strides = [1, 1]} : vector<1x128xf32> to vector<1x32xf32>
    %302 = arith.addf %300, %301 : vector<1x32xf32>
    %303 = arith.negf %302 : vector<1x32xf32>
    %304 = math.exp %303 : vector<1x32xf32>
    %cst_87 = arith.constant 1.000000e+00 : f32
    %305 = vector.broadcast %cst_87 : f32 to vector<1x32xf32>
    %306 = arith.addf %305, %304 : vector<1x32xf32>
    %307 = arith.divf %305, %306 : vector<1x32xf32>
    %308 = vector.extract_strided_slice %287 {offsets = [0, 64], sizes = [1, 32], strides = [1, 1]} : vector<1x128xf32> to vector<1x32xf32>
    %309 = vector.extract_strided_slice %291 {offsets = [0, 64], sizes = [1, 32], strides = [1, 1]} : vector<1x128xf32> to vector<1x32xf32>
    %310 = arith.mulf %299, %309 : vector<1x32xf32>
    %311 = arith.addf %308, %310 : vector<1x32xf32>
    %312 = math.tanh %311 : vector<1x32xf32>
    %cst_88 = arith.constant 1.000000e+00 : f32
    %313 = vector.broadcast %cst_88 : f32 to vector<1x32xf32>
    %314 = arith.subf %313, %307 : vector<1x32xf32>
    %315 = arith.mulf %314, %312 : vector<1x32xf32>
    %316 = arith.mulf %307, %286 : vector<1x32xf32>
    %317 = arith.addf %315, %316 : vector<1x32xf32>
    %318 = vector.extract_strided_slice %19 {offsets = [7, 0], sizes = [1, 32], strides = [1, 1]} : vector<8x32xf32> to vector<1x32xf32>
    %319 = arith.mulf %318, %317 : vector<1x32xf32>
    %c7 = arith.constant 7 : index
    %c0_89 = arith.constant 0 : index
    %320 = vector.load %arg17[%c7, %c0_89] : memref<8x32xf32, #tpu.memory_space<vmem>>, vector<1x32xf32>
    tpu.vector_store %arg17[%c7, %c0_89], %319 {strides = array<i32>} : memref<8x32xf32, #tpu.memory_space<vmem>>, vector<1x32xf32>,
    %cst_90 = arith.constant 1.000000e+00 : f32
    %321 = vector.broadcast %cst_90 : f32 to vector<1x32xf32>
    %322 = arith.subf %321, %318 : vector<1x32xf32>
    %323 = arith.mulf %322, %286 : vector<1x32xf32>
    %324 = arith.addf %319, %323 : vector<1x32xf32>
    %c0_91 = arith.constant 0 : index
    %c0_92 = arith.constant 0 : index
    %325 = vector.load %arg17[%c0_91, %c0_92] : memref<8x32xf32, #tpu.memory_space<vmem>>, vector<8x32xf32>
    %c1_93 = arith.constant 1 : index
    %c0_94 = arith.constant 0 : index
    %326 = vector.load %arg2[%c1_93, %c0_94] : memref<128x32xf32, #tpu.memory_space<vmem>>, vector<1x32xf32>
    %c0_i32 = arith.constant 0 : i32
    %327 = vector.broadcast %c0_i32 : i32 to vector<1x128xi32>
    %cst_95 = arith.constant 0.000000e+00 : f32
    %328 = vector.broadcast %cst_95 : f32 to vector<1x128xf32>
    %c0_i32_96 = arith.constant 0 : i32
    %c0_97 = arith.constant 0 : index
    %c0_98 = arith.constant 0 : index
    %329 = vector.load %arg7[%c0_97, %c0_98] : memref<32x128xf32, #tpu.memory_space<vmem>>, vector<32x128xf32>
    %cst_99 = arith.constant dense<0.000000e+00> : vector<1x128xf32>
    %330 = tpu.matmul %326, %329, %cst_99 {dimension_numbers = #tpu.dot_dimension_numbers<[1], [0], [0], [1], [0, 0, 1, 1], [], []>} : vector<1x32xf32>, vector<32x128xf32>, vector<1x128xf32> -> vector<1x128xf32>
    %c0_100 = arith.constant 0 : index
    %c0_101 = arith.constant 0 : index
    %331 = vector.load %arg9[%c0_100, %c0_101] : memref<1x128xf32, #tpu.memory_space<vmem>>, vector<1x128xf32>
    %332 = arith.addf %330, %331 : vector<1x128xf32>
    %c0_102 = arith.constant 0 : index
    %c0_103 = arith.constant 0 : index
    %333 = vector.load %arg8[%c0_102, %c0_103] : memref<32x128xf32, #tpu.memory_space<vmem>>, vector<32x128xf32>
    %cst_104 = arith.constant dense<0.000000e+00> : vector<1x128xf32>
    %334 = tpu.matmul %324, %333, %cst_104 {dimension_numbers = #tpu.dot_dimension_numbers<[1], [0], [0], [1], [0, 0, 1, 1], [], []>} : vector<1x32xf32>, vector<32x128xf32>, vector<1x128xf32> -> vector<1x128xf32>
    %c0_105 = arith.constant 0 : index
    %c0_106 = arith.constant 0 : index
    %335 = vector.load %arg10[%c0_105, %c0_106] : memref<1x128xf32, #tpu.memory_space<vmem>>, vector<1x128xf32>
    %336 = arith.addf %334, %335 : vector<1x128xf32>
    %337 = vector.extract_strided_slice %332 {offsets = [0, 0], sizes = [1, 32], strides = [1, 1]} : vector<1x128xf32> to vector<1x32xf32>
    %338 = vector.extract_strided_slice %336 {offsets = [0, 0], sizes = [1, 32], strides = [1, 1]} : vector<1x128xf32> to vector<1x32xf32>
    %339 = arith.addf %337, %338 : vector<1x32xf32>
    %340 = arith.negf %339 : vector<1x32xf32>
    %341 = math.exp %340 : vector<1x32xf32>
    %cst_107 = arith.constant 1.000000e+00 : f32
    %342 = vector.broadcast %cst_107 : f32 to vector<1x32xf32>
    %343 = arith.addf %342, %341 : vector<1x32xf32>
    %344 = arith.divf %342, %343 : vector<1x32xf32>
    %345 = vector.extract_strided_slice %332 {offsets = [0, 32], sizes = [1, 32], strides = [1, 1]} : vector<1x128xf32> to vector<1x32xf32>
    %346 = vector.extract_strided_slice %336 {offsets = [0, 32], sizes = [1, 32], strides = [1, 1]} : vector<1x128xf32> to vector<1x32xf32>
    %347 = arith.addf %345, %346 : vector<1x32xf32>
    %348 = arith.negf %347 : vector<1x32xf32>
    %349 = math.exp %348 : vector<1x32xf32>
    %cst_108 = arith.constant 1.000000e+00 : f32
    %350 = vector.broadcast %cst_108 : f32 to vector<1x32xf32>
    %351 = arith.addf %350, %349 : vector<1x32xf32>
    %352 = arith.divf %350, %351 : vector<1x32xf32>
    %353 = vector.extract_strided_slice %332 {offsets = [0, 64], sizes = [1, 32], strides = [1, 1]} : vector<1x128xf32> to vector<1x32xf32>
    %354 = vector.extract_strided_slice %336 {offsets = [0, 64], sizes = [1, 32], strides = [1, 1]} : vector<1x128xf32> to vector<1x32xf32>
    %355 = arith.mulf %344, %354 : vector<1x32xf32>
    %356 = arith.addf %353, %355 : vector<1x32xf32>
    %357 = math.tanh %356 : vector<1x32xf32>
    %cst_109 = arith.constant 1.000000e+00 : f32
    %358 = vector.broadcast %cst_109 : f32 to vector<1x32xf32>
    %359 = arith.subf %358, %352 : vector<1x32xf32>
    %360 = arith.mulf %359, %357 : vector<1x32xf32>
    %361 = arith.mulf %352, %324 : vector<1x32xf32>
    %362 = arith.addf %360, %361 : vector<1x32xf32>
    %cst_110 = arith.constant dense<0.000000e+00> : vector<1x8xf32>
    %363 = tpu.matmul %362, %325, %cst_110 {dimension_numbers = #tpu.dot_dimension_numbers<[1], [1], [0], [0], [0, 0, 1, 0], [], []>} : vector<1x32xf32>, vector<8x32xf32>, vector<1x8xf32> -> vector<1x8xf32>
    %cst_111 = arith.constant dense<0xFF800000> : vector<1xf32>
    %364 = vector.multi_reduction <maximumf>, %363, %cst_111 [1] : vector<1x8xf32> to vector<1xf32>
    %365 = vector.shape_cast %364 : vector<1xf32> to vector<1x1xf32>
    %366 = vector.broadcast %365 : vector<1x1xf32> to vector<1x8xf32>
    %367 = arith.subf %363, %366 : vector<1x8xf32>
    %368 = math.exp %367 : vector<1x8xf32>
    %cst_112 = arith.constant dense<0.000000e+00> : vector<1xf32>
    %369 = vector.multi_reduction <add>, %368, %cst_112 [1] : vector<1x8xf32> to vector<1xf32>
    %370 = vector.shape_cast %369 : vector<1xf32> to vector<1x1xf32>
    %371 = vector.broadcast %370 : vector<1x1xf32> to vector<1x8xf32>
    %372 = arith.divf %368, %371 : vector<1x8xf32>
    %cst_113 = arith.constant dense<0.000000e+00> : vector<1x32xf32>
    %373 = tpu.matmul %372, %325, %cst_113 {dimension_numbers = #tpu.dot_dimension_numbers<[1], [0], [0], [1], [0, 0, 1, 1], [], []>} : vector<1x8xf32>, vector<8x32xf32>, vector<1x32xf32> -> vector<1x32xf32>
    %c0_114 = arith.constant 0 : index
    %c0_115 = arith.constant 0 : index
    %c0_116 = arith.constant 0 : index
    %374 = vector.load %arg11[%c0_114, %c0_115, %c0_116] : memref<2x32x32xf32, #tpu.memory_space<vmem>>, vector<1x32x32xf32>
    %375 = vector.shape_cast %374 : vector<1x32x32xf32> to vector<32x32xf32>
    %cst_117 = arith.constant dense<0.000000e+00> : vector<1x32xf32>
    %376 = tpu.matmul %362, %375, %cst_117 {dimension_numbers = #tpu.dot_dimension_numbers<[1], [0], [0], [1], [0, 0, 1, 1], [], []>} : vector<1x32xf32>, vector<32x32xf32>, vector<1x32xf32> -> vector<1x32xf32>
    %c1_118 = arith.constant 1 : index
    %c0_119 = arith.constant 0 : index
    %c0_120 = arith.constant 0 : index
    %377 = vector.load %arg11[%c1_118, %c0_119, %c0_120] : memref<2x32x32xf32, #tpu.memory_space<vmem>>, vector<1x32x32xf32>
    %378 = vector.shape_cast %377 : vector<1x32x32xf32> to vector<32x32xf32>
    %cst_121 = arith.constant dense<0.000000e+00> : vector<1x32xf32>
    %379 = tpu.matmul %373, %378, %cst_121 {dimension_numbers = #tpu.dot_dimension_numbers<[1], [0], [0], [1], [0, 0, 1, 1], [], []>} : vector<1x32xf32>, vector<32x32xf32>, vector<1x32xf32> -> vector<1x32xf32>
    %380 = arith.addf %376, %379 : vector<1x32xf32>
    %c0_122 = arith.constant 0 : index
    %c0_123 = arith.constant 0 : index
    %381 = vector.load %arg12[%c0_122, %c0_123] : memref<1x32xf32, #tpu.memory_space<vmem>>, vector<1x32xf32>
    %382 = arith.addf %380, %381 : vector<1x32xf32>
    %383 = math.tanh %382 : vector<1x32xf32>
    %c0_124 = arith.constant 0 : index
    %c0_125 = arith.constant 0 : index
    %384 = vector.load %arg13[%c0_124, %c0_125] : memref<32x128xf32, #tpu.memory_space<vmem>>, vector<32x128xf32>
    %cst_126 = arith.constant dense<0.000000e+00> : vector<1x128xf32>
    %385 = tpu.matmul %383, %384, %cst_126 {dimension_numbers = #tpu.dot_dimension_numbers<[1], [0], [0], [1], [0, 0, 1, 1], [], []>} : vector<1x32xf32>, vector<32x128xf32>, vector<1x128xf32> -> vector<1x128xf32>
    %c0_127 = arith.constant 0 : index
    %c0_128 = arith.constant 0 : index
    %386 = vector.load %arg14[%c0_127, %c0_128] : memref<1x128xf32, #tpu.memory_space<vmem>>, vector<1x128xf32>
    %387 = arith.addf %385, %386 : vector<1x128xf32>
    %cst_129 = arith.constant dense<0xFF800000> : vector<1xf32>
    %388 = vector.multi_reduction <maximumf>, %387, %cst_129 [1] : vector<1x128xf32> to vector<1xf32>
    %389 = vector.shape_cast %388 : vector<1xf32> to vector<1x1xf32>
    %390 = vector.broadcast %389 : vector<1x1xf32> to vector<1x128xf32>
    %391 = arith.subf %387, %390 : vector<1x128xf32>
    %392 = math.exp %391 : vector<1x128xf32>
    %cst_130 = arith.constant dense<0.000000e+00> : vector<1xf32>
    %393 = vector.multi_reduction <add>, %392, %cst_130 [1] : vector<1x128xf32> to vector<1xf32>
    %394 = vector.shape_cast %393 : vector<1xf32> to vector<1x1xf32>
    %cst_131 = arith.constant 1.000000e+00 : f32
    %395 = vector.broadcast %cst_131 : f32 to vector<1x1xf32>
    %396 = arith.divf %395, %394 : vector<1x1xf32>
    %397 = vector.broadcast %389 : vector<1x1xf32> to vector<1x128xf32>
    %398 = arith.cmpf oeq, %387, %397 : vector<1x128xf32>
    %c128_i32 = arith.constant 128 : i32
    %399 = vector.broadcast %c128_i32 : i32 to vector<1x128xi32>
    %400 = arith.select %398, %1, %399 : vector<1x128xi1>, vector<1x128xi32>
    %cst_132 = arith.constant dense<2147483647> : vector<1xi32>
    %401 = vector.multi_reduction <minsi>, %400, %cst_132 [1] : vector<1x128xi32> to vector<1xi32>
    %402 = vector.shape_cast %401 : vector<1xi32> to vector<1x1xi32>
    %403 = vector.broadcast %c0_i32_96 : i32 to vector<1x128xi32>
    %404 = arith.cmpi eq, %1, %403 : vector<1x128xi32>
    %405 = vector.shape_cast %402 : vector<1x1xi32> to vector<1x1xi32>
    %406 = vector.broadcast %405 : vector<1x1xi32> to vector<1x128xi32>
    %407 = arith.select %404, %406, %327 : vector<1x128xi1>, vector<1x128xi32>
    %408 = vector.shape_cast %396 : vector<1x1xf32> to vector<1x1xf32>
    %409 = vector.broadcast %408 : vector<1x1xf32> to vector<1x128xf32>
    %410 = arith.select %404, %409, %328 : vector<1x128xi1>, vector<1x128xf32>
    %411 = vector.broadcast %402 : vector<1x1xi32> to vector<1x128xi32>
    %412 = arith.cmpi eq, %1, %411 : vector<1x128xi32>
    %413 = arith.extui %412 : vector<1x128xi1> to vector<1x128xi32>
    %414 = arith.sitofp %413 : vector<1x128xi32> to vector<1x128xf32>
    %c0_133 = arith.constant 0 : index
    %c0_134 = arith.constant 0 : index
    %415 = vector.load %arg2[%c0_133, %c0_134] : memref<128x32xf32, #tpu.memory_space<vmem>>, vector<128x32xf32>
    %cst_135 = arith.constant dense<0.000000e+00> : vector<1x32xf32>
    %416 = tpu.matmul %414, %415, %cst_135 {dimension_numbers = #tpu.dot_dimension_numbers<[1], [0], [0], [1], [0, 0, 1, 1], [], []>} : vector<1x128xf32>, vector<128x32xf32>, vector<1x32xf32> -> vector<1x32xf32>
    %c1_i32 = arith.constant 1 : i32
    %c0_136 = arith.constant 0 : index
    %c0_137 = arith.constant 0 : index
    %417 = vector.load %arg7[%c0_136, %c0_137] : memref<32x128xf32, #tpu.memory_space<vmem>>, vector<32x128xf32>
    %cst_138 = arith.constant dense<0.000000e+00> : vector<1x128xf32>
    %418 = tpu.matmul %416, %417, %cst_138 {dimension_numbers = #tpu.dot_dimension_numbers<[1], [0], [0], [1], [0, 0, 1, 1], [], []>} : vector<1x32xf32>, vector<32x128xf32>, vector<1x128xf32> -> vector<1x128xf32>
    %c0_139 = arith.constant 0 : index
    %c0_140 = arith.constant 0 : index
    %419 = vector.load %arg9[%c0_139, %c0_140] : memref<1x128xf32, #tpu.memory_space<vmem>>, vector<1x128xf32>
    %420 = arith.addf %418, %419 : vector<1x128xf32>
    %c0_141 = arith.constant 0 : index
    %c0_142 = arith.constant 0 : index
    %421 = vector.load %arg8[%c0_141, %c0_142] : memref<32x128xf32, #tpu.memory_space<vmem>>, vector<32x128xf32>
    %cst_143 = arith.constant dense<0.000000e+00> : vector<1x128xf32>
    %422 = tpu.matmul %362, %421, %cst_143 {dimension_numbers = #tpu.dot_dimension_numbers<[1], [0], [0], [1], [0, 0, 1, 1], [], []>} : vector<1x32xf32>, vector<32x128xf32>, vector<1x128xf32> -> vector<1x128xf32>
    %c0_144 = arith.constant 0 : index
    %c0_145 = arith.constant 0 : index
    %423 = vector.load %arg10[%c0_144, %c0_145] : memref<1x128xf32, #tpu.memory_space<vmem>>, vector<1x128xf32>
    %424 = arith.addf %422, %423 : vector<1x128xf32>
    %425 = vector.extract_strided_slice %420 {offsets = [0, 0], sizes = [1, 32], strides = [1, 1]} : vector<1x128xf32> to vector<1x32xf32>
    %426 = vector.extract_strided_slice %424 {offsets = [0, 0], sizes = [1, 32], strides = [1, 1]} : vector<1x128xf32> to vector<1x32xf32>
    %427 = arith.addf %425, %426 : vector<1x32xf32>
    %428 = arith.negf %427 : vector<1x32xf32>
    %429 = math.exp %428 : vector<1x32xf32>
    %cst_146 = arith.constant 1.000000e+00 : f32
    %430 = vector.broadcast %cst_146 : f32 to vector<1x32xf32>
    %431 = arith.addf %430, %429 : vector<1x32xf32>
    %432 = arith.divf %430, %431 : vector<1x32xf32>
    %433 = vector.extract_strided_slice %420 {offsets = [0, 32], sizes = [1, 32], strides = [1, 1]} : vector<1x128xf32> to vector<1x32xf32>
    %434 = vector.extract_strided_slice %424 {offsets = [0, 32], sizes = [1, 32], strides = [1, 1]} : vector<1x128xf32> to vector<1x32xf32>
    %435 = arith.addf %433, %434 : vector<1x32xf32>
    %436 = arith.negf %435 : vector<1x32xf32>
    %437 = math.exp %436 : vector<1x32xf32>
    %cst_147 = arith.constant 1.000000e+00 : f32
    %438 = vector.broadcast %cst_147 : f32 to vector<1x32xf32>
    %439 = arith.addf %438, %437 : vector<1x32xf32>
    %440 = arith.divf %438, %439 : vector<1x32xf32>
    %441 = vector.extract_strided_slice %420 {offsets = [0, 64], sizes = [1, 32], strides = [1, 1]} : vector<1x128xf32> to vector<1x32xf32>
    %442 = vector.extract_strided_slice %424 {offsets = [0, 64], sizes = [1, 32], strides = [1, 1]} : vector<1x128xf32> to vector<1x32xf32>
    %443 = arith.mulf %432, %442 : vector<1x32xf32>
    %444 = arith.addf %441, %443 : vector<1x32xf32>
    %445 = math.tanh %444 : vector<1x32xf32>
    %cst_148 = arith.constant 1.000000e+00 : f32
    %446 = vector.broadcast %cst_148 : f32 to vector<1x32xf32>
    %447 = arith.subf %446, %440 : vector<1x32xf32>
    %448 = arith.mulf %447, %445 : vector<1x32xf32>
    %449 = arith.mulf %440, %362 : vector<1x32xf32>
    %450 = arith.addf %448, %449 : vector<1x32xf32>
    %cst_149 = arith.constant dense<0.000000e+00> : vector<1x8xf32>
    %451 = tpu.matmul %450, %325, %cst_149 {dimension_numbers = #tpu.dot_dimension_numbers<[1], [1], [0], [0], [0, 0, 1, 0], [], []>} : vector<1x32xf32>, vector<8x32xf32>, vector<1x8xf32> -> vector<1x8xf32>
    %cst_150 = arith.constant dense<0xFF800000> : vector<1xf32>
    %452 = vector.multi_reduction <maximumf>, %451, %cst_150 [1] : vector<1x8xf32> to vector<1xf32>
    %453 = vector.shape_cast %452 : vector<1xf32> to vector<1x1xf32>
    %454 = vector.broadcast %453 : vector<1x1xf32> to vector<1x8xf32>
    %455 = arith.subf %451, %454 : vector<1x8xf32>
    %456 = math.exp %455 : vector<1x8xf32>
    %cst_151 = arith.constant dense<0.000000e+00> : vector<1xf32>
    %457 = vector.multi_reduction <add>, %456, %cst_151 [1] : vector<1x8xf32> to vector<1xf32>
    %458 = vector.shape_cast %457 : vector<1xf32> to vector<1x1xf32>
    %459 = vector.broadcast %458 : vector<1x1xf32> to vector<1x8xf32>
    %460 = arith.divf %456, %459 : vector<1x8xf32>
    %cst_152 = arith.constant dense<0.000000e+00> : vector<1x32xf32>
    %461 = tpu.matmul %460, %325, %cst_152 {dimension_numbers = #tpu.dot_dimension_numbers<[1], [0], [0], [1], [0, 0, 1, 1], [], []>} : vector<1x8xf32>, vector<8x32xf32>, vector<1x32xf32> -> vector<1x32xf32>
    %c0_153 = arith.constant 0 : index
    %c0_154 = arith.constant 0 : index
    %c0_155 = arith.constant 0 : index
    %462 = vector.load %arg11[%c0_153, %c0_154, %c0_155] : memref<2x32x32xf32, #tpu.memory_space<vmem>>, vector<1x32x32xf32>
    %463 = vector.shape_cast %462 : vector<1x32x32xf32> to vector<32x32xf32>
    %cst_156 = arith.constant dense<0.000000e+00> : vector<1x32xf32>
    %464 = tpu.matmul %450, %463, %cst_156 {dimension_numbers = #tpu.dot_dimension_numbers<[1], [0], [0], [1], [0, 0, 1, 1], [], []>} : vector<1x32xf32>, vector<32x32xf32>, vector<1x32xf32> -> vector<1x32xf32>
    %c1_157 = arith.constant 1 : index
    %c0_158 = arith.constant 0 : index
    %c0_159 = arith.constant 0 : index
    %465 = vector.load %arg11[%c1_157, %c0_158, %c0_159] : memref<2x32x32xf32, #tpu.memory_space<vmem>>, vector<1x32x32xf32>
    %466 = vector.shape_cast %465 : vector<1x32x32xf32> to vector<32x32xf32>
    %cst_160 = arith.constant dense<0.000000e+00> : vector<1x32xf32>
    %467 = tpu.matmul %461, %466, %cst_160 {dimension_numbers = #tpu.dot_dimension_numbers<[1], [0], [0], [1], [0, 0, 1, 1], [], []>} : vector<1x32xf32>, vector<32x32xf32>, vector<1x32xf32> -> vector<1x32xf32>
    %468 = arith.addf %464, %467 : vector<1x32xf32>
    %c0_161 = arith.constant 0 : index
    %c0_162 = arith.constant 0 : index
    %469 = vector.load %arg12[%c0_161, %c0_162] : memref<1x32xf32, #tpu.memory_space<vmem>>, vector<1x32xf32>
    %470 = arith.addf %468, %469 : vector<1x32xf32>
    %471 = math.tanh %470 : vector<1x32xf32>
    %c0_163 = arith.constant 0 : index
    %c0_164 = arith.constant 0 : index
    %472 = vector.load %arg13[%c0_163, %c0_164] : memref<32x128xf32, #tpu.memory_space<vmem>>, vector<32x128xf32>
    %cst_165 = arith.constant dense<0.000000e+00> : vector<1x128xf32>
    %473 = tpu.matmul %471, %472, %cst_165 {dimension_numbers = #tpu.dot_dimension_numbers<[1], [0], [0], [1], [0, 0, 1, 1], [], []>} : vector<1x32xf32>, vector<32x128xf32>, vector<1x128xf32> -> vector<1x128xf32>
    %c0_166 = arith.constant 0 : index
    %c0_167 = arith.constant 0 : index
    %474 = vector.load %arg14[%c0_166, %c0_167] : memref<1x128xf32, #tpu.memory_space<vmem>>, vector<1x128xf32>
    %475 = arith.addf %473, %474 : vector<1x128xf32>
    %cst_168 = arith.constant dense<0xFF800000> : vector<1xf32>
    %476 = vector.multi_reduction <maximumf>, %475, %cst_168 [1] : vector<1x128xf32> to vector<1xf32>
    %477 = vector.shape_cast %476 : vector<1xf32> to vector<1x1xf32>
    %478 = vector.broadcast %477 : vector<1x1xf32> to vector<1x128xf32>
    %479 = arith.subf %475, %478 : vector<1x128xf32>
    %480 = math.exp %479 : vector<1x128xf32>
    %cst_169 = arith.constant dense<0.000000e+00> : vector<1xf32>
    %481 = vector.multi_reduction <add>, %480, %cst_169 [1] : vector<1x128xf32> to vector<1xf32>
    %482 = vector.shape_cast %481 : vector<1xf32> to vector<1x1xf32>
    %cst_170 = arith.constant 1.000000e+00 : f32
    %483 = vector.broadcast %cst_170 : f32 to vector<1x1xf32>
    %484 = arith.divf %483, %482 : vector<1x1xf32>
    %485 = vector.broadcast %477 : vector<1x1xf32> to vector<1x128xf32>
    %486 = arith.cmpf oeq, %475, %485 : vector<1x128xf32>
    %c128_i32_171 = arith.constant 128 : i32
    %487 = vector.broadcast %c128_i32_171 : i32 to vector<1x128xi32>
    %488 = arith.select %486, %1, %487 : vector<1x128xi1>, vector<1x128xi32>
    %cst_172 = arith.constant dense<2147483647> : vector<1xi32>
    %489 = vector.multi_reduction <minsi>, %488, %cst_172 [1] : vector<1x128xi32> to vector<1xi32>
    %490 = vector.shape_cast %489 : vector<1xi32> to vector<1x1xi32>
    %491 = vector.broadcast %c1_i32 : i32 to vector<1x128xi32>
    %492 = arith.cmpi eq, %1, %491 : vector<1x128xi32>
    %493 = vector.shape_cast %490 : vector<1x1xi32> to vector<1x1xi32>
    %494 = vector.broadcast %493 : vector<1x1xi32> to vector<1x128xi32>
    %495 = arith.select %492, %494, %407 : vector<1x128xi1>, vector<1x128xi32>
    %496 = vector.shape_cast %484 : vector<1x1xf32> to vector<1x1xf32>
    %497 = vector.broadcast %496 : vector<1x1xf32> to vector<1x128xf32>
    %498 = arith.select %492, %497, %410 : vector<1x128xi1>, vector<1x128xf32>
    %499 = vector.broadcast %490 : vector<1x1xi32> to vector<1x128xi32>
    %500 = arith.cmpi eq, %1, %499 : vector<1x128xi32>
    %501 = arith.extui %500 : vector<1x128xi1> to vector<1x128xi32>
    %502 = arith.sitofp %501 : vector<1x128xi32> to vector<1x128xf32>
    %c0_173 = arith.constant 0 : index
    %c0_174 = arith.constant 0 : index
    %503 = vector.load %arg2[%c0_173, %c0_174] : memref<128x32xf32, #tpu.memory_space<vmem>>, vector<128x32xf32>
    %cst_175 = arith.constant dense<0.000000e+00> : vector<1x32xf32>
    %504 = tpu.matmul %502, %503, %cst_175 {dimension_numbers = #tpu.dot_dimension_numbers<[1], [0], [0], [1], [0, 0, 1, 1], [], []>} : vector<1x128xf32>, vector<128x32xf32>, vector<1x32xf32> -> vector<1x32xf32>
    %c2_i32 = arith.constant 2 : i32
    %c0_176 = arith.constant 0 : index
    %c0_177 = arith.constant 0 : index
    %505 = vector.load %arg7[%c0_176, %c0_177] : memref<32x128xf32, #tpu.memory_space<vmem>>, vector<32x128xf32>
    %cst_178 = arith.constant dense<0.000000e+00> : vector<1x128xf32>
    %506 = tpu.matmul %504, %505, %cst_178 {dimension_numbers = #tpu.dot_dimension_numbers<[1], [0], [0], [1], [0, 0, 1, 1], [], []>} : vector<1x32xf32>, vector<32x128xf32>, vector<1x128xf32> -> vector<1x128xf32>
    %c0_179 = arith.constant 0 : index
    %c0_180 = arith.constant 0 : index
    %507 = vector.load %arg9[%c0_179, %c0_180] : memref<1x128xf32, #tpu.memory_space<vmem>>, vector<1x128xf32>
    %508 = arith.addf %506, %507 : vector<1x128xf32>
    %c0_181 = arith.constant 0 : index
    %c0_182 = arith.constant 0 : index
    %509 = vector.load %arg8[%c0_181, %c0_182] : memref<32x128xf32, #tpu.memory_space<vmem>>, vector<32x128xf32>
    %cst_183 = arith.constant dense<0.000000e+00> : vector<1x128xf32>
    %510 = tpu.matmul %450, %509, %cst_183 {dimension_numbers = #tpu.dot_dimension_numbers<[1], [0], [0], [1], [0, 0, 1, 1], [], []>} : vector<1x32xf32>, vector<32x128xf32>, vector<1x128xf32> -> vector<1x128xf32>
    %c0_184 = arith.constant 0 : index
    %c0_185 = arith.constant 0 : index
    %511 = vector.load %arg10[%c0_184, %c0_185] : memref<1x128xf32, #tpu.memory_space<vmem>>, vector<1x128xf32>
    %512 = arith.addf %510, %511 : vector<1x128xf32>
    %513 = vector.extract_strided_slice %508 {offsets = [0, 0], sizes = [1, 32], strides = [1, 1]} : vector<1x128xf32> to vector<1x32xf32>
    %514 = vector.extract_strided_slice %512 {offsets = [0, 0], sizes = [1, 32], strides = [1, 1]} : vector<1x128xf32> to vector<1x32xf32>
    %515 = arith.addf %513, %514 : vector<1x32xf32>
    %516 = arith.negf %515 : vector<1x32xf32>
    %517 = math.exp %516 : vector<1x32xf32>
    %cst_186 = arith.constant 1.000000e+00 : f32
    %518 = vector.broadcast %cst_186 : f32 to vector<1x32xf32>
    %519 = arith.addf %518, %517 : vector<1x32xf32>
    %520 = arith.divf %518, %519 : vector<1x32xf32>
    %521 = vector.extract_strided_slice %508 {offsets = [0, 32], sizes = [1, 32], strides = [1, 1]} : vector<1x128xf32> to vector<1x32xf32>
    %522 = vector.extract_strided_slice %512 {offsets = [0, 32], sizes = [1, 32], strides = [1, 1]} : vector<1x128xf32> to vector<1x32xf32>
    %523 = arith.addf %521, %522 : vector<1x32xf32>
    %524 = arith.negf %523 : vector<1x32xf32>
    %525 = math.exp %524 : vector<1x32xf32>
    %cst_187 = arith.constant 1.000000e+00 : f32
    %526 = vector.broadcast %cst_187 : f32 to vector<1x32xf32>
    %527 = arith.addf %526, %525 : vector<1x32xf32>
    %528 = arith.divf %526, %527 : vector<1x32xf32>
    %529 = vector.extract_strided_slice %508 {offsets = [0, 64], sizes = [1, 32], strides = [1, 1]} : vector<1x128xf32> to vector<1x32xf32>
    %530 = vector.extract_strided_slice %512 {offsets = [0, 64], sizes = [1, 32], strides = [1, 1]} : vector<1x128xf32> to vector<1x32xf32>
    %531 = arith.mulf %520, %530 : vector<1x32xf32>
    %532 = arith.addf %529, %531 : vector<1x32xf32>
    %533 = math.tanh %532 : vector<1x32xf32>
    %cst_188 = arith.constant 1.000000e+00 : f32
    %534 = vector.broadcast %cst_188 : f32 to vector<1x32xf32>
    %535 = arith.subf %534, %528 : vector<1x32xf32>
    %536 = arith.mulf %535, %533 : vector<1x32xf32>
    %537 = arith.mulf %528, %450 : vector<1x32xf32>
    %538 = arith.addf %536, %537 : vector<1x32xf32>
    %cst_189 = arith.constant dense<0.000000e+00> : vector<1x8xf32>
    %539 = tpu.matmul %538, %325, %cst_189 {dimension_numbers = #tpu.dot_dimension_numbers<[1], [1], [0], [0], [0, 0, 1, 0], [], []>} : vector<1x32xf32>, vector<8x32xf32>, vector<1x8xf32> -> vector<1x8xf32>
    %cst_190 = arith.constant dense<0xFF800000> : vector<1xf32>
    %540 = vector.multi_reduction <maximumf>, %539, %cst_190 [1] : vector<1x8xf32> to vector<1xf32>
    %541 = vector.shape_cast %540 : vector<1xf32> to vector<1x1xf32>
    %542 = vector.broadcast %541 : vector<1x1xf32> to vector<1x8xf32>
    %543 = arith.subf %539, %542 : vector<1x8xf32>
    %544 = math.exp %543 : vector<1x8xf32>
    %cst_191 = arith.constant dense<0.000000e+00> : vector<1xf32>
    %545 = vector.multi_reduction <add>, %544, %cst_191 [1] : vector<1x8xf32> to vector<1xf32>
    %546 = vector.shape_cast %545 : vector<1xf32> to vector<1x1xf32>
    %547 = vector.broadcast %546 : vector<1x1xf32> to vector<1x8xf32>
    %548 = arith.divf %544, %547 : vector<1x8xf32>
    %cst_192 = arith.constant dense<0.000000e+00> : vector<1x32xf32>
    %549 = tpu.matmul %548, %325, %cst_192 {dimension_numbers = #tpu.dot_dimension_numbers<[1], [0], [0], [1], [0, 0, 1, 1], [], []>} : vector<1x8xf32>, vector<8x32xf32>, vector<1x32xf32> -> vector<1x32xf32>
    %c0_193 = arith.constant 0 : index
    %c0_194 = arith.constant 0 : index
    %c0_195 = arith.constant 0 : index
    %550 = vector.load %arg11[%c0_193, %c0_194, %c0_195] : memref<2x32x32xf32, #tpu.memory_space<vmem>>, vector<1x32x32xf32>
    %551 = vector.shape_cast %550 : vector<1x32x32xf32> to vector<32x32xf32>
    %cst_196 = arith.constant dense<0.000000e+00> : vector<1x32xf32>
    %552 = tpu.matmul %538, %551, %cst_196 {dimension_numbers = #tpu.dot_dimension_numbers<[1], [0], [0], [1], [0, 0, 1, 1], [], []>} : vector<1x32xf32>, vector<32x32xf32>, vector<1x32xf32> -> vector<1x32xf32>
    %c1_197 = arith.constant 1 : index
    %c0_198 = arith.constant 0 : index
    %c0_199 = arith.constant 0 : index
    %553 = vector.load %arg11[%c1_197, %c0_198, %c0_199] : memref<2x32x32xf32, #tpu.memory_space<vmem>>, vector<1x32x32xf32>
    %554 = vector.shape_cast %553 : vector<1x32x32xf32> to vector<32x32xf32>
    %cst_200 = arith.constant dense<0.000000e+00> : vector<1x32xf32>
    %555 = tpu.matmul %549, %554, %cst_200 {dimension_numbers = #tpu.dot_dimension_numbers<[1], [0], [0], [1], [0, 0, 1, 1], [], []>} : vector<1x32xf32>, vector<32x32xf32>, vector<1x32xf32> -> vector<1x32xf32>
    %556 = arith.addf %552, %555 : vector<1x32xf32>
    %c0_201 = arith.constant 0 : index
    %c0_202 = arith.constant 0 : index
    %557 = vector.load %arg12[%c0_201, %c0_202] : memref<1x32xf32, #tpu.memory_space<vmem>>, vector<1x32xf32>
    %558 = arith.addf %556, %557 : vector<1x32xf32>
    %559 = math.tanh %558 : vector<1x32xf32>
    %c0_203 = arith.constant 0 : index
    %c0_204 = arith.constant 0 : index
    %560 = vector.load %arg13[%c0_203, %c0_204] : memref<32x128xf32, #tpu.memory_space<vmem>>, vector<32x128xf32>
    %cst_205 = arith.constant dense<0.000000e+00> : vector<1x128xf32>
    %561 = tpu.matmul %559, %560, %cst_205 {dimension_numbers = #tpu.dot_dimension_numbers<[1], [0], [0], [1], [0, 0, 1, 1], [], []>} : vector<1x32xf32>, vector<32x128xf32>, vector<1x128xf32> -> vector<1x128xf32>
    %c0_206 = arith.constant 0 : index
    %c0_207 = arith.constant 0 : index
    %562 = vector.load %arg14[%c0_206, %c0_207] : memref<1x128xf32, #tpu.memory_space<vmem>>, vector<1x128xf32>
    %563 = arith.addf %561, %562 : vector<1x128xf32>
    %cst_208 = arith.constant dense<0xFF800000> : vector<1xf32>
    %564 = vector.multi_reduction <maximumf>, %563, %cst_208 [1] : vector<1x128xf32> to vector<1xf32>
    %565 = vector.shape_cast %564 : vector<1xf32> to vector<1x1xf32>
    %566 = vector.broadcast %565 : vector<1x1xf32> to vector<1x128xf32>
    %567 = arith.subf %563, %566 : vector<1x128xf32>
    %568 = math.exp %567 : vector<1x128xf32>
    %cst_209 = arith.constant dense<0.000000e+00> : vector<1xf32>
    %569 = vector.multi_reduction <add>, %568, %cst_209 [1] : vector<1x128xf32> to vector<1xf32>
    %570 = vector.shape_cast %569 : vector<1xf32> to vector<1x1xf32>
    %cst_210 = arith.constant 1.000000e+00 : f32
    %571 = vector.broadcast %cst_210 : f32 to vector<1x1xf32>
    %572 = arith.divf %571, %570 : vector<1x1xf32>
    %573 = vector.broadcast %565 : vector<1x1xf32> to vector<1x128xf32>
    %574 = arith.cmpf oeq, %563, %573 : vector<1x128xf32>
    %c128_i32_211 = arith.constant 128 : i32
    %575 = vector.broadcast %c128_i32_211 : i32 to vector<1x128xi32>
    %576 = arith.select %574, %1, %575 : vector<1x128xi1>, vector<1x128xi32>
    %cst_212 = arith.constant dense<2147483647> : vector<1xi32>
    %577 = vector.multi_reduction <minsi>, %576, %cst_212 [1] : vector<1x128xi32> to vector<1xi32>
    %578 = vector.shape_cast %577 : vector<1xi32> to vector<1x1xi32>
    %579 = vector.broadcast %c2_i32 : i32 to vector<1x128xi32>
    %580 = arith.cmpi eq, %1, %579 : vector<1x128xi32>
    %581 = vector.shape_cast %578 : vector<1x1xi32> to vector<1x1xi32>
    %582 = vector.broadcast %581 : vector<1x1xi32> to vector<1x128xi32>
    %583 = arith.select %580, %582, %495 : vector<1x128xi1>, vector<1x128xi32>
    %584 = vector.shape_cast %572 : vector<1x1xf32> to vector<1x1xf32>
    %585 = vector.broadcast %584 : vector<1x1xf32> to vector<1x128xf32>
    %586 = arith.select %580, %585, %498 : vector<1x128xi1>, vector<1x128xf32>
    %587 = vector.broadcast %578 : vector<1x1xi32> to vector<1x128xi32>
    %588 = arith.cmpi eq, %1, %587 : vector<1x128xi32>
    %589 = arith.extui %588 : vector<1x128xi1> to vector<1x128xi32>
    %590 = arith.sitofp %589 : vector<1x128xi32> to vector<1x128xf32>
    %c0_213 = arith.constant 0 : index
    %c0_214 = arith.constant 0 : index
    %591 = vector.load %arg2[%c0_213, %c0_214] : memref<128x32xf32, #tpu.memory_space<vmem>>, vector<128x32xf32>
    %cst_215 = arith.constant dense<0.000000e+00> : vector<1x32xf32>
    %592 = tpu.matmul %590, %591, %cst_215 {dimension_numbers = #tpu.dot_dimension_numbers<[1], [0], [0], [1], [0, 0, 1, 1], [], []>} : vector<1x128xf32>, vector<128x32xf32>, vector<1x32xf32> -> vector<1x32xf32>
    %c3_i32 = arith.constant 3 : i32
    %c0_216 = arith.constant 0 : index
    %c0_217 = arith.constant 0 : index
    %593 = vector.load %arg7[%c0_216, %c0_217] : memref<32x128xf32, #tpu.memory_space<vmem>>, vector<32x128xf32>
    %cst_218 = arith.constant dense<0.000000e+00> : vector<1x128xf32>
    %594 = tpu.matmul %592, %593, %cst_218 {dimension_numbers = #tpu.dot_dimension_numbers<[1], [0], [0], [1], [0, 0, 1, 1], [], []>} : vector<1x32xf32>, vector<32x128xf32>, vector<1x128xf32> -> vector<1x128xf32>
    %c0_219 = arith.constant 0 : index
    %c0_220 = arith.constant 0 : index
    %595 = vector.load %arg9[%c0_219, %c0_220] : memref<1x128xf32, #tpu.memory_space<vmem>>, vector<1x128xf32>
    %596 = arith.addf %594, %595 : vector<1x128xf32>
    %c0_221 = arith.constant 0 : index
    %c0_222 = arith.constant 0 : index
    %597 = vector.load %arg8[%c0_221, %c0_222] : memref<32x128xf32, #tpu.memory_space<vmem>>, vector<32x128xf32>
    %cst_223 = arith.constant dense<0.000000e+00> : vector<1x128xf32>
    %598 = tpu.matmul %538, %597, %cst_223 {dimension_numbers = #tpu.dot_dimension_numbers<[1], [0], [0], [1], [0, 0, 1, 1], [], []>} : vector<1x32xf32>, vector<32x128xf32>, vector<1x128xf32> -> vector<1x128xf32>
    %c0_224 = arith.constant 0 : index
    %c0_225 = arith.constant 0 : index
    %599 = vector.load %arg10[%c0_224, %c0_225] : memref<1x128xf32, #tpu.memory_space<vmem>>, vector<1x128xf32>
    %600 = arith.addf %598, %599 : vector<1x128xf32>
    %601 = vector.extract_strided_slice %596 {offsets = [0, 0], sizes = [1, 32], strides = [1, 1]} : vector<1x128xf32> to vector<1x32xf32>
    %602 = vector.extract_strided_slice %600 {offsets = [0, 0], sizes = [1, 32], strides = [1, 1]} : vector<1x128xf32> to vector<1x32xf32>
    %603 = arith.addf %601, %602 : vector<1x32xf32>
    %604 = arith.negf %603 : vector<1x32xf32>
    %605 = math.exp %604 : vector<1x32xf32>
    %cst_226 = arith.constant 1.000000e+00 : f32
    %606 = vector.broadcast %cst_226 : f32 to vector<1x32xf32>
    %607 = arith.addf %606, %605 : vector<1x32xf32>
    %608 = arith.divf %606, %607 : vector<1x32xf32>
    %609 = vector.extract_strided_slice %596 {offsets = [0, 32], sizes = [1, 32], strides = [1, 1]} : vector<1x128xf32> to vector<1x32xf32>
    %610 = vector.extract_strided_slice %600 {offsets = [0, 32], sizes = [1, 32], strides = [1, 1]} : vector<1x128xf32> to vector<1x32xf32>
    %611 = arith.addf %609, %610 : vector<1x32xf32>
    %612 = arith.negf %611 : vector<1x32xf32>
    %613 = math.exp %612 : vector<1x32xf32>
    %cst_227 = arith.constant 1.000000e+00 : f32
    %614 = vector.broadcast %cst_227 : f32 to vector<1x32xf32>
    %615 = arith.addf %614, %613 : vector<1x32xf32>
    %616 = arith.divf %614, %615 : vector<1x32xf32>
    %617 = vector.extract_strided_slice %596 {offsets = [0, 64], sizes = [1, 32], strides = [1, 1]} : vector<1x128xf32> to vector<1x32xf32>
    %618 = vector.extract_strided_slice %600 {offsets = [0, 64], sizes = [1, 32], strides = [1, 1]} : vector<1x128xf32> to vector<1x32xf32>
    %619 = arith.mulf %608, %618 : vector<1x32xf32>
    %620 = arith.addf %617, %619 : vector<1x32xf32>
    %621 = math.tanh %620 : vector<1x32xf32>
    %cst_228 = arith.constant 1.000000e+00 : f32
    %622 = vector.broadcast %cst_228 : f32 to vector<1x32xf32>
    %623 = arith.subf %622, %616 : vector<1x32xf32>
    %624 = arith.mulf %623, %621 : vector<1x32xf32>
    %625 = arith.mulf %616, %538 : vector<1x32xf32>
    %626 = arith.addf %624, %625 : vector<1x32xf32>
    %cst_229 = arith.constant dense<0.000000e+00> : vector<1x8xf32>
    %627 = tpu.matmul %626, %325, %cst_229 {dimension_numbers = #tpu.dot_dimension_numbers<[1], [1], [0], [0], [0, 0, 1, 0], [], []>} : vector<1x32xf32>, vector<8x32xf32>, vector<1x8xf32> -> vector<1x8xf32>
    %cst_230 = arith.constant dense<0xFF800000> : vector<1xf32>
    %628 = vector.multi_reduction <maximumf>, %627, %cst_230 [1] : vector<1x8xf32> to vector<1xf32>
    %629 = vector.shape_cast %628 : vector<1xf32> to vector<1x1xf32>
    %630 = vector.broadcast %629 : vector<1x1xf32> to vector<1x8xf32>
    %631 = arith.subf %627, %630 : vector<1x8xf32>
    %632 = math.exp %631 : vector<1x8xf32>
    %cst_231 = arith.constant dense<0.000000e+00> : vector<1xf32>
    %633 = vector.multi_reduction <add>, %632, %cst_231 [1] : vector<1x8xf32> to vector<1xf32>
    %634 = vector.shape_cast %633 : vector<1xf32> to vector<1x1xf32>
    %635 = vector.broadcast %634 : vector<1x1xf32> to vector<1x8xf32>
    %636 = arith.divf %632, %635 : vector<1x8xf32>
    %cst_232 = arith.constant dense<0.000000e+00> : vector<1x32xf32>
    %637 = tpu.matmul %636, %325, %cst_232 {dimension_numbers = #tpu.dot_dimension_numbers<[1], [0], [0], [1], [0, 0, 1, 1], [], []>} : vector<1x8xf32>, vector<8x32xf32>, vector<1x32xf32> -> vector<1x32xf32>
    %c0_233 = arith.constant 0 : index
    %c0_234 = arith.constant 0 : index
    %c0_235 = arith.constant 0 : index
    %638 = vector.load %arg11[%c0_233, %c0_234, %c0_235] : memref<2x32x32xf32, #tpu.memory_space<vmem>>, vector<1x32x32xf32>
    %639 = vector.shape_cast %638 : vector<1x32x32xf32> to vector<32x32xf32>
    %cst_236 = arith.constant dense<0.000000e+00> : vector<1x32xf32>
    %640 = tpu.matmul %626, %639, %cst_236 {dimension_numbers = #tpu.dot_dimension_numbers<[1], [0], [0], [1], [0, 0, 1, 1], [], []>} : vector<1x32xf32>, vector<32x32xf32>, vector<1x32xf32> -> vector<1x32xf32>
    %c1_237 = arith.constant 1 : index
    %c0_238 = arith.constant 0 : index
    %c0_239 = arith.constant 0 : index
    %641 = vector.load %arg11[%c1_237, %c0_238, %c0_239] : memref<2x32x32xf32, #tpu.memory_space<vmem>>, vector<1x32x32xf32>
    %642 = vector.shape_cast %641 : vector<1x32x32xf32> to vector<32x32xf32>
    %cst_240 = arith.constant dense<0.000000e+00> : vector<1x32xf32>
    %643 = tpu.matmul %637, %642, %cst_240 {dimension_numbers = #tpu.dot_dimension_numbers<[1], [0], [0], [1], [0, 0, 1, 1], [], []>} : vector<1x32xf32>, vector<32x32xf32>, vector<1x32xf32> -> vector<1x32xf32>
    %644 = arith.addf %640, %643 : vector<1x32xf32>
    %c0_241 = arith.constant 0 : index
    %c0_242 = arith.constant 0 : index
    %645 = vector.load %arg12[%c0_241, %c0_242] : memref<1x32xf32, #tpu.memory_space<vmem>>, vector<1x32xf32>
    %646 = arith.addf %644, %645 : vector<1x32xf32>
    %647 = math.tanh %646 : vector<1x32xf32>
    %c0_243 = arith.constant 0 : index
    %c0_244 = arith.constant 0 : index
    %648 = vector.load %arg13[%c0_243, %c0_244] : memref<32x128xf32, #tpu.memory_space<vmem>>, vector<32x128xf32>
    %cst_245 = arith.constant dense<0.000000e+00> : vector<1x128xf32>
    %649 = tpu.matmul %647, %648, %cst_245 {dimension_numbers = #tpu.dot_dimension_numbers<[1], [0], [0], [1], [0, 0, 1, 1], [], []>} : vector<1x32xf32>, vector<32x128xf32>, vector<1x128xf32> -> vector<1x128xf32>
    %c0_246 = arith.constant 0 : index
    %c0_247 = arith.constant 0 : index
    %650 = vector.load %arg14[%c0_246, %c0_247] : memref<1x128xf32, #tpu.memory_space<vmem>>, vector<1x128xf32>
    %651 = arith.addf %649, %650 : vector<1x128xf32>
    %cst_248 = arith.constant dense<0xFF800000> : vector<1xf32>
    %652 = vector.multi_reduction <maximumf>, %651, %cst_248 [1] : vector<1x128xf32> to vector<1xf32>
    %653 = vector.shape_cast %652 : vector<1xf32> to vector<1x1xf32>
    %654 = vector.broadcast %653 : vector<1x1xf32> to vector<1x128xf32>
    %655 = arith.subf %651, %654 : vector<1x128xf32>
    %656 = math.exp %655 : vector<1x128xf32>
    %cst_249 = arith.constant dense<0.000000e+00> : vector<1xf32>
    %657 = vector.multi_reduction <add>, %656, %cst_249 [1] : vector<1x128xf32> to vector<1xf32>
    %658 = vector.shape_cast %657 : vector<1xf32> to vector<1x1xf32>
    %cst_250 = arith.constant 1.000000e+00 : f32
    %659 = vector.broadcast %cst_250 : f32 to vector<1x1xf32>
    %660 = arith.divf %659, %658 : vector<1x1xf32>
    %661 = vector.broadcast %653 : vector<1x1xf32> to vector<1x128xf32>
    %662 = arith.cmpf oeq, %651, %661 : vector<1x128xf32>
    %c128_i32_251 = arith.constant 128 : i32
    %663 = vector.broadcast %c128_i32_251 : i32 to vector<1x128xi32>
    %664 = arith.select %662, %1, %663 : vector<1x128xi1>, vector<1x128xi32>
    %cst_252 = arith.constant dense<2147483647> : vector<1xi32>
    %665 = vector.multi_reduction <minsi>, %664, %cst_252 [1] : vector<1x128xi32> to vector<1xi32>
    %666 = vector.shape_cast %665 : vector<1xi32> to vector<1x1xi32>
    %667 = vector.broadcast %c3_i32 : i32 to vector<1x128xi32>
    %668 = arith.cmpi eq, %1, %667 : vector<1x128xi32>
    %669 = vector.shape_cast %666 : vector<1x1xi32> to vector<1x1xi32>
    %670 = vector.broadcast %669 : vector<1x1xi32> to vector<1x128xi32>
    %671 = arith.select %668, %670, %583 : vector<1x128xi1>, vector<1x128xi32>
    %672 = vector.shape_cast %660 : vector<1x1xf32> to vector<1x1xf32>
    %673 = vector.broadcast %672 : vector<1x1xf32> to vector<1x128xf32>
    %674 = arith.select %668, %673, %586 : vector<1x128xi1>, vector<1x128xf32>
    %675 = vector.broadcast %666 : vector<1x1xi32> to vector<1x128xi32>
    %676 = arith.cmpi eq, %1, %675 : vector<1x128xi32>
    %677 = arith.extui %676 : vector<1x128xi1> to vector<1x128xi32>
    %678 = arith.sitofp %677 : vector<1x128xi32> to vector<1x128xf32>
    %c0_253 = arith.constant 0 : index
    %c0_254 = arith.constant 0 : index
    %679 = vector.load %arg2[%c0_253, %c0_254] : memref<128x32xf32, #tpu.memory_space<vmem>>, vector<128x32xf32>
    %cst_255 = arith.constant dense<0.000000e+00> : vector<1x32xf32>
    %680 = tpu.matmul %678, %679, %cst_255 {dimension_numbers = #tpu.dot_dimension_numbers<[1], [0], [0], [1], [0, 0, 1, 1], [], []>} : vector<1x128xf32>, vector<128x32xf32>, vector<1x32xf32> -> vector<1x32xf32>
    %c4_i32 = arith.constant 4 : i32
    %c0_256 = arith.constant 0 : index
    %c0_257 = arith.constant 0 : index
    %681 = vector.load %arg7[%c0_256, %c0_257] : memref<32x128xf32, #tpu.memory_space<vmem>>, vector<32x128xf32>
    %cst_258 = arith.constant dense<0.000000e+00> : vector<1x128xf32>
    %682 = tpu.matmul %680, %681, %cst_258 {dimension_numbers = #tpu.dot_dimension_numbers<[1], [0], [0], [1], [0, 0, 1, 1], [], []>} : vector<1x32xf32>, vector<32x128xf32>, vector<1x128xf32> -> vector<1x128xf32>
    %c0_259 = arith.constant 0 : index
    %c0_260 = arith.constant 0 : index
    %683 = vector.load %arg9[%c0_259, %c0_260] : memref<1x128xf32, #tpu.memory_space<vmem>>, vector<1x128xf32>
    %684 = arith.addf %682, %683 : vector<1x128xf32>
    %c0_261 = arith.constant 0 : index
    %c0_262 = arith.constant 0 : index
    %685 = vector.load %arg8[%c0_261, %c0_262] : memref<32x128xf32, #tpu.memory_space<vmem>>, vector<32x128xf32>
    %cst_263 = arith.constant dense<0.000000e+00> : vector<1x128xf32>
    %686 = tpu.matmul %626, %685, %cst_263 {dimension_numbers = #tpu.dot_dimension_numbers<[1], [0], [0], [1], [0, 0, 1, 1], [], []>} : vector<1x32xf32>, vector<32x128xf32>, vector<1x128xf32> -> vector<1x128xf32>
    %c0_264 = arith.constant 0 : index
    %c0_265 = arith.constant 0 : index
    %687 = vector.load %arg10[%c0_264, %c0_265] : memref<1x128xf32, #tpu.memory_space<vmem>>, vector<1x128xf32>
    %688 = arith.addf %686, %687 : vector<1x128xf32>
    %689 = vector.extract_strided_slice %684 {offsets = [0, 0], sizes = [1, 32], strides = [1, 1]} : vector<1x128xf32> to vector<1x32xf32>
    %690 = vector.extract_strided_slice %688 {offsets = [0, 0], sizes = [1, 32], strides = [1, 1]} : vector<1x128xf32> to vector<1x32xf32>
    %691 = arith.addf %689, %690 : vector<1x32xf32>
    %692 = arith.negf %691 : vector<1x32xf32>
    %693 = math.exp %692 : vector<1x32xf32>
    %cst_266 = arith.constant 1.000000e+00 : f32
    %694 = vector.broadcast %cst_266 : f32 to vector<1x32xf32>
    %695 = arith.addf %694, %693 : vector<1x32xf32>
    %696 = arith.divf %694, %695 : vector<1x32xf32>
    %697 = vector.extract_strided_slice %684 {offsets = [0, 32], sizes = [1, 32], strides = [1, 1]} : vector<1x128xf32> to vector<1x32xf32>
    %698 = vector.extract_strided_slice %688 {offsets = [0, 32], sizes = [1, 32], strides = [1, 1]} : vector<1x128xf32> to vector<1x32xf32>
    %699 = arith.addf %697, %698 : vector<1x32xf32>
    %700 = arith.negf %699 : vector<1x32xf32>
    %701 = math.exp %700 : vector<1x32xf32>
    %cst_267 = arith.constant 1.000000e+00 : f32
    %702 = vector.broadcast %cst_267 : f32 to vector<1x32xf32>
    %703 = arith.addf %702, %701 : vector<1x32xf32>
    %704 = arith.divf %702, %703 : vector<1x32xf32>
    %705 = vector.extract_strided_slice %684 {offsets = [0, 64], sizes = [1, 32], strides = [1, 1]} : vector<1x128xf32> to vector<1x32xf32>
    %706 = vector.extract_strided_slice %688 {offsets = [0, 64], sizes = [1, 32], strides = [1, 1]} : vector<1x128xf32> to vector<1x32xf32>
    %707 = arith.mulf %696, %706 : vector<1x32xf32>
    %708 = arith.addf %705, %707 : vector<1x32xf32>
    %709 = math.tanh %708 : vector<1x32xf32>
    %cst_268 = arith.constant 1.000000e+00 : f32
    %710 = vector.broadcast %cst_268 : f32 to vector<1x32xf32>
    %711 = arith.subf %710, %704 : vector<1x32xf32>
    %712 = arith.mulf %711, %709 : vector<1x32xf32>
    %713 = arith.mulf %704, %626 : vector<1x32xf32>
    %714 = arith.addf %712, %713 : vector<1x32xf32>
    %cst_269 = arith.constant dense<0.000000e+00> : vector<1x8xf32>
    %715 = tpu.matmul %714, %325, %cst_269 {dimension_numbers = #tpu.dot_dimension_numbers<[1], [1], [0], [0], [0, 0, 1, 0], [], []>} : vector<1x32xf32>, vector<8x32xf32>, vector<1x8xf32> -> vector<1x8xf32>
    %cst_270 = arith.constant dense<0xFF800000> : vector<1xf32>
    %716 = vector.multi_reduction <maximumf>, %715, %cst_270 [1] : vector<1x8xf32> to vector<1xf32>
    %717 = vector.shape_cast %716 : vector<1xf32> to vector<1x1xf32>
    %718 = vector.broadcast %717 : vector<1x1xf32> to vector<1x8xf32>
    %719 = arith.subf %715, %718 : vector<1x8xf32>
    %720 = math.exp %719 : vector<1x8xf32>
    %cst_271 = arith.constant dense<0.000000e+00> : vector<1xf32>
    %721 = vector.multi_reduction <add>, %720, %cst_271 [1] : vector<1x8xf32> to vector<1xf32>
    %722 = vector.shape_cast %721 : vector<1xf32> to vector<1x1xf32>
    %723 = vector.broadcast %722 : vector<1x1xf32> to vector<1x8xf32>
    %724 = arith.divf %720, %723 : vector<1x8xf32>
    %cst_272 = arith.constant dense<0.000000e+00> : vector<1x32xf32>
    %725 = tpu.matmul %724, %325, %cst_272 {dimension_numbers = #tpu.dot_dimension_numbers<[1], [0], [0], [1], [0, 0, 1, 1], [], []>} : vector<1x8xf32>, vector<8x32xf32>, vector<1x32xf32> -> vector<1x32xf32>
    %c0_273 = arith.constant 0 : index
    %c0_274 = arith.constant 0 : index
    %c0_275 = arith.constant 0 : index
    %726 = vector.load %arg11[%c0_273, %c0_274, %c0_275] : memref<2x32x32xf32, #tpu.memory_space<vmem>>, vector<1x32x32xf32>
    %727 = vector.shape_cast %726 : vector<1x32x32xf32> to vector<32x32xf32>
    %cst_276 = arith.constant dense<0.000000e+00> : vector<1x32xf32>
    %728 = tpu.matmul %714, %727, %cst_276 {dimension_numbers = #tpu.dot_dimension_numbers<[1], [0], [0], [1], [0, 0, 1, 1], [], []>} : vector<1x32xf32>, vector<32x32xf32>, vector<1x32xf32> -> vector<1x32xf32>
    %c1_277 = arith.constant 1 : index
    %c0_278 = arith.constant 0 : index
    %c0_279 = arith.constant 0 : index
    %729 = vector.load %arg11[%c1_277, %c0_278, %c0_279] : memref<2x32x32xf32, #tpu.memory_space<vmem>>, vector<1x32x32xf32>
    %730 = vector.shape_cast %729 : vector<1x32x32xf32> to vector<32x32xf32>
    %cst_280 = arith.constant dense<0.000000e+00> : vector<1x32xf32>
    %731 = tpu.matmul %725, %730, %cst_280 {dimension_numbers = #tpu.dot_dimension_numbers<[1], [0], [0], [1], [0, 0, 1, 1], [], []>} : vector<1x32xf32>, vector<32x32xf32>, vector<1x32xf32> -> vector<1x32xf32>
    %732 = arith.addf %728, %731 : vector<1x32xf32>
    %c0_281 = arith.constant 0 : index
    %c0_282 = arith.constant 0 : index
    %733 = vector.load %arg12[%c0_281, %c0_282] : memref<1x32xf32, #tpu.memory_space<vmem>>, vector<1x32xf32>
    %734 = arith.addf %732, %733 : vector<1x32xf32>
    %735 = math.tanh %734 : vector<1x32xf32>
    %c0_283 = arith.constant 0 : index
    %c0_284 = arith.constant 0 : index
    %736 = vector.load %arg13[%c0_283, %c0_284] : memref<32x128xf32, #tpu.memory_space<vmem>>, vector<32x128xf32>
    %cst_285 = arith.constant dense<0.000000e+00> : vector<1x128xf32>
    %737 = tpu.matmul %735, %736, %cst_285 {dimension_numbers = #tpu.dot_dimension_numbers<[1], [0], [0], [1], [0, 0, 1, 1], [], []>} : vector<1x32xf32>, vector<32x128xf32>, vector<1x128xf32> -> vector<1x128xf32>
    %c0_286 = arith.constant 0 : index
    %c0_287 = arith.constant 0 : index
    %738 = vector.load %arg14[%c0_286, %c0_287] : memref<1x128xf32, #tpu.memory_space<vmem>>, vector<1x128xf32>
    %739 = arith.addf %737, %738 : vector<1x128xf32>
    %cst_288 = arith.constant dense<0xFF800000> : vector<1xf32>
    %740 = vector.multi_reduction <maximumf>, %739, %cst_288 [1] : vector<1x128xf32> to vector<1xf32>
    %741 = vector.shape_cast %740 : vector<1xf32> to vector<1x1xf32>
    %742 = vector.broadcast %741 : vector<1x1xf32> to vector<1x128xf32>
    %743 = arith.subf %739, %742 : vector<1x128xf32>
    %744 = math.exp %743 : vector<1x128xf32>
    %cst_289 = arith.constant dense<0.000000e+00> : vector<1xf32>
    %745 = vector.multi_reduction <add>, %744, %cst_289 [1] : vector<1x128xf32> to vector<1xf32>
    %746 = vector.shape_cast %745 : vector<1xf32> to vector<1x1xf32>
    %cst_290 = arith.constant 1.000000e+00 : f32
    %747 = vector.broadcast %cst_290 : f32 to vector<1x1xf32>
    %748 = arith.divf %747, %746 : vector<1x1xf32>
    %749 = vector.broadcast %741 : vector<1x1xf32> to vector<1x128xf32>
    %750 = arith.cmpf oeq, %739, %749 : vector<1x128xf32>
    %c128_i32_291 = arith.constant 128 : i32
    %751 = vector.broadcast %c128_i32_291 : i32 to vector<1x128xi32>
    %752 = arith.select %750, %1, %751 : vector<1x128xi1>, vector<1x128xi32>
    %cst_292 = arith.constant dense<2147483647> : vector<1xi32>
    %753 = vector.multi_reduction <minsi>, %752, %cst_292 [1] : vector<1x128xi32> to vector<1xi32>
    %754 = vector.shape_cast %753 : vector<1xi32> to vector<1x1xi32>
    %755 = vector.broadcast %c4_i32 : i32 to vector<1x128xi32>
    %756 = arith.cmpi eq, %1, %755 : vector<1x128xi32>
    %757 = vector.shape_cast %754 : vector<1x1xi32> to vector<1x1xi32>
    %758 = vector.broadcast %757 : vector<1x1xi32> to vector<1x128xi32>
    %759 = arith.select %756, %758, %671 : vector<1x128xi1>, vector<1x128xi32>
    %760 = vector.shape_cast %748 : vector<1x1xf32> to vector<1x1xf32>
    %761 = vector.broadcast %760 : vector<1x1xf32> to vector<1x128xf32>
    %762 = arith.select %756, %761, %674 : vector<1x128xi1>, vector<1x128xf32>
    %763 = vector.broadcast %754 : vector<1x1xi32> to vector<1x128xi32>
    %764 = arith.cmpi eq, %1, %763 : vector<1x128xi32>
    %765 = arith.extui %764 : vector<1x128xi1> to vector<1x128xi32>
    %766 = arith.sitofp %765 : vector<1x128xi32> to vector<1x128xf32>
    %c0_293 = arith.constant 0 : index
    %c0_294 = arith.constant 0 : index
    %767 = vector.load %arg2[%c0_293, %c0_294] : memref<128x32xf32, #tpu.memory_space<vmem>>, vector<128x32xf32>
    %cst_295 = arith.constant dense<0.000000e+00> : vector<1x32xf32>
    %768 = tpu.matmul %766, %767, %cst_295 {dimension_numbers = #tpu.dot_dimension_numbers<[1], [0], [0], [1], [0, 0, 1, 1], [], []>} : vector<1x128xf32>, vector<128x32xf32>, vector<1x32xf32> -> vector<1x32xf32>
    %c5_i32 = arith.constant 5 : i32
    %c0_296 = arith.constant 0 : index
    %c0_297 = arith.constant 0 : index
    %769 = vector.load %arg7[%c0_296, %c0_297] : memref<32x128xf32, #tpu.memory_space<vmem>>, vector<32x128xf32>
    %cst_298 = arith.constant dense<0.000000e+00> : vector<1x128xf32>
    %770 = tpu.matmul %768, %769, %cst_298 {dimension_numbers = #tpu.dot_dimension_numbers<[1], [0], [0], [1], [0, 0, 1, 1], [], []>} : vector<1x32xf32>, vector<32x128xf32>, vector<1x128xf32> -> vector<1x128xf32>
    %c0_299 = arith.constant 0 : index
    %c0_300 = arith.constant 0 : index
    %771 = vector.load %arg9[%c0_299, %c0_300] : memref<1x128xf32, #tpu.memory_space<vmem>>, vector<1x128xf32>
    %772 = arith.addf %770, %771 : vector<1x128xf32>
    %c0_301 = arith.constant 0 : index
    %c0_302 = arith.constant 0 : index
    %773 = vector.load %arg8[%c0_301, %c0_302] : memref<32x128xf32, #tpu.memory_space<vmem>>, vector<32x128xf32>
    %cst_303 = arith.constant dense<0.000000e+00> : vector<1x128xf32>
    %774 = tpu.matmul %714, %773, %cst_303 {dimension_numbers = #tpu.dot_dimension_numbers<[1], [0], [0], [1], [0, 0, 1, 1], [], []>} : vector<1x32xf32>, vector<32x128xf32>, vector<1x128xf32> -> vector<1x128xf32>
    %c0_304 = arith.constant 0 : index
    %c0_305 = arith.constant 0 : index
    %775 = vector.load %arg10[%c0_304, %c0_305] : memref<1x128xf32, #tpu.memory_space<vmem>>, vector<1x128xf32>
    %776 = arith.addf %774, %775 : vector<1x128xf32>
    %777 = vector.extract_strided_slice %772 {offsets = [0, 0], sizes = [1, 32], strides = [1, 1]} : vector<1x128xf32> to vector<1x32xf32>
    %778 = vector.extract_strided_slice %776 {offsets = [0, 0], sizes = [1, 32], strides = [1, 1]} : vector<1x128xf32> to vector<1x32xf32>
    %779 = arith.addf %777, %778 : vector<1x32xf32>
    %780 = arith.negf %779 : vector<1x32xf32>
    %781 = math.exp %780 : vector<1x32xf32>
    %cst_306 = arith.constant 1.000000e+00 : f32
    %782 = vector.broadcast %cst_306 : f32 to vector<1x32xf32>
    %783 = arith.addf %782, %781 : vector<1x32xf32>
    %784 = arith.divf %782, %783 : vector<1x32xf32>
    %785 = vector.extract_strided_slice %772 {offsets = [0, 32], sizes = [1, 32], strides = [1, 1]} : vector<1x128xf32> to vector<1x32xf32>
    %786 = vector.extract_strided_slice %776 {offsets = [0, 32], sizes = [1, 32], strides = [1, 1]} : vector<1x128xf32> to vector<1x32xf32>
    %787 = arith.addf %785, %786 : vector<1x32xf32>
    %788 = arith.negf %787 : vector<1x32xf32>
    %789 = math.exp %788 : vector<1x32xf32>
    %cst_307 = arith.constant 1.000000e+00 : f32
    %790 = vector.broadcast %cst_307 : f32 to vector<1x32xf32>
    %791 = arith.addf %790, %789 : vector<1x32xf32>
    %792 = arith.divf %790, %791 : vector<1x32xf32>
    %793 = vector.extract_strided_slice %772 {offsets = [0, 64], sizes = [1, 32], strides = [1, 1]} : vector<1x128xf32> to vector<1x32xf32>
    %794 = vector.extract_strided_slice %776 {offsets = [0, 64], sizes = [1, 32], strides = [1, 1]} : vector<1x128xf32> to vector<1x32xf32>
    %795 = arith.mulf %784, %794 : vector<1x32xf32>
    %796 = arith.addf %793, %795 : vector<1x32xf32>
    %797 = math.tanh %796 : vector<1x32xf32>
    %cst_308 = arith.constant 1.000000e+00 : f32
    %798 = vector.broadcast %cst_308 : f32 to vector<1x32xf32>
    %799 = arith.subf %798, %792 : vector<1x32xf32>
    %800 = arith.mulf %799, %797 : vector<1x32xf32>
    %801 = arith.mulf %792, %714 : vector<1x32xf32>
    %802 = arith.addf %800, %801 : vector<1x32xf32>
    %cst_309 = arith.constant dense<0.000000e+00> : vector<1x8xf32>
    %803 = tpu.matmul %802, %325, %cst_309 {dimension_numbers = #tpu.dot_dimension_numbers<[1], [1], [0], [0], [0, 0, 1, 0], [], []>} : vector<1x32xf32>, vector<8x32xf32>, vector<1x8xf32> -> vector<1x8xf32>
    %cst_310 = arith.constant dense<0xFF800000> : vector<1xf32>
    %804 = vector.multi_reduction <maximumf>, %803, %cst_310 [1] : vector<1x8xf32> to vector<1xf32>
    %805 = vector.shape_cast %804 : vector<1xf32> to vector<1x1xf32>
    %806 = vector.broadcast %805 : vector<1x1xf32> to vector<1x8xf32>
    %807 = arith.subf %803, %806 : vector<1x8xf32>
    %808 = math.exp %807 : vector<1x8xf32>
    %cst_311 = arith.constant dense<0.000000e+00> : vector<1xf32>
    %809 = vector.multi_reduction <add>, %808, %cst_311 [1] : vector<1x8xf32> to vector<1xf32>
    %810 = vector.shape_cast %809 : vector<1xf32> to vector<1x1xf32>
    %811 = vector.broadcast %810 : vector<1x1xf32> to vector<1x8xf32>
    %812 = arith.divf %808, %811 : vector<1x8xf32>
    %cst_312 = arith.constant dense<0.000000e+00> : vector<1x32xf32>
    %813 = tpu.matmul %812, %325, %cst_312 {dimension_numbers = #tpu.dot_dimension_numbers<[1], [0], [0], [1], [0, 0, 1, 1], [], []>} : vector<1x8xf32>, vector<8x32xf32>, vector<1x32xf32> -> vector<1x32xf32>
    %c0_313 = arith.constant 0 : index
    %c0_314 = arith.constant 0 : index
    %c0_315 = arith.constant 0 : index
    %814 = vector.load %arg11[%c0_313, %c0_314, %c0_315] : memref<2x32x32xf32, #tpu.memory_space<vmem>>, vector<1x32x32xf32>
    %815 = vector.shape_cast %814 : vector<1x32x32xf32> to vector<32x32xf32>
    %cst_316 = arith.constant dense<0.000000e+00> : vector<1x32xf32>
    %816 = tpu.matmul %802, %815, %cst_316 {dimension_numbers = #tpu.dot_dimension_numbers<[1], [0], [0], [1], [0, 0, 1, 1], [], []>} : vector<1x32xf32>, vector<32x32xf32>, vector<1x32xf32> -> vector<1x32xf32>
    %c1_317 = arith.constant 1 : index
    %c0_318 = arith.constant 0 : index
    %c0_319 = arith.constant 0 : index
    %817 = vector.load %arg11[%c1_317, %c0_318, %c0_319] : memref<2x32x32xf32, #tpu.memory_space<vmem>>, vector<1x32x32xf32>
    %818 = vector.shape_cast %817 : vector<1x32x32xf32> to vector<32x32xf32>
    %cst_320 = arith.constant dense<0.000000e+00> : vector<1x32xf32>
    %819 = tpu.matmul %813, %818, %cst_320 {dimension_numbers = #tpu.dot_dimension_numbers<[1], [0], [0], [1], [0, 0, 1, 1], [], []>} : vector<1x32xf32>, vector<32x32xf32>, vector<1x32xf32> -> vector<1x32xf32>
    %820 = arith.addf %816, %819 : vector<1x32xf32>
    %c0_321 = arith.constant 0 : index
    %c0_322 = arith.constant 0 : index
    %821 = vector.load %arg12[%c0_321, %c0_322] : memref<1x32xf32, #tpu.memory_space<vmem>>, vector<1x32xf32>
    %822 = arith.addf %820, %821 : vector<1x32xf32>
    %823 = math.tanh %822 : vector<1x32xf32>
    %c0_323 = arith.constant 0 : index
    %c0_324 = arith.constant 0 : index
    %824 = vector.load %arg13[%c0_323, %c0_324] : memref<32x128xf32, #tpu.memory_space<vmem>>, vector<32x128xf32>
    %cst_325 = arith.constant dense<0.000000e+00> : vector<1x128xf32>
    %825 = tpu.matmul %823, %824, %cst_325 {dimension_numbers = #tpu.dot_dimension_numbers<[1], [0], [0], [1], [0, 0, 1, 1], [], []>} : vector<1x32xf32>, vector<32x128xf32>, vector<1x128xf32> -> vector<1x128xf32>
    %c0_326 = arith.constant 0 : index
    %c0_327 = arith.constant 0 : index
    %826 = vector.load %arg14[%c0_326, %c0_327] : memref<1x128xf32, #tpu.memory_space<vmem>>, vector<1x128xf32>
    %827 = arith.addf %825, %826 : vector<1x128xf32>
    %cst_328 = arith.constant dense<0xFF800000> : vector<1xf32>
    %828 = vector.multi_reduction <maximumf>, %827, %cst_328 [1] : vector<1x128xf32> to vector<1xf32>
    %829 = vector.shape_cast %828 : vector<1xf32> to vector<1x1xf32>
    %830 = vector.broadcast %829 : vector<1x1xf32> to vector<1x128xf32>
    %831 = arith.subf %827, %830 : vector<1x128xf32>
    %832 = math.exp %831 : vector<1x128xf32>
    %cst_329 = arith.constant dense<0.000000e+00> : vector<1xf32>
    %833 = vector.multi_reduction <add>, %832, %cst_329 [1] : vector<1x128xf32> to vector<1xf32>
    %834 = vector.shape_cast %833 : vector<1xf32> to vector<1x1xf32>
    %cst_330 = arith.constant 1.000000e+00 : f32
    %835 = vector.broadcast %cst_330 : f32 to vector<1x1xf32>
    %836 = arith.divf %835, %834 : vector<1x1xf32>
    %837 = vector.broadcast %829 : vector<1x1xf32> to vector<1x128xf32>
    %838 = arith.cmpf oeq, %827, %837 : vector<1x128xf32>
    %c128_i32_331 = arith.constant 128 : i32
    %839 = vector.broadcast %c128_i32_331 : i32 to vector<1x128xi32>
    %840 = arith.select %838, %1, %839 : vector<1x128xi1>, vector<1x128xi32>
    %cst_332 = arith.constant dense<2147483647> : vector<1xi32>
    %841 = vector.multi_reduction <minsi>, %840, %cst_332 [1] : vector<1x128xi32> to vector<1xi32>
    %842 = vector.shape_cast %841 : vector<1xi32> to vector<1x1xi32>
    %843 = vector.broadcast %c5_i32 : i32 to vector<1x128xi32>
    %844 = arith.cmpi eq, %1, %843 : vector<1x128xi32>
    %845 = vector.shape_cast %842 : vector<1x1xi32> to vector<1x1xi32>
    %846 = vector.broadcast %845 : vector<1x1xi32> to vector<1x128xi32>
    %847 = arith.select %844, %846, %759 : vector<1x128xi1>, vector<1x128xi32>
    %848 = vector.shape_cast %836 : vector<1x1xf32> to vector<1x1xf32>
    %849 = vector.broadcast %848 : vector<1x1xf32> to vector<1x128xf32>
    %850 = arith.select %844, %849, %762 : vector<1x128xi1>, vector<1x128xf32>
    %851 = vector.broadcast %842 : vector<1x1xi32> to vector<1x128xi32>
    %852 = arith.cmpi eq, %1, %851 : vector<1x128xi32>
    %853 = arith.extui %852 : vector<1x128xi1> to vector<1x128xi32>
    %854 = arith.sitofp %853 : vector<1x128xi32> to vector<1x128xf32>
    %c0_333 = arith.constant 0 : index
    %c0_334 = arith.constant 0 : index
    %855 = vector.load %arg2[%c0_333, %c0_334] : memref<128x32xf32, #tpu.memory_space<vmem>>, vector<128x32xf32>
    %cst_335 = arith.constant dense<0.000000e+00> : vector<1x32xf32>
    %856 = tpu.matmul %854, %855, %cst_335 {dimension_numbers = #tpu.dot_dimension_numbers<[1], [0], [0], [1], [0, 0, 1, 1], [], []>} : vector<1x128xf32>, vector<128x32xf32>, vector<1x32xf32> -> vector<1x32xf32>
    %c6_i32 = arith.constant 6 : i32
    %c0_336 = arith.constant 0 : index
    %c0_337 = arith.constant 0 : index
    %857 = vector.load %arg15[%c0_336, %c0_337] : memref<1x128xi32, #tpu.memory_space<vmem>>, vector<1x128xi32>
    tpu.vector_store %arg15[%c0_336, %c0_337], %847 {strides = array<i32>} : memref<1x128xi32, #tpu.memory_space<vmem>>, vector<1x128xi32>,
    %c0_338 = arith.constant 0 : index
    %c0_339 = arith.constant 0 : index
    %858 = vector.load %arg16[%c0_338, %c0_339] : memref<1x128xf32, #tpu.memory_space<vmem>>, vector<1x128xf32>
    tpu.vector_store %arg16[%c0_338, %c0_339], %850 {strides = array<i32>} : memref<1x128xf32, #tpu.memory_space<vmem>>, vector<1x128xf32>,
    return
  }
}

</mosaic_0001>

<bundles_post_ra>
// kernel: greedy_search_decoder.1
= control target key start
LH: loop header
LB: loop body
LE: loop exit
PB: predicated region body
PF: predicated region fallthrough
CT: control target
= control target key end

     0   :  { %s8211_s0 = inlined_call_operand.<no memory space> [shape: s32[1], index: 0, kind: input, shape index: {}]   ;;  %s8212_s1 = inlined_call_operand.vmem [shape: s32[8,1], index: 1, kind: input, shape index: {}]   ;;  %s8213_s2 = inlined_call_operand.vmem [shape: f32[128,32], index: 2, kind: input, shape index: {}]   ;;  %s8214_s3 = inlined_call_operand.vmem [shape: f32[32,128], index: 3, kind: input, shape index: {}]   ;;  %s8215_s4 = inlined_call_operand.vmem [shape: f32[32,128], index: 4, kind: input, shape index: {}]   ;;  %s8216_s5 = inlined_call_operand.vmem [shape: f32[1,128], index: 5, kind: input, shape index: {}]   ;;  %s8217_s6 = inlined_call_operand.hbm [shape: f32[1,128], index: 6, kind: input, shape index: {}]   ;;  %s8218_s7 = inlined_call_operand.vmem [shape: f32[32,128], index: 7, kind: input, shape index: {}]   ;;  %s8219_s8 = inlined_call_operand.hbm [shape: f32[32,128], index: 8, kind: input, shape index: {}]   ;;  %s8220_s9 = inlined_call_operand.hbm [shape: f32[1,128], index: 9, kind: input, shape index: {}]   ;;  %s8221_s10 = inlined_call_operand.hbm [shape: f32[1,128], index: 10, kind: input, shape index: {}]   ;;  %s8222_s11 = inlined_call_operand.vmem [shape: f32[2,32,32], index: 11, kind: input, shape index: {}]   ;;  %s8223_s12 = inlined_call_operand.hbm [shape: f32[1,32], index: 12, kind: input, shape index: {}]   ;;  %s8224_s13 = inlined_call_operand.vmem [shape: f32[32,128], index: 13, kind: input, shape index: {}]   ;;  %s8225_s14 = inlined_call_operand.hbm [shape: f32[1,128], index: 14, kind: input, shape index: {}]   ;;  %s8226_s15 = inlined_call_operand.vmem [shape: s32[1,128], index: 15, kind: output, shape index: {0}]   ;;  %s8227_s16 = inlined_call_operand.vmem [shape: f32[1,128], index: 16, kind: output, shape index: {1}]  }
   0x1   :  { %8228 = sst [smem:[#allocation18_spill]] %s8211_s0 }
   0x2   :  { %8229 = sst [smem:[#allocation19_spill]] %s8226_s15 }
   0x3   :  { %23 = vsyncpa [#allocation5], 0 }
   0x4   :  { %24 = vsyncpa [#allocation7], 0 }
   0x5   :  { %25 = vsyncpa [#allocation10], 0 }
   0x6   :  { %26 = vsyncpa [#allocation13], 0  ;;  %s7003_s21 = smov [#allocation6]   ;;  %s6863_s25 = scalar_lea.hbm %s8219_s8, 512 }
   0x7   :  { %s56_s22 = sshll.u32 %s7003_s21, 4  ;;  %p6864_p0 = scmp.ne.s32.totalorder %s8219_s8, %s6863_s25  ;;  %s57_s22 = int_to_ptr.vmem [resolvable:$true] %s56_s22 }
   0x8   :  { %p6867_p1 = scmp.lt.u32.totalorder %s6863_s25, %s8219_s8 }
   0xa   :  { %p6869_p2 = pnand %p6867_p1, %p6864_p0 }
   0xc   :  { %6872 = shalt.err (!%p6869_p2)
}
   0xd   :  { %s6873_s30 = scalar_lea.vmem %s57_s22, 512  ;;  %p6878_p4 = scmp.lt.s32.totalorder %s57_s22, %s57_s22 }
   0xe   :  { %p6874_p3 = scmp.ne.s32.totalorder %s57_s22, %s6873_s30  ;;  %p6879_p5 = scmp.lt.s32.totalorder %s6873_s30, %s6873_s30 }
  0x10   :  { %p6880_p6 = por %p6879_p5, %p6878_p4 }
  0x12   :  { %p6881_p7 = pnand %p6880_p6, %p6874_p3 }
  0x14   :  { %6884 = shalt.err (!%p6881_p7)
}
  0x15   :  { %s7004_s0 = smov 128   ;;  %s7005_s17 = smov 8  }
  0x16   :  { %62 = dma.hbm_to_vmem [thread:$0]  %s8219_s8, 512, %s57_s22, [#allocation7], %s7004_s0, %s7004_s0, %s7005_s17  }
  0x17   :  { %s7006_s20 = smov [#allocation9]   ;;  %s7007_s23 = smov [#allocation4]  }
  0x18   :  { %s79_s21 = sshll.u32 %s7006_s20, 4  ;;  %s45_s24 = sshll.u32 %s7007_s23, 4  ;;  %s80_s21 = int_to_ptr.vmem [resolvable:$true] %s79_s21  ;;  %s46_s24 = int_to_ptr.vmem [resolvable:$true] %s45_s24 }
  0x19   :  { %s6885_s27 = scalar_lea.hbm %s8221_s10, 16 }
  0x1a   :  { %p6886_p8 = scmp.ne.s32.totalorder %s8221_s10, %s6885_s27  ;;  %p6889_p9 = scmp.lt.u32.totalorder %s6885_s27, %s8221_s10 }
  0x1c   :  { %p6891_p10 = pnand %p6889_p9, %p6886_p8 }
  0x1e   :  { %6894 = shalt.err (!%p6891_p10)
}
  0x1f   :  { %s6895_s8 = scalar_lea.vmem %s80_s21, 16  ;;  %s6899_s22 = scalar_lea.vmem %s80_s21, 32 }
  0x20   :  { %p6896_p11 = scmp.ne.s32.totalorder %s80_s21, %s6895_s8  ;;  %p6900_p12 = scmp.lt.s32.totalorder %s80_s21, %s80_s21 }
  0x21   :  { %p6901_p13 = scmp.lt.s32.totalorder %s6899_s22, %s6895_s8 }
  0x23   :  { %p6902_p0 = por %p6901_p13, %p6900_p12 }
  0x25   :  { %p6903_p1 = pnand %p6902_p0, %p6896_p11 }
  0x27   :  { %6906 = shalt.err (!%p6903_p1)
}
  0x28   :  { %82 = dma.hbm_to_vmem [thread:$0]  %s8221_s10, 16, %s80_s21, [#allocation10]  }
  0x29   :  { %s6907_s15 = scalar_lea.hbm %s8217_s6, 16 }
  0x2a   :  { %p6908_p2 = scmp.ne.s32.totalorder %s8217_s6, %s6907_s15  ;;  %p6911_p3 = scmp.lt.u32.totalorder %s6907_s15, %s8217_s6 }
  0x2c   :  { %p6913_p4 = pnand %p6911_p3, %p6908_p2 }
  0x2e   :  { %6916 = shalt.err (!%p6913_p4)
}
  0x2f   :  { %s6917_s27 = scalar_lea.vmem %s46_s24, 16  ;;  %s6921_s28 = scalar_lea.vmem %s46_s24, 32 }
  0x30   :  { %p6918_p5 = scmp.ne.s32.totalorder %s46_s24, %s6917_s27  ;;  %p6922_p6 = scmp.lt.s32.totalorder %s46_s24, %s46_s24 }
  0x31   :  { %p6923_p7 = scmp.lt.s32.totalorder %s6921_s28, %s6917_s27 }
  0x33   :  { %p6924_p8 = por %p6923_p7, %p6922_p6 }
  0x35   :  { %p6925_p9 = pnand %p6924_p8, %p6918_p5 }
  0x37   :  { %6928 = shalt.err (!%p6925_p9)
}
  0x38   :  { %48 = dma.hbm_to_vmem [thread:$0]  %s8217_s6, 16, %s46_s24, [#allocation5]  }
  0x39   :  { %s7008_s29 = smov [#allocation8]   ;;  %s7009_s8 = smov [#allocation11]  }
  0x3a   :  { %s69_s30 = sshll.u32 %s7008_s29, 4  ;;  %s91_s22 = sshll.u32 %s7009_s8, 4  ;;  %s70_s30 = int_to_ptr.vmem [resolvable:$true] %s69_s30  ;;  %s92_s22 = int_to_ptr.vmem [resolvable:$true] %s91_s22 }
  0x3b   :  { %s6929_s18 = scalar_lea.hbm %s8220_s9, 16 }
  0x3c   :  { %p6930_p10 = scmp.ne.s32.totalorder %s8220_s9, %s6929_s18  ;;  %p6933_p11 = scmp.lt.u32.totalorder %s6929_s18, %s8220_s9 }
  0x3e   :  { %p6935_p12 = pnand %p6933_p11, %p6930_p10 }
  0x40   :  { %6938 = shalt.err (!%p6935_p12)
}
  0x41   :  { %s6939_s6 = scalar_lea.vmem %s70_s30, 16  ;;  %s6943_s24 = scalar_lea.vmem %s70_s30, 32 }
  0x42   :  { %p6940_p13 = scmp.ne.s32.totalorder %s70_s30, %s6939_s6  ;;  %p6944_p0 = scmp.lt.s32.totalorder %s70_s30, %s70_s30 }
  0x43   :  { %p6945_p1 = scmp.lt.s32.totalorder %s6943_s24, %s6939_s6 }
  0x45   :  { %p6946_p2 = por %p6945_p1, %p6944_p0 }
  0x47   :  { %p6947_p3 = pnand %p6946_p2, %p6940_p13 }
  0x49   :  { %6950 = shalt.err (!%p6947_p3)
}
  0x4a   :  { %72 = dma.hbm_to_vmem [thread:$0]  %s8220_s9, 16, %s70_s30, [#allocation7]  }
  0x4b   :  { %s6951_s10 = scalar_lea.hbm %s8223_s12, 16 }
  0x4c   :  { %p6952_p4 = scmp.ne.s32.totalorder %s8223_s12, %s6951_s10  ;;  %p6955_p5 = scmp.lt.u32.totalorder %s6951_s10, %s8223_s12 }
  0x4e   :  { %p6957_p6 = pnand %p6955_p5, %p6952_p4 }
  0x50   :  { %6960 = shalt.err (!%p6957_p6)
}
  0x51   :  { %s6961_s17 = scalar_lea.vmem %s92_s22, 16  ;;  %s6965_s18 = scalar_lea.vmem %s92_s22, 32 }
  0x52   :  { %p6962_p7 = scmp.ne.s32.totalorder %s92_s22, %s6961_s17  ;;  %p6966_p8 = scmp.lt.s32.totalorder %s92_s22, %s92_s22 }
  0x53   :  { %p6967_p9 = scmp.lt.s32.totalorder %s6965_s18, %s6961_s17 }
  0x55   :  { %p6968_p10 = por %p6967_p9, %p6966_p8 }
  0x57   :  { %p6969_p11 = pnand %p6968_p10, %p6962_p7 }
  0x59   :  { %6972 = shalt.err (!%p6969_p11)
}
  0x5a   :  { %94 = dma.hbm_to_vmem [thread:$0]  %s8223_s12, 16, %s92_s22, [#allocation10]  }
  0x5b   :  { %s7010_s19 = smov [#allocation12]   ;;  %s6973_s6 = scalar_lea.hbm %s8225_s14, 16 }
  0x5c   :  { %s103_s15 = sshll.u32 %s7010_s19, 4  ;;  %p6974_p12 = scmp.ne.s32.totalorder %s8225_s14, %s6973_s6  ;;  %s104_s15 = int_to_ptr.vmem [resolvable:$true] %s103_s15 }
  0x5d   :  { %p6977_p13 = scmp.lt.u32.totalorder %s6973_s6, %s8225_s14 }
  0x5f   :  { %p6979_p0 = pnand %p6977_p13, %p6974_p12 }
  0x61   :  { %6982 = shalt.err (!%p6979_p0)
}
  0x62   :  { %s6983_s28 = scalar_lea.vmem %s104_s15, 16  ;;  %s6987_s12 = scalar_lea.vmem %s104_s15, 32 }
  0x63   :  { %p6984_p1 = scmp.ne.s32.totalorder %s104_s15, %s6983_s28  ;;  %p6988_p2 = scmp.lt.s32.totalorder %s104_s15, %s104_s15 }
  0x64   :  { %p6989_p3 = scmp.lt.s32.totalorder %s6987_s12, %s6983_s28 }
  0x66   :  { %p6990_p4 = por %p6989_p3, %p6988_p2 }
  0x68   :  { %p6991_p5 = pnand %p6990_p4, %p6984_p1 }
  0x6a   :  { %6994 = shalt.err (!%p6991_p5)
}
  0x6b   :  { %106 = dma.hbm_to_vmem [thread:$0]  %s8225_s14, 16, %s104_s15, [#allocation13]  }
  0x6c   :  { %6995 = dma.done.wait [#allocation5], 16  }
  0x6d   :  { %6996 = vsyncadd [#allocation5], 4294967280 }
  0x6e   :  { %6997 = dma.done.wait [#allocation7], 528  }
  0x6f   :  { %6998 = vsyncadd [#allocation7], 4294966768 }
  0x70   :  { %6999 = dma.done.wait [#allocation10], 32  }
  0x71   :  { %7000 = vsyncadd [#allocation10], 4294967264 }
  0x72   :  { %7001 = dma.done.wait [#allocation13], 16  }
  0x73   :  { %7002 = vsyncadd [#allocation13], 4294967280  ;;  %v7011_v0 = vmov 0   ;;  %v7012_v1 = vmov 0.0|0.0   ;;  %v128_v2 = vld [vmem:[%s8212_s1] sm:$0xff]  ;;  %v136_v4 = vld [vmem:[%s8213_s2 + $0x8] sm:$0xff]  ;;  %v126_v34 = vlaneseq }
  0x74   :  { %6713 = vset.pattern.permute.xlu0 %v7011_v0  ;;  %6319 = vmatprep.subr.bf16.mxu0 %v7012_v1  ;;  %v135_v3 = vld [vmem:[%s8213_s2] sm:$0xff]  ;;  %v137_v6 = vld [vmem:[%s8213_s2 + $0x10] sm:$0xff]  ;;  %v138_v7 = vld [vmem:[%s8213_s2 + $0x18] sm:$0xff]  ;;  %vm7013_vm0 = vmmov 0   ;;  %v7014_v8 = vmov 0.0   ;;  %v7015_v37 = vmov 1.0  }
  0x75   :  { %6343 = vmatprep.subr.bf16.mxu1 %v7012_v1  ;;  %130 = vperm.xlu0 %6713, %v128_v2   ;;  %v6320_v5 = vpack.c.bf16 %v136_v4, %v135_v3  ;;  %v6323_v9 = vpack.c.bf16 %v138_v7, %v137_v6  ;;  %v139_v10 = vld [vmem:[%s8213_s2 + $0x20] sm:$0xff]  ;;  %v140_v11 = vld [vmem:[%s8213_s2 + $0x28] sm:$0xff]  ;;  %v223_v14 = vld [vmem:[%s8214_s3 + $0x10] sm:$0xff]  ;;  %v7255_v35 = vand.u32 127, %v126_v34  ;;  %vm232_vm2 = vcmask 261120   ;;  %s8230_s18 = sld [smem:[#allocation18_spill]] }
  0x76   :  { %5652 = vmatprep.mubr.msk.f32.mxu0 %vm7013_vm0, %v7014_v8  ;;  %5663 = vmatprep.mubr.msk.f32.mxu1 %vm7013_vm0, %v7014_v8  ;;  %v221_v12 = vld [vmem:[%s8214_s3] sm:$0xff]  ;;  %v222_v13 = vld [vmem:[%s8214_s3 + $0x8] sm:$0xff]  ;;  %v224_v15 = vld [vmem:[%s8214_s3 + $0x18] sm:$0xff]  ;;  %v6326_v16 = vpack.c.bf16 %v140_v11, %v139_v10  ;;  %v307_v0 = vshrl.u32 %v126_v34, 7  ;;  %s7018_s9 = smov 32   ;;  %vm421_vm4 = vcmask 253952  }
  0x77   :  { %6321 = vmatpush3.bf16.msra.mxu0 %v6320_v5  ;;  %v6344_v17 = vpack.c.bf16 %v222_v13, %v221_v12  ;;  %v141_v18 = vld [vmem:[%s8213_s2 + $0x30] sm:$0xff]  ;;  %v142_v19 = vld [vmem:[%s8213_s2 + $0x38] sm:$0xff]  ;;  %v6347_v20 = vpack.c.bf16 %v224_v15, %v223_v14  ;;  %v143_v22 = vld [vmem:[%s8213_s2 + $0x40] sm:$0xff]  ;;  %vm668_vm5 = vcmask 256002   ;;  %vm922_vm6 = vcmask 258052   ;;  %s8231_s12 = sld [smem:[#allocation19_spill]] }
  0x78   :  { %6322 = vmatprep.subr.bf16.mxu0 %v7012_v1  ;;  %v6329_v21 = vpack.c.bf16 %v142_v19, %v141_v18  ;;  %v144_v23 = vld [vmem:[%s8213_s2 + $0x48] sm:$0xff]  ;;  %v145_v25 = vld [vmem:[%s8213_s2 + $0x50] sm:$0xff]  ;;  %v146_v26 = vld [vmem:[%s8213_s2 + $0x58] sm:$0xff]  ;;  %vm1176_vm7 = vcmask 260102   ;;  %vm541_vm8 = vcmask 254977   ;;  %vm795_vm9 = vcmask 257027  }
  0x79   :  { %6345 = vmatpush3.bf16.msra.mxu1 %v6344_v17  ;;  %v6332_v24 = vpack.c.bf16 %v144_v23, %v143_v22  ;;  %v6335_v27 = vpack.c.bf16 %v146_v26, %v145_v25  ;;  %v147_v28 = vld [vmem:[%s8213_s2 + $0x60] sm:$0xff]  ;;  %v148_v29 = vld [vmem:[%s8213_s2 + $0x68] sm:$0xff]  ;;  %v149_v31 = vld [vmem:[%s8213_s2 + $0x70] sm:$0xff]  ;;  %vm1049_vm10 = vcmask 259077   ;;  %vm1303_vm11 = vcmask 261127  }
  0x7a   :  { %6346 = vmatprep.subr.bf16.mxu1 %v7012_v1  ;;  %v6338_v30 = vpack.c.bf16 %v148_v29, %v147_v28  ;;  %v150_v32 = vld [vmem:[%s8213_s2 + $0x78] sm:$0xff]  ;;  %v312_v38 = vld [vmem:[%s8215_s4] sm:$0xff]  ;;  %v313_v39 = vld [vmem:[%s8215_s4 + $0x8] sm:$0xff]  ;;  %vm1580_vm12 = vcmask 57344   ;;  %vm1592_vm13 = vcmask 64512   ;;  %vm1899_vm14 = vcmask 1040384  }
  0x7b   :  { %6324 = vmatpush3.bf16.msra.mxu0 %v6323_v9  ;;  %v6341_v33 = vpack.c.bf16 %v150_v32, %v149_v31  ;;  %v7267_v40 = vpack.c.bf16 %v313_v39, %v312_v38  ;;  %v314_v41 = vld [vmem:[%s8215_s4 + $0x10] sm:$0xff]  ;;  %v315_v42 = vld [vmem:[%s8215_s4 + $0x18] sm:$0xff]  ;;  %v316_v48 = vld [vmem:[#allocation4] sm:$0x1]  ;;  %s7016_s4 = smov 64   ;;  %v308_v2 = vstv %s8230_s18 }
  0x7c   :  { %6325 = vmatprep.subr.bf16.mxu0 %v7012_v1  ;;  %v7277_v43 = vpack.c.bf16 %v315_v42, %v314_v41  ;;  %v5213_v52 = vld [vmem:[%s8216_s5] ss:$0 sm:$0xff]  ;;  %s7017_s5 = smov 96   ;;  %vm309_vm3 = vcmp.lt.s32.totalorder %v307_v0, %v308_v2  ;;  %v430_v15 = vld [vmem:[#allocation4] sm:$0x1] }
  0x7d   :  { %6348 = vmatpush3.bf16.msra.mxu1 %v6347_v20  ;;  %v7309_v3 = vsel %vm309_vm3, 1.0, %v7014_v8 }
  0x7e   :  { %6349 = vmatprep.subr.bf16.mxu1 %v7012_v1  ;;  %v7312_v5 = vsub.f32 1.0, %v7309_v3 }
  0x7f   :  { %6327 = vmatpush3.bf16.msra.mxu0 %v6326_v16 }
  0x80   :  { %6328 = vmatprep.subr.bf16.mxu0 %v7012_v1  ;;  %v424_v11 = vmul.f32 0.0, %v7312_v5 }
  0x83   :  { %6330 = vmatpush3.bf16.msra.mxu0 %v6329_v21 }
  0x84   :  { %6331 = vmatprep.subr.bf16.mxu0 %v7012_v1 }
  0x87   :  { %6333 = vmatpush3.bf16.msra.mxu0 %v6332_v24 }
  0x88   :  { %6334 = vmatprep.subr.bf16.mxu0 %v7012_v1 }
  0x8b   :  { %6336 = vmatpush3.bf16.msra.mxu0 %v6335_v27 }
  0x8c   :  { %6337 = vmatprep.subr.bf16.mxu0 %v7012_v1 }
  0x8f   :  { %6339 = vmatpush3.bf16.msra.mxu0 %v6338_v30 }
  0x90   :  { %6340 = vmatprep.subr.bf16.mxu0 %v7012_v1 }
  0x93   :  { %6342 = vmatpush3.bf16.msra.mxu0 %v6341_v33 }
  0x94   :  { %6367 = vmatprep.subr.bf16.mxu0 %v7012_v1 }
  0xf4   :  { %v131_v36 = vpop.permute.xlu0 %130 }
  0xf5   :  { %vm132_vm1 = vcmp.eq.s32.totalorder %v7255_v35, %v131_v36 }
  0xf6   :  { %5653 = vmatmul.mubr.msk.f32.vlgmr.msra.gmra.mrb[0].mxu0 %vm132_vm1, %v7015_v37 }
  0xf7   :  { %5707 = vmatprep.mubr.msk.f32.mxu0 %vm7013_vm0, %v7014_v8  ;;  %6369 = vmatpush3.bf16.msra.mxu0 %v7267_v40 }
  0xf8   :  { %6370 = vmatprep.subr.bf16.mxu0 %v7012_v1 }
  0xfb   :  { %6372 = vmatpush3.bf16.msra.mxu0 %v7277_v43 }
  0xfc   :  { %6379 = vmatprep.subr.bf16.mxu0 %v7012_v1 }
 0x1c9   :  { %v217_v44 = vpop.f32.mrb[0].mxu0 }
 0x1ca   :  { %v5654_v45 = vpop.f32.mrb[1].mxu0  ;;  %5664 = vmatmul.mubr.msk.f32.vlgmr.msra.gmra.mrb[0].mxu1 %vm232_vm2, %v217_v44 }
 0x1cb   :  { %6351 = vmatpush3.bf16.msra.mxu1 %v7267_v40  ;;  %5674 = vmatprep.mubr.msk.f32.mxu1 %vm7013_vm0, %v7014_v8 }
 0x1cc   :  { %6352 = vmatprep.subr.bf16.mxu1 %v7012_v1 }
 0x1cf   :  { %6354 = vmatpush3.bf16.msra.mxu1 %v7277_v43 }
 0x1d0   :  { %6355 = vmatprep.subr.bf16.mxu1 %v7012_v1 }
 0x1d2   :  { %5675 = vmatmul.mubr.f32.vlgmr.msra.gmra.mrb[2].mxu1 %v7014_v8 }
 0x1d3   :  { %6357 = vmatpush3.bf16.msra.mxu1 %v7267_v40  ;;  %5685 = vmatprep.mubr.msk.f32.mxu1 %vm7013_vm0, %v7014_v8 }
 0x1d4   :  { %6358 = vmatprep.subr.bf16.mxu1 %v7012_v1 }
 0x1d7   :  { %6360 = vmatpush3.bf16.msra.mxu1 %v7277_v43 }
 0x1d8   :  { %6361 = vmatprep.subr.bf16.mxu1 %v7012_v1 }
 0x29d   :  { %v302_v46 = vpop.f32.mrb[0].mxu1 }
 0x29e   :  { %v5665_v47 = vpop.f32.mrb[1].mxu1  ;;  %v7299_v53 = vadd.f32 %v5213_v52, %v302_v46 }
 0x29f   :  { %v556_v47 = vld [vmem:[#allocation4] sm:$0x1] }
 0x2a5   :  { %v386_v49 = vpop.f32.mrb[2].mxu1 }
 0x2a6   :  { %v387_v50 = vadd.f32 %v386_v49, %v316_v48  ;;  %v5676_v51 = vpop.f32.mrb[3].mxu1 }
 0x2a8   :  { %398 = vrot.lane.b32.xlu0 %v387_v50, %s7016_s4  ;;  %v390_v54 = vadd.f32 %v387_v50, %v7299_v53 }
 0x2aa   :  { %v5216_v55 = vmul.f32 -1.442695, %v390_v54 }
 0x2ac   :  { %6714 = vpow2.f32 %v5216_v55 }
 0x2b6   :  { %v6715_v56 = vpop.eup %6714 }
 0x2b7   :  { %v394_v57 = vadd.f32 1.0, %v6715_v56 }
 0x2b9   :  { %6716 = vrcp.f32 %v394_v57 }
 0x2c3   :  { %v6717_v58 = vpop.eup %6716 }
 0x2c4   :  { %v408_v4 = vsub.f32 1.0, %v6717_v58  ;;  %v414_v7 = vmul.f32 0.0, %v6717_v58 }
 0x31a   :  { %v399_v59 = vpop.permute.xlu0 %398 }
 0x31b   :  { %v401_v60 = vmul.f32 %v6717_v58, %v399_v59 }
 0x31d   :  { %403 = vrot.lane.b32.xlu1 %v401_v60, %s7016_s4 }
 0x38f   :  { %v404_v61 = vpop.permute.xlu1 %403 }
 0x390   :  { %v406_v62 = vadd.f32 %v404_v61, %v7299_v53 }
 0x392   :  { %6718 = vtanh.f32 %v406_v62 }
 0x39c   :  { %v6719_v63 = vpop.eup %6718 }
 0x39d   :  { %410 = vrot.lane.b32.xlu1 %v6719_v63, %s7017_s5 }
 0x40f   :  { %v411_v6 = vpop.permute.xlu1 %410 }
 0x410   :  { %v413_v9 = vmul.f32 %v411_v6, %v408_v4 }
 0x412   :  { %v415_v10 = vadd.f32 %v414_v7, %v413_v9 }
 0x414   :  { %v7316_v12 = vmul.f32 %v7309_v3, %v415_v10 }
 0x416   :  { %v425_v13 = vadd.f32 %v424_v11, %v7316_v12 }
 0x418   :  { %432 = vrot.lane.b32.xlu0 %v425_v13, %s7017_s5  ;;  %v532_v20 = vrot.slane %v425_v13, 7 }
 0x48a   :  { %v433_v14 = vpop.permute.xlu0 %432 }
 0x48b   :  { %5686 = vmatmul.mubr.msk.f32.vlgmr.msra.gmra.mrb[4].mxu1 %vm232_vm2, %v433_v14 }
 0x48c   :  { %6363 = vmatpush3.bf16.msra.mxu1 %v7267_v40  ;;  %5696 = vmatprep.mubr.msk.f32.mxu1 %vm7013_vm0, %v7014_v8 }
 0x48d   :  { %6364 = vmatprep.subr.bf16.mxu1 %v7012_v1 }
 0x490   :  { %6366 = vmatpush3.bf16.msra.mxu1 %v7277_v43 }
 0x491   :  { %6373 = vmatprep.subr.bf16.mxu1 %v7012_v1 }
 0x55e   :  { %v502_v16 = vpop.f32.mrb[4].mxu1 }
 0x55f   :  { %v503_v17 = vadd.f32 %v502_v16, %v430_v15  ;;  %v5687_v18 = vpop.f32.mrb[5].mxu1 }
 0x561   :  { %v507_v19 = vrot.slane %v503_v17, 7  ;;  %v683_v17 = vld [vmem:[#allocation4] sm:$0x1] }
 0x563   :  { %516 = vrot.lane.b32.xlu1 %v507_v19, %s7016_s4  ;;  %v509_v21 = vadd.f32 %v507_v19, %v7299_v53 }
 0x565   :  { %v5218_v22 = vmul.f32 -1.442695, %v509_v21 }
 0x567   :  { %543 = vrot.lane.b32.xlu1 %v532_v20, %s7017_s5  ;;  %6720 = vpow2.f32 %v5218_v22 }
 0x571   :  { %v6721_v23 = vpop.eup %6720 }
 0x572   :  { %v513_v24 = vadd.f32 1.0, %v6721_v23 }
 0x574   :  { %6722 = vrcp.f32 %v513_v24 }
 0x57e   :  { %v6723_v25 = vpop.eup %6722 }
 0x57f   :  { %v526_v33 = vsub.f32 1.0, %v6723_v25  ;;  %v534_v36 = vmul.f32 %v6723_v25, %v532_v20 }
 0x5d5   :  { %v517_v26 = vpop.permute.xlu1 %516 }
 0x5d6   :  { %v519_v27 = vmul.f32 %v6723_v25, %v517_v26 }
 0x5d8   :  { %521 = vrot.lane.b32.xlu0 %v519_v27, %s7016_s4 }
 0x5d9   :  { %v544_v28 = vpop.permute.xlu1 %543 }
 0x5da   :  { %v546_v29 = vmul.f32 %v544_v28, %v7312_v5 }
 0x5dc   :  { %548 = vrot.lane.b32.xlu1 %v546_v29, %s7018_s9 }
 0x64a   :  { %v522_v30 = vpop.permute.xlu0 %521 }
 0x64b   :  { %v524_v31 = vadd.f32 %v522_v30, %v7299_v53 }
 0x64d   :  { %6724 = vtanh.f32 %v524_v31 }
 0x64e   :  { %v549_v42 = vpop.permute.xlu1 %548 }
 0x657   :  { %v6725_v32 = vpop.eup %6724 }
 0x658   :  { %528 = vrot.lane.b32.xlu0 %v6725_v32, %s7017_s5 }
 0x6ca   :  { %v529_v34 = vpop.permute.xlu0 %528 }
 0x6cb   :  { %v531_v38 = vmul.f32 %v529_v34, %v526_v33 }
 0x6cd   :  { %v535_v39 = vadd.f32 %v534_v36, %v531_v38 }
 0x6cf   :  { %v7336_v41 = vmul.f32 %v7309_v3, %v535_v39 }
 0x6d1   :  { %v551_v44 = vadd.f32 %v549_v42, %v7336_v41 }
 0x6d3   :  { %v558_v45 = vrot.slane %v551_v44, 1  ;;  %v659_v52 = vrot.slane %v551_v44, 7 }
 0x6d5   :  { %559 = vrot.lane.b32.xlu0 %v558_v45, %s7017_s5 }
 0x747   :  { %v560_v46 = vpop.permute.xlu0 %559 }
 0x748   :  { %5697 = vmatmul.mubr.msk.f32.vlgmr.msra.gmra.mrb[6].mxu1 %vm232_vm2, %v560_v46 }
 0x749   :  { %6375 = vmatpush3.bf16.msra.mxu1 %v7267_v40  ;;  %5718 = vmatprep.mubr.msk.f32.mxu1 %vm7013_vm0, %v7014_v8 }
 0x74a   :  { %6376 = vmatprep.subr.bf16.mxu1 %v7012_v1 }
 0x74d   :  { %6378 = vmatpush3.bf16.msra.mxu1 %v7277_v43 }
 0x74e   :  { %6385 = vmatprep.subr.bf16.mxu1 %v7012_v1 }
 0x81b   :  { %v629_v48 = vpop.f32.mrb[6].mxu1 }
 0x81c   :  { %v630_v49 = vadd.f32 %v629_v48, %v556_v47  ;;  %v5698_v50 = vpop.f32.mrb[7].mxu1 }
 0x81d   :  { %v810_v50 = vld [vmem:[#allocation4] sm:$0x1] }
 0x81e   :  { %v634_v51 = vrot.slane %v630_v49, 6 }
 0x820   :  { %643 = vrot.lane.b32.xlu1 %v634_v51, %s7016_s4  ;;  %v636_v54 = vadd.f32 %v634_v51, %v7299_v53 }
 0x822   :  { %v5220_v55 = vmul.f32 -1.442695, %v636_v54 }
 0x824   :  { %670 = vrot.lane.b32.xlu1 %v659_v52, %s7017_s5  ;;  %6726 = vpow2.f32 %v5220_v55 }
 0x82e   :  { %v6727_v56 = vpop.eup %6726 }
 0x82f   :  { %v640_v57 = vadd.f32 1.0, %v6727_v56 }
 0x831   :  { %6728 = vrcp.f32 %v640_v57 }
 0x83b   :  { %v6729_v58 = vpop.eup %6728 }
 0x83c   :  { %v653_v4 = vsub.f32 1.0, %v6729_v58  ;;  %v661_v7 = vmul.f32 %v6729_v58, %v659_v52 }
 0x892   :  { %v644_v59 = vpop.permute.xlu1 %643 }
 0x893   :  { %v646_v60 = vmul.f32 %v6729_v58, %v644_v59 }
 0x895   :  { %648 = vrot.lane.b32.xlu0 %v646_v60, %s7016_s4 }
 0x896   :  { %v671_v61 = vpop.permute.xlu1 %670 }
 0x897   :  { %v673_v62 = vmul.f32 %v671_v61, %v7312_v5 }
 0x899   :  { %675 = vrot.lane.b32.xlu1 %v673_v62, %s7018_s9 }
 0x907   :  { %v649_v63 = vpop.permute.xlu0 %648 }
 0x908   :  { %v651_v0 = vadd.f32 %v649_v63, %v7299_v53 }
 0x90a   :  { %6730 = vtanh.f32 %v651_v0 }
 0x90b   :  { %v676_v13 = vpop.permute.xlu1 %675 }
 0x914   :  { %v6731_v2 = vpop.eup %6730 }
 0x915   :  { %655 = vrot.lane.b32.xlu0 %v6731_v2, %s7017_s5 }
 0x987   :  { %v656_v6 = vpop.permute.xlu0 %655 }
 0x988   :  { %v658_v9 = vmul.f32 %v656_v6, %v653_v4 }
 0x98a   :  { %v662_v10 = vadd.f32 %v661_v7, %v658_v9 }
 0x98c   :  { %v7356_v11 = vmul.f32 %v7309_v3, %v662_v10 }
 0x98e   :  { %v678_v14 = vadd.f32 %v676_v13, %v7356_v11 }
 0x990   :  { %v685_v15 = vrot.slane %v678_v14, 2  ;;  %v786_v22 = vrot.slane %v678_v14, 7 }
 0x992   :  { %686 = vrot.lane.b32.xlu0 %v685_v15, %s7017_s5 }
 0xa04   :  { %v687_v16 = vpop.permute.xlu0 %686 }
 0xa05   :  { %5708 = vmatmul.mubr.msk.f32.vlgmr.msra.gmra.mrb[2].mxu0 %vm232_vm2, %v687_v16 }
 0xa06   :  { %6381 = vmatpush3.bf16.msra.mxu0 %v7267_v40  ;;  %5729 = vmatprep.mubr.msk.f32.mxu0 %vm7013_vm0, %v7014_v8 }
 0xa07   :  { %6382 = vmatprep.subr.bf16.mxu0 %v7012_v1 }
 0xa0a   :  { %6384 = vmatpush3.bf16.msra.mxu0 %v7277_v43 }
 0xa0b   :  { %6391 = vmatprep.subr.bf16.mxu0 %v7012_v1 }
 0xad8   :  { %v756_v18 = vpop.f32.mrb[2].mxu0 }
 0xad9   :  { %v757_v19 = vadd.f32 %v756_v18, %v683_v17  ;;  %v5709_v20 = vpop.f32.mrb[3].mxu0 }
 0xadb   :  { %v761_v21 = vrot.slane %v757_v19, 5 }
 0xadd   :  { %770 = vrot.lane.b32.xlu1 %v761_v21, %s7016_s4  ;;  %v763_v23 = vadd.f32 %v761_v21, %v7299_v53  ;;  %v937_v21 = vld [vmem:[#allocation4] sm:$0x1] }
 0xadf   :  { %v5222_v24 = vmul.f32 -1.442695, %v763_v23 }
 0xae1   :  { %797 = vrot.lane.b32.xlu1 %v786_v22, %s7017_s5  ;;  %6732 = vpow2.f32 %v5222_v24 }
 0xaeb   :  { %v6733_v25 = vpop.eup %6732 }
 0xaec   :  { %v767_v26 = vadd.f32 1.0, %v6733_v25 }
 0xaee   :  { %6734 = vrcp.f32 %v767_v26 }
 0xaf8   :  { %v6735_v27 = vpop.eup %6734 }
 0xaf9   :  { %v780_v36 = vsub.f32 1.0, %v6735_v27  ;;  %v788_v39 = vmul.f32 %v6735_v27, %v786_v22 }
 0xb4f   :  { %v771_v28 = vpop.permute.xlu1 %770 }
 0xb50   :  { %v773_v29 = vmul.f32 %v6735_v27, %v771_v28 }
 0xb52   :  { %775 = vrot.lane.b32.xlu0 %v773_v29, %s7016_s4 }
 0xb53   :  { %v798_v30 = vpop.permute.xlu1 %797 }
 0xb54   :  { %v800_v31 = vmul.f32 %v798_v30, %v7312_v5 }
 0xb56   :  { %802 = vrot.lane.b32.xlu1 %v800_v31, %s7018_s9 }
 0xbc4   :  { %v776_v32 = vpop.permute.xlu0 %775 }
 0xbc5   :  { %v778_v33 = vadd.f32 %v776_v32, %v7299_v53 }
 0xbc7   :  { %6736 = vtanh.f32 %v778_v33 }
 0xbc8   :  { %v803_v46 = vpop.permute.xlu1 %802 }
 0xbd1   :  { %v6737_v34 = vpop.eup %6736 }
 0xbd2   :  { %782 = vrot.lane.b32.xlu0 %v6737_v34, %s7017_s5 }
 0xc44   :  { %v783_v38 = vpop.permute.xlu0 %782 }
 0xc45   :  { %v785_v42 = vmul.f32 %v783_v38, %v780_v36 }
 0xc47   :  { %v789_v44 = vadd.f32 %v788_v39, %v785_v42 }
 0xc49   :  { %v7376_v45 = vmul.f32 %v7309_v3, %v789_v44 }
 0xc4b   :  { %v805_v47 = vadd.f32 %v803_v46, %v7376_v45 }
 0xc4d   :  { %v812_v48 = vrot.slane %v805_v47, 3  ;;  %v913_v56 = vrot.slane %v805_v47, 7 }
 0xc4f   :  { %813 = vrot.lane.b32.xlu0 %v812_v48, %s7017_s5 }
 0xcc1   :  { %v814_v49 = vpop.permute.xlu0 %813 }
 0xcc2   :  { %5719 = vmatmul.mubr.msk.f32.vlgmr.msra.gmra.mrb[8].mxu1 %vm232_vm2, %v814_v49 }
 0xcc3   :  { %6387 = vmatpush3.bf16.msra.mxu1 %v7267_v40  ;;  %5740 = vmatprep.mubr.msk.f32.mxu1 %vm7013_vm0, %v7014_v8 }
 0xcc4   :  { %6388 = vmatprep.subr.bf16.mxu1 %v7012_v1 }
 0xcc7   :  { %6390 = vmatpush3.bf16.msra.mxu1 %v7277_v43 }
 0xcc8   :  { %6397 = vmatprep.subr.bf16.mxu1 %v7012_v1 }
 0xd95   :  { %v883_v51 = vpop.f32.mrb[8].mxu1 }
 0xd96   :  { %v884_v52 = vadd.f32 %v883_v51, %v810_v50  ;;  %v5720_v54 = vpop.f32.mrb[9].mxu1 }
 0xd97   :  { %v1064_v54 = vld [vmem:[#allocation4] sm:$0x1] }
 0xd98   :  { %v888_v55 = vrot.slane %v884_v52, 4 }
 0xd9a   :  { %897 = vrot.lane.b32.xlu1 %v888_v55, %s7016_s4  ;;  %v890_v57 = vadd.f32 %v888_v55, %v7299_v53 }
 0xd9c   :  { %v5224_v58 = vmul.f32 -1.442695, %v890_v57 }
 0xd9e   :  { %924 = vrot.lane.b32.xlu1 %v913_v56, %s7017_s5  ;;  %6738 = vpow2.f32 %v5224_v58 }
 0xda8   :  { %v6739_v59 = vpop.eup %6738 }
 0xda9   :  { %v894_v60 = vadd.f32 1.0, %v6739_v59 }
 0xdab   :  { %6740 = vrcp.f32 %v894_v60 }
 0xdb5   :  { %v6741_v61 = vpop.eup %6740 }
 0xdb6   :  { %v907_v9 = vsub.f32 1.0, %v6741_v61  ;;  %v915_v13 = vmul.f32 %v6741_v61, %v913_v56 }
 0xe0c   :  { %v898_v62 = vpop.permute.xlu1 %897 }
 0xe0d   :  { %v900_v63 = vmul.f32 %v6741_v61, %v898_v62 }
 0xe0f   :  { %902 = vrot.lane.b32.xlu0 %v900_v63, %s7016_s4 }
 0xe10   :  { %v925_v0 = vpop.permute.xlu1 %924 }
 0xe11   :  { %v927_v2 = vmul.f32 %v925_v0, %v7312_v5 }
 0xe13   :  { %929 = vrot.lane.b32.xlu1 %v927_v2, %s7018_s9 }
 0xe81   :  { %v903_v4 = vpop.permute.xlu0 %902 }
 0xe82   :  { %v905_v6 = vadd.f32 %v903_v4, %v7299_v53 }
 0xe84   :  { %6742 = vtanh.f32 %v905_v6 }
 0xe85   :  { %v930_v17 = vpop.permute.xlu1 %929 }
 0xe8e   :  { %v6743_v7 = vpop.eup %6742 }
 0xe8f   :  { %909 = vrot.lane.b32.xlu0 %v6743_v7, %s7017_s5 }
 0xf01   :  { %v910_v10 = vpop.permute.xlu0 %909 }
 0xf02   :  { %v912_v14 = vmul.f32 %v910_v10, %v907_v9 }
 0xf04   :  { %v916_v15 = vadd.f32 %v915_v13, %v912_v14 }
 0xf06   :  { %v7396_v16 = vmul.f32 %v7309_v3, %v916_v15 }
 0xf08   :  { %v932_v18 = vadd.f32 %v930_v17, %v7396_v16 }
 0xf0a   :  { %v939_v19 = vrot.slane %v932_v18, 4  ;;  %v1040_v26 = vrot.slane %v932_v18, 7 }
 0xf0c   :  { %940 = vrot.lane.b32.xlu0 %v939_v19, %s7017_s5 }
 0xf7e   :  { %v941_v20 = vpop.permute.xlu0 %940 }
 0xf7f   :  { %5730 = vmatmul.mubr.msk.f32.vlgmr.msra.gmra.mrb[4].mxu0 %vm232_vm2, %v941_v20 }
 0xf80   :  { %6393 = vmatpush3.bf16.msra.mxu0 %v7267_v40  ;;  %5751 = vmatprep.mubr.msk.f32.mxu0 %vm7013_vm0, %v7014_v8 }
 0xf81   :  { %6394 = vmatprep.subr.bf16.mxu0 %v7012_v1 }
 0xf84   :  { %6396 = vmatpush3.bf16.msra.mxu0 %v7277_v43 }
 0xf85   :  { %6403 = vmatprep.subr.bf16.mxu0 %v7012_v1 }
0x1052   :  { %v1010_v22 = vpop.f32.mrb[4].mxu0 }
0x1053   :  { %v1011_v23 = vadd.f32 %v1010_v22, %v937_v21  ;;  %v5731_v24 = vpop.f32.mrb[5].mxu0 }
0x1055   :  { %v1015_v25 = vrot.slane %v1011_v23, 3 }
0x1057   :  { %1024 = vrot.lane.b32.xlu1 %v1015_v25, %s7016_s4  ;;  %v1017_v40 = vadd.f32 %v1015_v25, %v7299_v53  ;;  %v1191_v25 = vld [vmem:[#allocation4] sm:$0x1] }
0x1059   :  { %v5226_v27 = vmul.f32 -1.442695, %v1017_v40 }
0x105b   :  { %1051 = vrot.lane.b32.xlu1 %v1040_v26, %s7017_s5  ;;  %6744 = vpow2.f32 %v5226_v27 }
0x1065   :  { %v6745_v28 = vpop.eup %6744 }
0x1066   :  { %v1021_v29 = vadd.f32 1.0, %v6745_v28 }
0x1068   :  { %6746 = vrcp.f32 %v1021_v29 }
0x1072   :  { %v6747_v43 = vpop.eup %6746 }
0x1073   :  { %v1034_v39 = vsub.f32 1.0, %v6747_v43  ;;  %v1042_v44 = vmul.f32 %v6747_v43, %v1040_v26 }
0x10c9   :  { %v1025_v30 = vpop.permute.xlu1 %1024 }
0x10ca   :  { %v1027_v31 = vmul.f32 %v6747_v43, %v1025_v30 }
0x10cc   :  { %1029 = vrot.lane.b32.xlu0 %v1027_v31, %s7016_s4 }
0x10cd   :  { %v1052_v32 = vpop.permute.xlu1 %1051 }
0x10ce   :  { %v1054_v33 = vmul.f32 %v1052_v32, %v7312_v5 }
0x10d0   :  { %1056 = vrot.lane.b32.xlu1 %v1054_v33, %s7018_s9 }
0x113e   :  { %v1030_v34 = vpop.permute.xlu0 %1029 }
0x113f   :  { %v1032_v36 = vadd.f32 %v1030_v34, %v7299_v53 }
0x1141   :  { %6748 = vtanh.f32 %v1032_v36 }
0x1142   :  { %v1057_v49 = vpop.permute.xlu1 %1056 }
0x114b   :  { %v6749_v38 = vpop.eup %6748 }
0x114c   :  { %1036 = vrot.lane.b32.xlu0 %v6749_v38, %s7017_s5 }
0x11be   :  { %v1037_v42 = vpop.permute.xlu0 %1036 }
0x11bf   :  { %v1039_v46 = vmul.f32 %v1037_v42, %v1034_v39 }
0x11c1   :  { %v1043_v47 = vadd.f32 %v1042_v44, %v1039_v46  ;;  %v1316_v46 = vld [vmem:[%s8218_s7] sm:$0xff] }
0x11c3   :  { %v7416_v48 = vmul.f32 %v7309_v3, %v1043_v47  ;;  %v1317_v47 = vld [vmem:[%s8218_s7 + $0x8] sm:$0xff] }
0x11c5   :  { %v1059_v50 = vadd.f32 %v1057_v49, %v7416_v48  ;;  %v1394_v49 = vld [vmem:[#allocation6] sm:$0xff] }
0x11c7   :  { %v1066_v51 = vrot.slane %v1059_v50, 5  ;;  %v1167_v59 = vrot.slane %v1059_v50, 7  ;;  %v7452_v50 = vpack.c.bf16 %v1317_v47, %v1316_v46 }
0x11c9   :  { %1067 = vrot.lane.b32.xlu0 %v1066_v51, %s7017_s5  ;;  %v1395_v51 = vld [vmem:[#allocation6 + $0x8] sm:$0xff] }
0x123b   :  { %v1068_v52 = vpop.permute.xlu0 %1067 }
0x123c   :  { %5741 = vmatmul.mubr.msk.f32.vlgmr.msra.gmra.mrb[10].mxu1 %vm232_vm2, %v1068_v52 }
0x123d   :  { %5762 = vmatprep.mubr.msk.f32.mxu1 %vm7013_vm0, %v7014_v8  ;;  %6399 = vmatpush3.bf16.msra.mxu1 %v7452_v50 }
0x123e   :  { %6400 = vmatprep.subr.bf16.mxu1 %v7012_v1 }
0x130f   :  { %v1137_v55 = vpop.f32.mrb[10].mxu1 }
0x1310   :  { %v1138_v56 = vadd.f32 %v1137_v55, %v1064_v54  ;;  %v5742_v57 = vpop.f32.mrb[11].mxu1  ;;  %v7460_v54 = vpack.c.bf16 %v1395_v51, %v1394_v49  ;;  %v1396_v55 = vld [vmem:[#allocation6 + $0x10] sm:$0xff] }
0x1312   :  { %v1142_v58 = vrot.slane %v1138_v56, 2  ;;  %v1397_v56 = vld [vmem:[#allocation6 + $0x18] sm:$0xff] }
0x1314   :  { %1151 = vrot.lane.b32.xlu1 %v1142_v58, %s7016_s4  ;;  %v1144_v60 = vadd.f32 %v1142_v58, %v7299_v53  ;;  %v7468_v58 = vpack.c.bf16 %v1397_v56, %v1396_v55  ;;  %v5239_v55 = vld [vmem:[%s8222_s11 + $0x30] sm:$0xff] }
0x1316   :  { %v5228_v61 = vmul.f32 -1.442695, %v1144_v60 }
0x1318   :  { %1178 = vrot.lane.b32.xlu1 %v1167_v59, %s7017_s5  ;;  %6750 = vpow2.f32 %v5228_v61 }
0x1322   :  { %v6751_v62 = vpop.eup %6750 }
0x1323   :  { %v1148_v63 = vadd.f32 1.0, %v6751_v62 }
0x1325   :  { %6752 = vrcp.f32 %v1148_v63 }
0x132f   :  { %v6753_v0 = vpop.eup %6752 }
0x1330   :  { %v1161_v14 = vsub.f32 1.0, %v6753_v0  ;;  %v1169_v17 = vmul.f32 %v6753_v0, %v1167_v59  ;;  %v1315_v59 = vld [vmem:[%s8213_s2 + $0x1] sm:$0x1] }
0x1386   :  { %v1152_v2 = vpop.permute.xlu1 %1151 }
0x1387   :  { %v1154_v4 = vmul.f32 %v6753_v0, %v1152_v2 }
0x1389   :  { %1156 = vrot.lane.b32.xlu0 %v1154_v4, %s7016_s4 }
0x138a   :  { %v1179_v6 = vpop.permute.xlu1 %1178 }
0x138b   :  { %v1181_v7 = vmul.f32 %v1179_v6, %v7312_v5 }
0x138d   :  { %1183 = vrot.lane.b32.xlu1 %v1181_v7, %s7018_s9 }
0x13fb   :  { %v1157_v9 = vpop.permute.xlu0 %1156 }
0x13fc   :  { %v1159_v10 = vadd.f32 %v1157_v9, %v7299_v53 }
0x13fe   :  { %6754 = vtanh.f32 %v1159_v10 }
0x13ff   :  { %v1184_v21 = vpop.permute.xlu1 %1183 }
0x1408   :  { %v6755_v13 = vpop.eup %6754 }
0x1409   :  { %1163 = vrot.lane.b32.xlu0 %v6755_v13, %s7017_s5 }
0x147b   :  { %v1164_v15 = vpop.permute.xlu0 %1163 }
0x147c   :  { %v1166_v18 = vmul.f32 %v1164_v15, %v1161_v14  ;;  %v7486_v14 = vld [vmem:[#allocation9] sm:$0x1] }
0x147e   :  { %v1170_v19 = vadd.f32 %v1169_v17, %v1166_v18 }
0x1480   :  { %v7432_v20 = vmul.f32 %v7309_v3, %v1170_v19 }
0x1482   :  { %v1186_v22 = vadd.f32 %v1184_v21, %v7432_v20 }
0x1484   :  { %v1193_v23 = vrot.slane %v1186_v22, 6  ;;  %v1294_v29 = vrot.slane %v1186_v22, 7 }
0x1486   :  { %1194 = vrot.lane.b32.xlu0 %v1193_v23, %s7017_s5 }
0x14f8   :  { %v1195_v24 = vpop.permute.xlu0 %1194 }
0x14f9   :  { %5752 = vmatmul.mubr.msk.f32.vlgmr.msra.gmra.mrb[6].mxu0 %vm232_vm2, %v1195_v24 }
0x14fa   :  { %5773 = vmatprep.mubr.msk.f32.mxu0 %vm7013_vm0, %v7014_v8  ;;  %6405 = vmatpush3.bf16.msra.mxu0 %v7460_v54 }
0x14fb   :  { %6406 = vmatprep.subr.bf16.mxu0 %v7012_v1 }
0x14fe   :  { %6408 = vmatpush3.bf16.msra.mxu0 %v7468_v58 }
0x14ff   :  { %6409 = vmatprep.subr.bf16.mxu0 %v7012_v1 }
0x15cc   :  { %v1264_v26 = vpop.f32.mrb[6].mxu0 }
0x15cd   :  { %v1265_v40 = vadd.f32 %v1264_v26, %v1191_v25  ;;  %v5753_v27 = vpop.f32.mrb[7].mxu0 }
0x15cf   :  { %v1269_v28 = vrot.slane %v1265_v40, 1 }
0x15d1   :  { %1278 = vrot.lane.b32.xlu1 %v1269_v28, %s7016_s4  ;;  %v1271_v43 = vadd.f32 %v1269_v28, %v7299_v53 }
0x15d3   :  { %v5230_v30 = vmul.f32 -1.442695, %v1271_v43 }
0x15d5   :  { %1305 = vrot.lane.b32.xlu1 %v1294_v29, %s7017_s5  ;;  %6756 = vpow2.f32 %v5230_v30 }
0x15df   :  { %v6757_v31 = vpop.eup %6756 }
0x15e0   :  { %v1275_v32 = vadd.f32 1.0, %v6757_v31 }
0x15e2   :  { %6758 = vrcp.f32 %v1275_v32 }
0x15ec   :  { %v6759_v33 = vpop.eup %6758 }
0x15ed   :  { %v1288_v60 = vsub.f32 1.0, %v6759_v33  ;;  %v1296_v62 = vmul.f32 %v6759_v33, %v1294_v29 }
0x1643   :  { %v1279_v34 = vpop.permute.xlu1 %1278 }
0x1644   :  { %v1281_v36 = vmul.f32 %v6759_v33, %v1279_v34 }
0x1646   :  { %1283 = vrot.lane.b32.xlu0 %v1281_v36, %s7016_s4 }
0x1647   :  { %v1306_v38 = vpop.permute.xlu1 %1305 }
0x1648   :  { %v1308_v39 = vmul.f32 %v1306_v38, %v7312_v5  ;;  %v1318_v5 = vld [vmem:[%s8218_s7 + $0x10] sm:$0xff] }
0x164a   :  { %1310 = vrot.lane.b32.xlu1 %v1308_v39, %s7018_s9 }
0x16b8   :  { %v1284_v42 = vpop.permute.xlu0 %1283 }
0x16b9   :  { %v1286_v44 = vadd.f32 %v1284_v42, %v7299_v53  ;;  %v1319_v53 = vld [vmem:[%s8218_s7 + $0x18] sm:$0xff] }
0x16ba   :  { %v7464_v57 = vpack.c.bf16 %v1319_v53, %v1318_v5  ;;  %v5237_v53 = vld [vmem:[%s8222_s11 + $0x20] sm:$0xff] }
0x16bb   :  { %6760 = vtanh.f32 %v1286_v44 }
0x16bc   :  { %6402 = vmatpush3.bf16.msra.mxu1 %v7464_v57  ;;  %v1311_v4 = vpop.permute.xlu1 %1310 }
0x16bd   :  { %5776 = vmatprep.subr.mxu1 %v7014_v8 }
0x16bf   :  { %5763 = vmatmul.mubr.msk.f32.vlgmr.msra.gmra.mrb[12].mxu1 %vm232_vm2, %v1315_v59  ;;  %v5240_v59 = vld [vmem:[%s8222_s11 + $0x38] sm:$0xff] }
0x16c0   :  { %5778 = vmatprep.mubr.msk.f32.mxu1 %vm7013_vm0, %v7014_v8 }
0x16c5   :  { %v6761_v52 = vpop.eup %6760 }
0x16c6   :  { %1290 = vrot.lane.b32.xlu0 %v6761_v52, %s7017_s5  ;;  %v5238_v52 = vld [vmem:[%s8222_s11 + $0x28] sm:$0xff] }
0x16c7   :  { %v7538_v56 = vpack.c.bf16 %v5238_v52, %v5237_v53  ;;  %v1941_v53 = vld [vmem:[%s8213_s2 + $0x38] sm:$0xff] }
0x1738   :  { %v1291_v61 = vpop.permute.xlu0 %1290 }
0x1739   :  { %v1293_v63 = vmul.f32 %v1291_v61, %v1288_v60  ;;  %v7544_v60 = vpack.c.bf16 %v5240_v59, %v5239_v55  ;;  %v1942_v55 = vld [vmem:[%s8213_s2 + $0x40] sm:$0xff]  ;;  %v1943_v59 = vld [vmem:[%s8213_s2 + $0x48] sm:$0xff] }
0x173b   :  { %v1297_v0 = vadd.f32 %v1296_v62, %v1293_v63  ;;  %v1666_v62 = vld [vmem:[%s8222_s11] sm:$0xff]  ;;  %v1667_v63 = vld [vmem:[%s8222_s11 + $0x8] sm:$0xff] }
0x173d   :  { %v1298_v2 = vmul.f32 %v7309_v3, %v1297_v0  ;;  %v7490_v3 = vld [vmem:[#allocation8] sm:$0x1] }
0x173f   :  { %v1313_v6 = vadd.f32 %v1311_v4, %v1298_v2 }
0x1741   :  { %v1400_v7 = vrot.slane %v1313_v6, 7  ;;  %v1668_v6 = vld [vmem:[%s8222_s11 + $0x10] sm:$0xff] }
0x1743   :  { %1401 = vrot.lane.b32.xlu0 %v1400_v7, %s7017_s5 }
0x1792   :  { %v1390_v10 = vpop.f32.mrb[12].mxu1 }
0x1793   :  { %v5764_v13 = vpop.f32.mrb[13].mxu1  ;;  %v1391_v19 = vadd.f32 %v1390_v10, %v7490_v3 }
0x17b5   :  { %v1402_v9 = vpop.permute.xlu0 %1401 }
0x17b6   :  { %5774 = vmatmul.mubr.msk.f32.vlgmr.msra.gmra.mrb[8].mxu0 %vm232_vm2, %v1402_v9 }
0x17b7   :  { %5794 = vmatprep.mubr.msk.f32.mxu0 %vm7013_vm0, %v7014_v8  ;;  %6411 = vmatpush3.bf16.msra.mxu0 %v7538_v56 }
0x17b8   :  { %6412 = vmatprep.subr.bf16.mxu0 %v7012_v1 }
0x17bb   :  { %6414 = vmatpush3.bf16.msra.mxu0 %v7544_v60 }
0x17bc   :  { %6421 = vmatprep.subr.bf16.mxu0 %v7012_v1 }
0x1889   :  { %v1471_v15 = vpop.f32.mrb[8].mxu0 }
0x188a   :  { %v1472_v17 = vadd.f32 %v1471_v15, %v7486_v14  ;;  %v5775_v18 = vpop.f32.mrb[9].mxu0 }
0x188b   :  { %v1821_v18 = vld [vmem:[%s8224_s13] sm:$0xff] }
0x188c   :  { %1483 = vrot.lane.b32.xlu1 %v1472_v17, %s7016_s4  ;;  %v1475_v21 = vadd.f32 %v1472_v17, %v1391_v19 }
0x188e   :  { %v5233_v22 = vmul.f32 -1.442695, %v1475_v21  ;;  %v1823_v21 = vld [vmem:[%s8224_s13 + $0x10] sm:$0xff] }
0x1890   :  { %6762 = vpow2.f32 %v5233_v22 }
0x189a   :  { %v6763_v23 = vpop.eup %6762 }
0x189b   :  { %v1479_v24 = vadd.f32 1.0, %v6763_v23  ;;  %v1824_v23 = vld [vmem:[%s8224_s13 + $0x18] sm:$0xff] }
0x189d   :  { %6764 = vrcp.f32 %v1479_v24  ;;  %v7594_v24 = vpack.c.bf16 %v1824_v23, %v1823_v21 }
0x18a7   :  { %v6765_v25 = vpop.eup %6764 }
0x18a8   :  { %v1500_v31 = vmul.f32 %v6765_v25, %v1400_v7  ;;  %v1669_v7 = vld [vmem:[%s8222_s11 + $0x18] sm:$0xff] }
0x18a9   :  { %v7565_v9 = vpack.c.bf16 %v1669_v7, %v1668_v6  ;;  %v1947_v6 = vld [vmem:[%s8213_s2 + $0x68] sm:$0xff] }
0x18fe   :  { %v1484_v26 = vpop.permute.xlu1 %1483 }
0x18ff   :  { %v1486_v40 = vmul.f32 %v6765_v25, %v1484_v26  ;;  %v7599_v26 = vld [vmem:[#allocation11] sm:$0x1] }
0x1901   :  { %1488 = vrot.lane.b32.xlu0 %v1486_v40, %s7016_s4 }
0x1905   :  { %418 = vrot.lane.b32.xlu0 %v7316_v12, %s7017_s5 }
0x1909   :  { %665 = vrot.lane.b32.xlu0 %v7356_v11, %s7017_s5 }
0x190d   :  { %919 = vrot.lane.b32.xlu0 %v7396_v16, %s7017_s5  ;;  %v1493_v16 = vsub.f32 1.0, %v6765_v25 }
0x1911   :  { %1173 = vrot.lane.b32.xlu0 %v7432_v20, %s7017_s5 }
0x1973   :  { %v1489_v27 = vpop.permute.xlu0 %1488 }
0x1974   :  { %v1491_v28 = vadd.f32 %v1489_v27, %v1391_v19  ;;  %v1822_v19 = vld [vmem:[%s8224_s13 + $0x8] sm:$0xff] }
0x1975   :  { %v7588_v22 = vpack.c.bf16 %v1822_v19, %v1821_v18 }
0x1976   :  { %6766 = vtanh.f32 %v1491_v28 }
0x1977   :  { %v419_v29 = vpop.permute.xlu0 %418 }
0x1978   :  { %422 = vst.msk [vmem:[#allocation2] sm:$0x1] %vm421_vm4, %v419_v29 }
0x197b   :  { %v666_v43 = vpop.permute.xlu0 %665 }
0x197c   :  { %669 = vst.msk [vmem:[#allocation2] sm:$0x4] %vm668_vm5, %v666_v43  ;;  %v7609_v43 = vld [vmem:[#allocation12] sm:$0x1] }
0x197f   :  { %v920_v12 = vpop.permute.xlu0 %919 }
0x1980   :  { %v6767_v30 = vpop.eup %6766  ;;  %923 = vst.msk [vmem:[#allocation2] sm:$0x10] %vm922_vm6, %v920_v12  ;;  %vm1928_vm6 = vcmp.eq.s32.totalorder %v7255_v35, 0 }
0x1981   :  { %1495 = vrot.lane.b32.xlu1 %v6767_v30, %s7017_s5 }
0x1983   :  { %v1174_v11 = vpop.permute.xlu0 %1173 }
0x1984   :  { %1177 = vst.msk [vmem:[#allocation2] sm:$0x40] %vm1176_vm7, %v1174_v11  ;;  %vm2594_vm7 = vcmp.eq.s32.totalorder %v7255_v35, 1 }
0x1985   :  { %538 = vrot.lane.b32.xlu1 %v7336_v41, %s7017_s5 }
0x1989   :  { %792 = vrot.lane.b32.xlu1 %v7376_v45, %s7017_s5 }
0x198d   :  { %1046 = vrot.lane.b32.xlu1 %v7416_v48, %s7017_s5 }
0x1991   :  { %1300 = vrot.lane.b32.xlu1 %v1298_v2, %s7017_s5  ;;  %v7555_v2 = vpack.c.bf16 %v1667_v63, %v1666_v62  ;;  %v1944_v62 = vld [vmem:[%s8213_s2 + $0x50] sm:$0xff]  ;;  %v1945_v63 = vld [vmem:[%s8213_s2 + $0x58] sm:$0xff] }
0x19f3   :  { %v1496_v20 = vpop.permute.xlu1 %1495 }
0x19f4   :  { %v1498_v32 = vmul.f32 %v1496_v20, %v1493_v16 }
0x19f6   :  { %v7510_v33 = vadd.f32 %v1500_v31, %v1498_v32 }
0x19f7   :  { %v539_v34 = vpop.permute.xlu1 %538 }
0x19f8   :  { %542 = vst.msk [vmem:[#allocation2] sm:$0x2] %vm541_vm8, %v539_v34  ;;  %1503 = vrot.lane.b32.xlu0 %v7510_v33, %s7017_s5 }
0x19fb   :  { %v793_v41 = vpop.permute.xlu1 %792 }
0x19fc   :  { %796 = vst.msk [vmem:[#allocation2] sm:$0x8] %vm795_vm9, %v793_v41 }
0x19ff   :  { %v1047_v45 = vpop.permute.xlu1 %1046 }
0x1a00   :  { %1050 = vst.msk [vmem:[#allocation2] sm:$0x20] %vm1049_vm10, %v1047_v45  ;;  %v1934_v45 = vld [vmem:[%s8213_s2] sm:$0xff] }
0x1a03   :  { %v1301_v48 = vpop.permute.xlu1 %1300 }
0x1a04   :  { %1304 = vst.msk [vmem:[#allocation2] sm:$0x80] %vm1303_vm11, %v1301_v48  ;;  %v1935_v48 = vld [vmem:[%s8213_s2 + $0x8] sm:$0xff]  ;;  %vm3244_vm11 = vcmp.eq.s32.totalorder %v7255_v35, 2 }
0x1a0b   :  { %v7514_v36 = vld [vmem:[#allocation2] sm:$0xff] }
0x1a0c   :  { %5777 = vmatpush3.xpose.msk.msra.mxu1 %vm232_vm2, %v7514_v36 }
0x1a0d   :  { %5781 = vmatprep.subr.mxu1 %v7014_v8 }
0x1a6a   :  { %v7519_v38 = vpop.permute.xlu0 %1503 }
0x1a6b   :  { %5779 = vmatmul.mubr.msk.f32.vlgmr.msra.gmra.mrb[14].mxu1 %vm232_vm2, %v7519_v38 }
0x1a6c   :  { %5782 = vmatpush3.msra.mxu1 %v7514_v36  ;;  %5783 = vmatprep.mubr.msk.f32.mxu1 %vm7013_vm0, %v7014_v8 }
0x1a6d   :  { %6415 = vmatprep.subr.bf16.mxu1 %v7012_v1 }
0x1b3e   :  { %v1576_v39 = vpop.f32.mrb[14].mxu1 }
0x1b3f   :  { %v5780_v42 = vpop.f32.mrb[15].mxu1  ;;  %v1581_v44 = vsel %vm1580_vm12, %v1576_v39, -inf }
0x1b40   :  { %1582 = vmax.xlane.f32.xlu1 %v1581_v44  ;;  %v7631_v42 = vpack.c.bf16 %v1935_v48, %v1934_v45  ;;  %v1937_v44 = vld [vmem:[%s8213_s2 + $0x18] sm:$0xff] }
0x1bcd   :  { %v1583_v46 = vpop.xlane.xlu1 %1582 }
0x1bce   :  { %v1584_v47 = vsub.f32 %v1576_v39, %v1583_v46  ;;  %v1936_v39 = vld [vmem:[%s8213_s2 + $0x10] sm:$0xff] }
0x1bcf   :  { %v7637_v46 = vpack.c.bf16 %v1937_v44, %v1936_v39 }
0x1bd0   :  { %v1585_v49 = vmul.f32 1.442695, %v1584_v47  ;;  %v1938_v47 = vld [vmem:[%s8213_s2 + $0x20] sm:$0xff] }
0x1bd2   :  { %6768 = vpow2.f32 %v1585_v49  ;;  %v1939_v49 = vld [vmem:[%s8213_s2 + $0x28] sm:$0xff] }
0x1bdc   :  { %v6769_v51 = vpop.eup %6768 }
0x1bdd   :  { %v1587_v5 = vsel %vm1580_vm12, %v6769_v51, 0.0 }
0x1bde   :  { %1588 = vadd.xlane.f32.xlu0 %v1587_v5  ;;  %v1940_v5 = vld [vmem:[%s8213_s2 + $0x30] sm:$0xff] }
0x1bdf   :  { %v7657_v52 = vpack.c.bf16 %v1941_v53, %v1940_v5 }
0x1c6b   :  { %v1589_v61 = vpop.xlane.xlu0 %1588 }
0x1c6c   :  { %6770 = vrcp.f32 %v1589_v61  ;;  %v7667_v61 = vpack.c.bf16 %v1943_v59, %v1942_v55 }
0x1c76   :  { %v6771_v0 = vpop.eup %6770 }
0x1c77   :  { %v1591_v4 = vmul.f32 %v6771_v0, %v6769_v51  ;;  %v7647_v51 = vpack.c.bf16 %v1939_v49, %v1938_v47  ;;  %v7677_v0 = vpack.c.bf16 %v1945_v63, %v1944_v62 }
0x1c79   :  { %5784 = vmatmul.mubr.msk.f32.vlgmr.msra.gmra.mrb[16].mxu1 %vm1592_vm13, %v1591_v4  ;;  %v1946_v4 = vld [vmem:[%s8213_s2 + $0x60] sm:$0xff] }
0x1c7a   :  { %6417 = vmatpush3.bf16.msra.mxu1 %v7555_v2  ;;  %5805 = vmatprep.mubr.msk.f32.mxu1 %vm7013_vm0, %v7014_v8  ;;  %v7687_v7 = vpack.c.bf16 %v1947_v6, %v1946_v4 }
0x1c7b   :  { %6418 = vmatprep.subr.bf16.mxu1 %v7012_v1 }
0x1c7e   :  { %6420 = vmatpush3.bf16.msra.mxu1 %v7565_v9 }
0x1c7f   :  { %6427 = vmatprep.subr.bf16.mxu1 %v7012_v1 }
0x1c81   :  { %5806 = vmatmul.mubr.msk.f32.vlgmr.msra.gmra.mrb[18].mxu1 %vm232_vm2, %v7519_v38 }
0x1c82   :  { %5851 = vmatprep.mubr.msk.f32.mxu1 %vm7013_vm0, %v7014_v8  ;;  %6429 = vmatpush3.bf16.msra.mxu1 %v7631_v42 }
0x1c83   :  { %6430 = vmatprep.subr.bf16.mxu1 %v7012_v1 }
0x1c86   :  { %6432 = vmatpush3.bf16.msra.mxu1 %v7637_v46 }
0x1c87   :  { %6433 = vmatprep.subr.bf16.mxu1 %v7012_v1 }
0x1c8a   :  { %6435 = vmatpush3.bf16.msra.mxu1 %v7647_v51 }
0x1c8b   :  { %6436 = vmatprep.subr.bf16.mxu1 %v7012_v1 }
0x1c8e   :  { %6438 = vmatpush3.bf16.msra.mxu1 %v7657_v52 }
0x1c8f   :  { %6439 = vmatprep.subr.bf16.mxu1 %v7012_v1 }
0x1c92   :  { %6441 = vmatpush3.bf16.msra.mxu1 %v7667_v61 }
0x1c93   :  { %6442 = vmatprep.subr.bf16.mxu1 %v7012_v1 }
0x1c96   :  { %6444 = vmatpush3.bf16.msra.mxu1 %v7677_v0 }
0x1c97   :  { %6445 = vmatprep.subr.bf16.mxu1 %v7012_v1 }
0x1c9a   :  { %6447 = vmatpush3.bf16.msra.mxu1 %v7687_v7 }
0x1c9b   :  { %6448 = vmatprep.subr.bf16.mxu1 %v7012_v1 }
0x1d4c   :  { %v1662_v10 = vpop.f32.mrb[16].mxu1 }
0x1d4d   :  { %v5785_v13 = vpop.f32.mrb[17].mxu1  ;;  %5795 = vmatmul.mubr.msk.f32.vlgmr.msra.gmra.mrb[10].mxu0 %vm232_vm2, %v1662_v10  ;;  %v1948_v10 = vld [vmem:[%s8213_s2 + $0x70] sm:$0xff] }
0x1d4e   :  { %5816 = vmatprep.mubr.msk.f32.mxu0 %vm7013_vm0, %v7014_v8  ;;  %6423 = vmatpush3.bf16.msra.mxu0 %v7588_v22  ;;  %v1949_v13 = vld [vmem:[%s8213_s2 + $0x78] sm:$0xff] }
0x1d4f   :  { %6424 = vmatprep.subr.bf16.mxu0 %v7012_v1 }
0x1d52   :  { %6426 = vmatpush3.bf16.msra.mxu0 %v7594_v24 }
0x1d53   :  { %6451 = vmatprep.subr.bf16.mxu0 %v7012_v1 }
0x1d54   :  { %v1814_v15 = vpop.f32.mrb[18].mxu1 }
0x1d55   :  { %v5807_v17 = vpop.f32.mrb[19].mxu1 }
0x1e20   :  { %v1744_v25 = vpop.f32.mrb[10].mxu0 }
0x1e21   :  { %v1815_v40 = vadd.f32 %v1814_v15, %v1744_v25  ;;  %v5796_v27 = vpop.f32.mrb[11].mxu0  ;;  %v7697_v15 = vpack.c.bf16 %v1949_v13, %v1948_v10 }
0x1e23   :  { %v1819_v28 = vadd.f32 %v7599_v26, %v1815_v40  ;;  %6450 = vmatpush3.bf16.msra.mxu1 %v7697_v15 }
0x1e24   :  { %5876 = vmatprep.subr.mxu1 %v7014_v8 }
0x1e25   :  { %6772 = vtanh.f32 %v1819_v28 }
0x1e2f   :  { %v6773_v29 = vpop.eup %6772 }
0x1e30   :  { %5817 = vmatmul.mubr.msk.f32.vlgmr.msra.gmra.mrb[12].mxu0 %vm232_vm2, %v6773_v29 }
0x1e31   :  { %6453 = vmatpush3.bf16.msra.mxu0 %v7452_v50  ;;  %5862 = vmatprep.mubr.msk.f32.mxu0 %vm7013_vm0, %v7014_v8 }
0x1e32   :  { %6454 = vmatprep.subr.bf16.mxu0 %v7012_v1 }
0x1e35   :  { %6456 = vmatpush3.bf16.msra.mxu0 %v7464_v57 }
0x1e36   :  { %6457 = vmatprep.subr.bf16.mxu0 %v7012_v1 }
0x1f03   :  { %v1895_v12 = vpop.f32.mrb[12].mxu0 }
0x1f04   :  { %v7612_v30 = vadd.f32 %v1895_v12, %v7609_v43  ;;  %v5818_v11 = vpop.f32.mrb[13].mxu0 }
0x1f06   :  { %v1900_v16 = vsel %vm1899_vm14, %v7612_v30, -inf }
0x1f07   :  { %1901 = vmax.xlane.f32.xlu0 %v1900_v16 }
0x1f94   :  { %v7616_v20 = vpop.xlane.xlu0 %1901 }
0x1f95   :  { %vm1911_vm15 = vcmp.eq.f32.partialorder %v7612_v30, %v7616_v20 }
0x1f96   :  { %v1912_v31 = vsel %vm1911_vm15, %v7255_v35, 128 }
0x1f97   :  { %v1913_v32 = vsel %vm1899_vm14, %v1912_v31, 2147483647 }
0x1f98   :  { %v1915_v34 = vshra.s32 %v1913_v32, 16  ;;  %v1914_v17 = vand.u32 65535, %v1913_v32 }
0x1f9a   :  { %v1917_v41 = vcvt.s32.f32 %v1915_v34  ;;  %v1916_v19 = vcvt.s32.f32 %v1914_v17 }
0x1f9c   :  { %1918 = vmin.xlane.f32.xlu1 %v1917_v41 }
0x2029   :  { %v1919_v18 = vpop.xlane.xlu1 %1918 }
0x202a   :  { %vm1920_vm1 = vcmp.eq.f32.partialorder %v1917_v41, %v1919_v18  ;;  %v1925_v23 = vcvt.f32.s32 %v1919_v18 }
0x202b   :  { %v1921_v21 = vsel %vm1920_vm1, %v1916_v19, inf }
0x202c   :  { %1922 = vmin.xlane.f32.xlu0 %v1921_v21  ;;  %v1926_v40 = vshll.u32 %v1925_v23, 16 }
0x20b9   :  { %v1923_v25 = vpop.xlane.xlu0 %1922 }
0x20ba   :  { %v1924_v27 = vcvt.f32.s32 %v1923_v25 }
0x20bc   :  { %v7702_v28 = vadd.s32 %v1926_v40, %v1924_v27 }
0x20be   :  { %vm1931_vm3 = vcmp.eq.s32.totalorder %v7255_v35, %v7702_v28 }
0x20bf   :  { %5852 = vmatmul.mubr.msk.f32.vlgmr.msra.gmra.mrb[20].mxu1 %vm1931_vm3, %v7015_v37 }
0x20c0   :  { %5877 = vmatpush3.xpose.msk.msra.mxu1 %vm232_vm2, %v7514_v36  ;;  %5878 = vmatprep.mubr.msk.f32.mxu1 %vm7013_vm0, %v7014_v8 }
0x20c1   :  { %6469 = vmatprep.subr.bf16.mxu1 %v7012_v1 }
0x2192   :  { %v2016_v29 = vpop.f32.mrb[20].mxu1 }
0x2193   :  { %v5853_v12 = vpop.f32.mrb[21].mxu1  ;;  %5863 = vmatmul.mubr.msk.f32.vlgmr.msra.gmra.mrb[14].mxu0 %vm232_vm2, %v2016_v29 }
0x2194   :  { %6459 = vmatpush3.bf16.msra.mxu0 %v7460_v54  ;;  %5873 = vmatprep.mubr.msk.f32.mxu0 %vm7013_vm0, %v7014_v8 }
0x2195   :  { %6460 = vmatprep.subr.bf16.mxu0 %v7012_v1 }
0x2198   :  { %6462 = vmatpush3.bf16.msra.mxu0 %v7468_v58 }
0x2199   :  { %5881 = vmatprep.subr.mxu0 %v7014_v8 }
0x219b   :  { %5874 = vmatmul.mubr.msk.f32.vlgmr.msra.gmra.mrb[16].mxu0 %vm232_vm2, %v7519_v38 }
0x219c   :  { %5882 = vmatpush3.msra.mxu0 %v7514_v36  ;;  %5883 = vmatprep.mubr.msk.f32.mxu0 %vm7013_vm0, %v7014_v8 }
0x219d   :  { %6463 = vmatprep.subr.bf16.mxu0 %v7012_v1 }
0x2266   :  { %v2089_v11 = vpop.f32.mrb[14].mxu0 }
0x2267   :  { %v5864_v16 = vpop.f32.mrb[15].mxu0  ;;  %v2090_v41 = vadd.f32 %v2089_v11, %v7490_v3 }
0x226e   :  { %v2159_v31 = vpop.f32.mrb[16].mxu0 }
0x226f   :  { %v2160_v32 = vadd.f32 %v2159_v31, %v7486_v14  ;;  %v5875_v34 = vpop.f32.mrb[17].mxu0 }
0x2271   :  { %2171 = vrot.lane.b32.xlu1 %v2160_v32, %s7016_s4  ;;  %v2163_v45 = vadd.f32 %v2160_v32, %v2090_v41 }
0x2273   :  { %v5248_v48 = vmul.f32 -1.442695, %v2163_v45 }
0x2275   :  { %6774 = vpow2.f32 %v5248_v48 }
0x227f   :  { %v6775_v38 = vpop.eup %6774 }
0x2280   :  { %v2167_v39 = vadd.f32 1.0, %v6775_v38 }
0x2282   :  { %6776 = vrcp.f32 %v2167_v39 }
0x228c   :  { %v6777_v44 = vpop.eup %6776 }
0x228d   :  { %v2181_v59 = vsub.f32 1.0, %v6777_v44  ;;  %v2187_v63 = vmul.f32 %v6777_v44, %v7510_v33 }
0x22e3   :  { %v2172_v47 = vpop.permute.xlu1 %2171 }
0x22e4   :  { %v2174_v49 = vmul.f32 %v6777_v44, %v2172_v47 }
0x22e6   :  { %2176 = vrot.lane.b32.xlu0 %v2174_v49, %s7016_s4 }
0x2358   :  { %v2177_v5 = vpop.permute.xlu0 %2176 }
0x2359   :  { %v2179_v53 = vadd.f32 %v2177_v5, %v2090_v41 }
0x235b   :  { %6778 = vtanh.f32 %v2179_v53 }
0x2365   :  { %v6779_v55 = vpop.eup %6778 }
0x2366   :  { %2183 = vrot.lane.b32.xlu1 %v6779_v55, %s7017_s5 }
0x23d8   :  { %v2184_v62 = vpop.permute.xlu1 %2183 }
0x23d9   :  { %v2186_v4 = vmul.f32 %v2184_v62, %v2181_v59 }
0x23db   :  { %v7731_v6 = vadd.f32 %v2187_v63, %v2186_v4 }
0x23dd   :  { %2190 = vrot.lane.b32.xlu1 %v7731_v6, %s7017_s5 }
0x244f   :  { %v7735_v10 = vpop.permute.xlu1 %2190 }
0x2450   :  { %5879 = vmatmul.mubr.msk.f32.vlgmr.msra.gmra.mrb[22].mxu1 %vm232_vm2, %v7735_v10 }
0x2451   :  { %6471 = vmatpush3.bf16.msra.mxu1 %v7555_v2  ;;  %5905 = vmatprep.mubr.msk.f32.mxu1 %vm7013_vm0, %v7014_v8 }
0x2452   :  { %6472 = vmatprep.subr.bf16.mxu1 %v7012_v1 }
0x2455   :  { %6474 = vmatpush3.bf16.msra.mxu1 %v7565_v9 }
0x2456   :  { %6481 = vmatprep.subr.bf16.mxu1 %v7012_v1 }
0x2458   :  { %5906 = vmatmul.mubr.msk.f32.vlgmr.msra.gmra.mrb[24].mxu1 %vm232_vm2, %v7735_v10 }
0x2459   :  { %6483 = vmatpush3.bf16.msra.mxu1 %v7631_v42  ;;  %5951 = vmatprep.mubr.msk.f32.mxu1 %vm7013_vm0, %v7014_v8 }
0x245a   :  { %6484 = vmatprep.subr.bf16.mxu1 %v7012_v1 }
0x245d   :  { %6486 = vmatpush3.bf16.msra.mxu1 %v7637_v46 }
0x245e   :  { %6487 = vmatprep.subr.bf16.mxu1 %v7012_v1 }
0x2461   :  { %6489 = vmatpush3.bf16.msra.mxu1 %v7647_v51 }
0x2462   :  { %6490 = vmatprep.subr.bf16.mxu1 %v7012_v1 }
0x2465   :  { %6492 = vmatpush3.bf16.msra.mxu1 %v7657_v52 }
0x2466   :  { %6493 = vmatprep.subr.bf16.mxu1 %v7012_v1 }
0x2469   :  { %6495 = vmatpush3.bf16.msra.mxu1 %v7667_v61 }
0x246a   :  { %6496 = vmatprep.subr.bf16.mxu1 %v7012_v1 }
0x246d   :  { %6498 = vmatpush3.bf16.msra.mxu1 %v7677_v0 }
0x246e   :  { %6499 = vmatprep.subr.bf16.mxu1 %v7012_v1 }
0x2471   :  { %6501 = vmatpush3.bf16.msra.mxu1 %v7687_v7 }
0x2472   :  { %6502 = vmatprep.subr.bf16.mxu1 %v7012_v1 }
0x2475   :  { %6504 = vmatpush3.bf16.msra.mxu1 %v7697_v15 }
0x2476   :  { %6523 = vmatprep.subr.bf16.mxu1 %v7012_v1 }
0x2523   :  { %v2260_v33 = vpop.f32.mrb[22].mxu1 }
0x2524   :  { %v5880_v13 = vpop.f32.mrb[23].mxu1  ;;  %v2264_v17 = vsel %vm1580_vm12, %v2260_v33, -inf }
0x2525   :  { %2265 = vmax.xlane.f32.xlu0 %v2264_v17 }
0x252b   :  { %v2487_v18 = vpop.f32.mrb[24].mxu1 }
0x252c   :  { %v5907_v19 = vpop.f32.mrb[25].mxu1 }
0x25b2   :  { %v2266_v21 = vpop.xlane.xlu0 %2265 }
0x25b3   :  { %v2267_v23 = vsub.f32 %v2260_v33, %v2266_v21 }
0x25b5   :  { %v2268_v25 = vmul.f32 1.442695, %v2267_v23  ;;  %v1929_v23 = vsel %vm1928_vm6, %v7702_v28, 0 }
0x25b7   :  { %6780 = vpow2.f32 %v2268_v25 }
0x25c1   :  { %v6781_v40 = vpop.eup %6780 }
0x25c2   :  { %v2270_v27 = vsel %vm1580_vm12, %v6781_v40, 0.0 }
0x25c3   :  { %2271 = vadd.xlane.f32.xlu1 %v2270_v27 }
0x2650   :  { %v2272_v29 = vpop.xlane.xlu1 %2271 }
0x2651   :  { %6782 = vrcp.f32 %v2272_v29 }
0x265b   :  { %v6783_v12 = vpop.eup %6782 }
0x265c   :  { %v2274_v11 = vmul.f32 %v6783_v12, %v6781_v40 }
0x265e   :  { %5884 = vmatmul.mubr.msk.f32.vlgmr.msra.gmra.mrb[18].mxu0 %vm1592_vm13, %v2274_v11 }
0x265f   :  { %6465 = vmatpush3.bf16.msra.mxu0 %v7538_v56  ;;  %5894 = vmatprep.mubr.msk.f32.mxu0 %vm7013_vm0, %v7014_v8 }
0x2660   :  { %6466 = vmatprep.subr.bf16.mxu0 %v7012_v1 }
0x2663   :  { %6468 = vmatpush3.bf16.msra.mxu0 %v7544_v60 }
0x2664   :  { %6475 = vmatprep.subr.bf16.mxu0 %v7012_v1 }
0x2731   :  { %v2344_v16 = vpop.f32.mrb[18].mxu0 }
0x2732   :  { %v5885_v31 = vpop.f32.mrb[19].mxu0  ;;  %5895 = vmatmul.mubr.msk.f32.vlgmr.msra.gmra.mrb[20].mxu0 %vm232_vm2, %v2344_v16 }
0x2733   :  { %6477 = vmatpush3.bf16.msra.mxu0 %v7588_v22  ;;  %5916 = vmatprep.mubr.msk.f32.mxu0 %vm7013_vm0, %v7014_v8 }
0x2734   :  { %6478 = vmatprep.subr.bf16.mxu0 %v7012_v1 }
0x2737   :  { %6480 = vmatpush3.bf16.msra.mxu0 %v7594_v24 }
0x2738   :  { %6505 = vmatprep.subr.bf16.mxu0 %v7012_v1 }
0x2805   :  { %v2417_v32 = vpop.f32.mrb[20].mxu0 }
0x2806   :  { %v2488_v34 = vadd.f32 %v2487_v18, %v2417_v32  ;;  %v5896_v41 = vpop.f32.mrb[21].mxu0 }
0x2808   :  { %v2491_v45 = vadd.f32 %v2488_v34, %v7599_v26 }
0x280a   :  { %6784 = vtanh.f32 %v2491_v45 }
0x2814   :  { %v6785_v48 = vpop.eup %6784 }
0x2815   :  { %5917 = vmatmul.mubr.msk.f32.vlgmr.msra.gmra.mrb[22].mxu0 %vm232_vm2, %v6785_v48 }
0x2816   :  { %6507 = vmatpush3.bf16.msra.mxu0 %v7452_v50  ;;  %5962 = vmatprep.mubr.msk.f32.mxu0 %vm7013_vm0, %v7014_v8 }
0x2817   :  { %6508 = vmatprep.subr.bf16.mxu0 %v7012_v1 }
0x281a   :  { %6510 = vmatpush3.bf16.msra.mxu0 %v7464_v57 }
0x281b   :  { %6511 = vmatprep.subr.bf16.mxu0 %v7012_v1 }
0x28e8   :  { %v2562_v38 = vpop.f32.mrb[22].mxu0 }
0x28e9   :  { %v7790_v39 = vadd.f32 %v2562_v38, %v7609_v43  ;;  %v5918_v44 = vpop.f32.mrb[23].mxu0 }
0x28eb   :  { %v2566_v47 = vsel %vm1899_vm14, %v7790_v39, -inf }
0x28ec   :  { %2567 = vmax.xlane.f32.xlu0 %v2566_v47 }
0x2979   :  { %v7794_v49 = vpop.xlane.xlu0 %2567 }
0x297a   :  { %vm2577_vm4 = vcmp.eq.f32.partialorder %v7790_v39, %v7794_v49 }
0x297b   :  { %v2578_v5 = vsel %vm2577_vm4, %v7255_v35, 128  ;;  %vm3894_vm4 = vcmp.eq.s32.totalorder %v7255_v35, 3 }
0x297c   :  { %v2579_v53 = vsel %vm1899_vm14, %v2578_v5, 2147483647 }
0x297d   :  { %v2581_v55 = vshra.s32 %v2579_v53, 16  ;;  %v2580_v62 = vand.u32 65535, %v2579_v53 }
0x297f   :  { %v2583_v59 = vcvt.s32.f32 %v2581_v55  ;;  %v2582_v4 = vcvt.s32.f32 %v2580_v62 }
0x2981   :  { %2584 = vmin.xlane.f32.xlu0 %v2583_v59 }
0x2a0e   :  { %v2585_v63 = vpop.xlane.xlu0 %2584 }
0x2a0f   :  { %vm2586_vm5 = vcmp.eq.f32.partialorder %v2583_v59, %v2585_v63  ;;  %v2591_v13 = vcvt.f32.s32 %v2585_v63 }
0x2a10   :  { %v2587_v33 = vsel %vm2586_vm5, %v2582_v4, inf }
0x2a11   :  { %2588 = vmin.xlane.f32.xlu1 %v2587_v33  ;;  %v2592_v18 = vshll.u32 %v2591_v13, 16 }
0x2a9e   :  { %v2589_v17 = vpop.xlane.xlu1 %2588 }
0x2a9f   :  { %v2590_v19 = vcvt.f32.s32 %v2589_v17 }
0x2aa1   :  { %v2593_v21 = vadd.s32 %v2592_v18, %v2590_v19 }
0x2aa3   :  { %v7807_v25 = vsel %vm2594_vm7, %v2593_v21, %v1929_v23  ;;  %vm2597_vm8 = vcmp.eq.s32.totalorder %v7255_v35, %v2593_v21 }
0x2aa4   :  { %5952 = vmatmul.mubr.msk.f32.vlgmr.msra.gmra.mrb[26].mxu1 %vm2597_vm8, %v7015_v37 }
0x2aa5   :  { %6525 = vmatpush3.bf16.msra.mxu1 %v7555_v2  ;;  %6005 = vmatprep.mubr.msk.f32.mxu1 %vm7013_vm0, %v7014_v8 }
0x2aa6   :  { %6526 = vmatprep.subr.bf16.mxu1 %v7012_v1 }
0x2aa9   :  { %6528 = vmatpush3.bf16.msra.mxu1 %v7565_v9 }
0x2aaa   :  { %6535 = vmatprep.subr.bf16.mxu1 %v7012_v1 }
0x2b77   :  { %v2666_v28 = vpop.f32.mrb[26].mxu1 }
0x2b78   :  { %v5953_v40 = vpop.f32.mrb[27].mxu1  ;;  %5963 = vmatmul.mubr.msk.f32.vlgmr.msra.gmra.mrb[24].mxu0 %vm232_vm2, %v2666_v28 }
0x2b79   :  { %6513 = vmatpush3.bf16.msra.mxu0 %v7460_v54  ;;  %5973 = vmatprep.mubr.msk.f32.mxu0 %vm7013_vm0, %v7014_v8 }
0x2b7a   :  { %6514 = vmatprep.subr.bf16.mxu0 %v7012_v1 }
0x2b7d   :  { %6516 = vmatpush3.bf16.msra.mxu0 %v7468_v58 }
0x2b7e   :  { %5976 = vmatprep.subr.mxu0 %v7014_v8 }
0x2b80   :  { %5974 = vmatmul.mubr.msk.f32.vlgmr.msra.gmra.mrb[26].mxu0 %vm232_vm2, %v7735_v10 }
0x2b81   :  { %5978 = vmatprep.mubr.msk.f32.mxu0 %vm7013_vm0, %v7014_v8 }
0x2b86   :  { %5977 = vmatpush3.xpose.msk.msra.mxu0 %vm232_vm2, %v7514_v36 }
0x2b87   :  { %5981 = vmatprep.subr.mxu0 %v7014_v8 }
0x2c4b   :  { %v2739_v27 = vpop.f32.mrb[24].mxu0 }
0x2c4c   :  { %v5964_v29 = vpop.f32.mrb[25].mxu0  ;;  %v2740_v31 = vadd.f32 %v2739_v27, %v7490_v3 }
0x2c53   :  { %v2809_v12 = vpop.f32.mrb[26].mxu0 }
0x2c54   :  { %v2810_v11 = vadd.f32 %v2809_v12, %v7486_v14  ;;  %v5975_v16 = vpop.f32.mrb[27].mxu0 }
0x2c56   :  { %2821 = vrot.lane.b32.xlu0 %v2810_v11, %s7016_s4  ;;  %v2813_v32 = vadd.f32 %v2810_v11, %v2740_v31 }
0x2c58   :  { %v5259_v10 = vmul.f32 -1.442695, %v2813_v32 }
0x2c5a   :  { %6786 = vpow2.f32 %v5259_v10 }
0x2c64   :  { %v6787_v34 = vpop.eup %6786 }
0x2c65   :  { %v2817_v41 = vadd.f32 1.0, %v6787_v34 }
0x2c67   :  { %6788 = vrcp.f32 %v2817_v41 }
0x2c71   :  { %v6789_v45 = vpop.eup %6788 }
0x2c72   :  { %v2831_v53 = vsub.f32 1.0, %v6789_v45  ;;  %v2837_v59 = vmul.f32 %v6789_v45, %v7731_v6 }
0x2cc8   :  { %v2822_v48 = vpop.permute.xlu0 %2821 }
0x2cc9   :  { %v2824_v38 = vmul.f32 %v6789_v45, %v2822_v48 }
0x2ccb   :  { %2826 = vrot.lane.b32.xlu1 %v2824_v38, %s7016_s4 }
0x2d3d   :  { %v2827_v44 = vpop.permute.xlu1 %2826 }
0x2d3e   :  { %v2829_v47 = vadd.f32 %v2827_v44, %v2740_v31 }
0x2d40   :  { %6790 = vtanh.f32 %v2829_v47 }
0x2d4a   :  { %v6791_v5 = vpop.eup %6790 }
0x2d4b   :  { %2833 = vrot.lane.b32.xlu1 %v6791_v5, %s7017_s5 }
0x2dbd   :  { %v2834_v55 = vpop.permute.xlu1 %2833 }
0x2dbe   :  { %v2836_v62 = vmul.f32 %v2834_v55, %v2831_v53 }
0x2dc0   :  { %v7837_v63 = vadd.f32 %v2837_v59, %v2836_v62 }
0x2dc2   :  { %2840 = vrot.lane.b32.xlu0 %v7837_v63, %s7017_s5 }
0x2e34   :  { %v7841_v4 = vpop.permute.xlu0 %2840 }
0x2e35   :  { %5979 = vmatmul.mubr.msk.f32.vlgmr.msra.gmra.mrb[28].mxu0 %vm232_vm2, %v7841_v4  ;;  %6006 = vmatmul.mubr.msk.f32.vlgmr.msra.gmra.mrb[28].mxu1 %vm232_vm2, %v7841_v4 }
0x2e36   :  { %5982 = vmatpush3.msra.mxu0 %v7514_v36  ;;  %5983 = vmatprep.mubr.msk.f32.mxu0 %vm7013_vm0, %v7014_v8 }
0x2e37   :  { %6517 = vmatprep.subr.bf16.mxu0 %v7012_v1  ;;  %6537 = vmatpush3.bf16.msra.mxu1 %v7631_v42 }
0x2e38   :  { %6538 = vmatprep.subr.bf16.mxu1 %v7012_v1  ;;  %6051 = vmatprep.mubr.msk.f32.mxu1 %vm7013_vm0, %v7014_v8 }
0x2e3b   :  { %6540 = vmatpush3.bf16.msra.mxu1 %v7637_v46 }
0x2e3c   :  { %6541 = vmatprep.subr.bf16.mxu1 %v7012_v1 }
0x2e3f   :  { %6543 = vmatpush3.bf16.msra.mxu1 %v7647_v51 }
0x2e40   :  { %6544 = vmatprep.subr.bf16.mxu1 %v7012_v1 }
0x2e43   :  { %6546 = vmatpush3.bf16.msra.mxu1 %v7657_v52 }
0x2e44   :  { %6547 = vmatprep.subr.bf16.mxu1 %v7012_v1 }
0x2e47   :  { %6549 = vmatpush3.bf16.msra.mxu1 %v7667_v61 }
0x2e48   :  { %6550 = vmatprep.subr.bf16.mxu1 %v7012_v1 }
0x2e4b   :  { %6552 = vmatpush3.bf16.msra.mxu1 %v7677_v0 }
0x2e4c   :  { %6553 = vmatprep.subr.bf16.mxu1 %v7012_v1 }
0x2e4f   :  { %6555 = vmatpush3.bf16.msra.mxu1 %v7687_v7 }
0x2e50   :  { %6556 = vmatprep.subr.bf16.mxu1 %v7012_v1 }
0x2e53   :  { %6558 = vmatpush3.bf16.msra.mxu1 %v7697_v15 }
0x2e54   :  { %6577 = vmatprep.subr.bf16.mxu1 %v7012_v1 }
0x2f08   :  { %v2910_v6 = vpop.f32.mrb[28].mxu0  ;;  %v3137_v33 = vpop.f32.mrb[28].mxu1 }
0x2f09   :  { %v5980_v13 = vpop.f32.mrb[29].mxu0  ;;  %v6007_v17 = vpop.f32.mrb[29].mxu1  ;;  %v2914_v18 = vsel %vm1580_vm12, %v2910_v6, -inf }
0x2f0a   :  { %2915 = vmax.xlane.f32.xlu1 %v2914_v18 }
0x2f97   :  { %v2916_v19 = vpop.xlane.xlu1 %2915 }
0x2f98   :  { %v2917_v21 = vsub.f32 %v2910_v6, %v2916_v19 }
0x2f9a   :  { %v2918_v23 = vmul.f32 1.442695, %v2917_v21 }
0x2f9c   :  { %6792 = vpow2.f32 %v2918_v23 }
0x2fa6   :  { %v6793_v28 = vpop.eup %6792 }
0x2fa7   :  { %v2920_v40 = vsel %vm1580_vm12, %v6793_v28, 0.0 }
0x2fa8   :  { %2921 = vadd.xlane.f32.xlu0 %v2920_v40 }
0x3035   :  { %v2922_v27 = vpop.xlane.xlu0 %2921 }
0x3036   :  { %6794 = vrcp.f32 %v2922_v27 }
0x3040   :  { %v6795_v29 = vpop.eup %6794 }
0x3041   :  { %v2924_v12 = vmul.f32 %v6795_v29, %v6793_v28 }
0x3043   :  { %5984 = vmatmul.mubr.msk.f32.vlgmr.msra.gmra.mrb[30].mxu0 %vm1592_vm13, %v2924_v12 }
0x3044   :  { %6519 = vmatpush3.bf16.msra.mxu0 %v7538_v56  ;;  %5994 = vmatprep.mubr.msk.f32.mxu0 %vm7013_vm0, %v7014_v8 }
0x3045   :  { %6520 = vmatprep.subr.bf16.mxu0 %v7012_v1 }
0x3048   :  { %6522 = vmatpush3.bf16.msra.mxu0 %v7544_v60 }
0x3049   :  { %6529 = vmatprep.subr.bf16.mxu0 %v7012_v1 }
0x3116   :  { %v2994_v11 = vpop.f32.mrb[30].mxu0 }
0x3117   :  { %v5985_v16 = vpop.f32.mrb[31].mxu0  ;;  %5995 = vmatmul.mubr.msk.f32.vlgmr.msra.gmra.mrb[32].mxu0 %vm232_vm2, %v2994_v11 }
0x3118   :  { %6531 = vmatpush3.bf16.msra.mxu0 %v7588_v22  ;;  %6016 = vmatprep.mubr.msk.f32.mxu0 %vm7013_vm0, %v7014_v8 }
0x3119   :  { %6532 = vmatprep.subr.bf16.mxu0 %v7012_v1 }
0x311c   :  { %6534 = vmatpush3.bf16.msra.mxu0 %v7594_v24 }
0x311d   :  { %6559 = vmatprep.subr.bf16.mxu0 %v7012_v1 }
0x31ea   :  { %v3067_v31 = vpop.f32.mrb[32].mxu0 }
0x31eb   :  { %v3138_v32 = vadd.f32 %v3137_v33, %v3067_v31  ;;  %v5996_v10 = vpop.f32.mrb[33].mxu0 }
0x31ed   :  { %v3141_v34 = vadd.f32 %v3138_v32, %v7599_v26 }
0x31ef   :  { %6796 = vtanh.f32 %v3141_v34 }
0x31f9   :  { %v6797_v41 = vpop.eup %6796 }
0x31fa   :  { %6017 = vmatmul.mubr.msk.f32.vlgmr.msra.gmra.mrb[34].mxu0 %vm232_vm2, %v6797_v41 }
0x31fb   :  { %6561 = vmatpush3.bf16.msra.mxu0 %v7452_v50  ;;  %6062 = vmatprep.mubr.msk.f32.mxu0 %vm7013_vm0, %v7014_v8 }
0x31fc   :  { %6562 = vmatprep.subr.bf16.mxu0 %v7012_v1 }
0x31ff   :  { %6564 = vmatpush3.bf16.msra.mxu0 %v7464_v57 }
0x3200   :  { %6565 = vmatprep.subr.bf16.mxu0 %v7012_v1 }
0x32cd   :  { %v3212_v45 = vpop.f32.mrb[34].mxu0 }
0x32ce   :  { %v7894_v48 = vadd.f32 %v3212_v45, %v7609_v43  ;;  %v6018_v38 = vpop.f32.mrb[35].mxu0 }
0x32d0   :  { %v3216_v44 = vsel %vm1899_vm14, %v7894_v48, -inf }
0x32d1   :  { %3217 = vmax.xlane.f32.xlu0 %v3216_v44 }
0x335e   :  { %v7898_v47 = vpop.xlane.xlu0 %3217 }
0x335f   :  { %vm3227_vm9 = vcmp.eq.f32.partialorder %v7894_v48, %v7898_v47 }
0x3360   :  { %v3228_v5 = vsel %vm3227_vm9, %v7255_v35, 128 }
0x3361   :  { %v3229_v53 = vsel %vm1899_vm14, %v3228_v5, 2147483647 }
0x3362   :  { %v3231_v55 = vshra.s32 %v3229_v53, 16  ;;  %v3230_v62 = vand.u32 65535, %v3229_v53 }
0x3364   :  { %v3233_v59 = vcvt.s32.f32 %v3231_v55  ;;  %v3232_v33 = vcvt.s32.f32 %v3230_v62 }
0x3366   :  { %3234 = vmin.xlane.f32.xlu1 %v3233_v59 }
0x33f3   :  { %v3235_v6 = vpop.xlane.xlu1 %3234 }
0x33f4   :  { %vm3236_vm10 = vcmp.eq.f32.partialorder %v3233_v59, %v3235_v6  ;;  %v3241_v17 = vcvt.f32.s32 %v3235_v6 }
0x33f5   :  { %v3237_v13 = vsel %vm3236_vm10, %v3232_v33, inf  ;;  %vm4544_vm10 = vcmp.eq.s32.totalorder %v7255_v35, 4 }
0x33f6   :  { %3238 = vmin.xlane.f32.xlu0 %v3237_v13  ;;  %v3242_v19 = vshll.u32 %v3241_v17, 16 }
0x3483   :  { %v3239_v18 = vpop.xlane.xlu0 %3238 }
0x3484   :  { %v3240_v21 = vcvt.f32.s32 %v3239_v18 }
0x3486   :  { %v3243_v23 = vadd.s32 %v3242_v19, %v3240_v21 }
0x3488   :  { %v7908_v28 = vsel %vm3244_vm11, %v3243_v23, %v7807_v25  ;;  %vm3247_vm15 = vcmp.eq.s32.totalorder %v7255_v35, %v3243_v23 }
0x3489   :  { %6052 = vmatmul.mubr.msk.f32.vlgmr.msra.gmra.mrb[30].mxu1 %vm3247_vm15, %v7015_v37 }
0x348a   :  { %6579 = vmatpush3.bf16.msra.mxu1 %v7555_v2  ;;  %6105 = vmatprep.mubr.msk.f32.mxu1 %vm7013_vm0, %v7014_v8 }
0x348b   :  { %6580 = vmatprep.subr.bf16.mxu1 %v7012_v1 }
0x348e   :  { %6582 = vmatpush3.bf16.msra.mxu1 %v7565_v9 }
0x348f   :  { %6589 = vmatprep.subr.bf16.mxu1 %v7012_v1 }
0x355c   :  { %v3316_v40 = vpop.f32.mrb[30].mxu1 }
0x355d   :  { %v6053_v27 = vpop.f32.mrb[31].mxu1  ;;  %6063 = vmatmul.mubr.msk.f32.vlgmr.msra.gmra.mrb[36].mxu0 %vm232_vm2, %v3316_v40 }
0x355e   :  { %6567 = vmatpush3.bf16.msra.mxu0 %v7460_v54  ;;  %6073 = vmatprep.mubr.msk.f32.mxu0 %vm7013_vm0, %v7014_v8 }
0x355f   :  { %6568 = vmatprep.subr.bf16.mxu0 %v7012_v1 }
0x3562   :  { %6570 = vmatpush3.bf16.msra.mxu0 %v7468_v58 }
0x3563   :  { %6076 = vmatprep.subr.mxu0 %v7014_v8 }
0x3565   :  { %6074 = vmatmul.mubr.msk.f32.vlgmr.msra.gmra.mrb[38].mxu0 %vm232_vm2, %v7841_v4 }
0x3566   :  { %6078 = vmatprep.mubr.msk.f32.mxu0 %vm7013_vm0, %v7014_v8 }
0x356b   :  { %6077 = vmatpush3.xpose.msk.msra.mxu0 %vm232_vm2, %v7514_v36 }
0x356c   :  { %6081 = vmatprep.subr.mxu0 %v7014_v8 }
0x3630   :  { %v3389_v25 = vpop.f32.mrb[36].mxu0 }
0x3631   :  { %v6064_v29 = vpop.f32.mrb[37].mxu0  ;;  %v3390_v31 = vadd.f32 %v3389_v25, %v7490_v3 }
0x3638   :  { %v3459_v12 = vpop.f32.mrb[38].mxu0 }
0x3639   :  { %v3460_v11 = vadd.f32 %v3459_v12, %v7486_v14  ;;  %v6075_v16 = vpop.f32.mrb[39].mxu0 }
0x363b   :  { %3471 = vrot.lane.b32.xlu1 %v3460_v11, %s7016_s4  ;;  %v3463_v32 = vadd.f32 %v3460_v11, %v3390_v31 }
0x363d   :  { %v5270_v4 = vmul.f32 -1.442695, %v3463_v32 }
0x363f   :  { %6798 = vpow2.f32 %v5270_v4 }
0x3649   :  { %v6799_v10 = vpop.eup %6798 }
0x364a   :  { %v3467_v34 = vadd.f32 1.0, %v6799_v10 }
0x364c   :  { %6800 = vrcp.f32 %v3467_v34 }
0x3656   :  { %v6801_v41 = vpop.eup %6800 }
0x3657   :  { %v3481_v53 = vsub.f32 1.0, %v6801_v41  ;;  %v3487_v3 = vmul.f32 %v6801_v41, %v7837_v63 }
0x36ad   :  { %v3472_v45 = vpop.permute.xlu1 %3471 }
0x36ae   :  { %v3474_v38 = vmul.f32 %v6801_v41, %v3472_v45 }
0x36b0   :  { %3476 = vrot.lane.b32.xlu0 %v3474_v38, %s7016_s4 }
0x3722   :  { %v3477_v44 = vpop.permute.xlu0 %3476 }
0x3723   :  { %v3479_v5 = vadd.f32 %v3477_v44, %v3390_v31 }
0x3725   :  { %6802 = vtanh.f32 %v3479_v5 }
0x372f   :  { %v6803_v14 = vpop.eup %6802 }
0x3730   :  { %3483 = vrot.lane.b32.xlu1 %v6803_v14, %s7017_s5 }
0x37a2   :  { %v3484_v55 = vpop.permute.xlu1 %3483 }
0x37a3   :  { %v3486_v59 = vmul.f32 %v3484_v55, %v3481_v53 }
0x37a5   :  { %v7938_v62 = vadd.f32 %v3487_v3, %v3486_v59 }
0x37a7   :  { %3490 = vrot.lane.b32.xlu1 %v7938_v62, %s7017_s5 }
0x3819   :  { %v7942_v6 = vpop.permute.xlu1 %3490 }
0x381a   :  { %6079 = vmatmul.mubr.msk.f32.vlgmr.msra.gmra.mrb[40].mxu0 %vm232_vm2, %v7942_v6  ;;  %6106 = vmatmul.mubr.msk.f32.vlgmr.msra.gmra.mrb[32].mxu1 %vm232_vm2, %v7942_v6 }
0x381b   :  { %6082 = vmatpush3.msra.mxu0 %v7514_v36  ;;  %6083 = vmatprep.mubr.msk.f32.mxu0 %vm7013_vm0, %v7014_v8 }
0x381c   :  { %6571 = vmatprep.subr.bf16.mxu0 %v7012_v1  ;;  %6591 = vmatpush3.bf16.msra.mxu1 %v7631_v42 }
0x381d   :  { %6592 = vmatprep.subr.bf16.mxu1 %v7012_v1  ;;  %6151 = vmatprep.mubr.msk.f32.mxu1 %vm7013_vm0, %v7014_v8 }
0x3820   :  { %6594 = vmatpush3.bf16.msra.mxu1 %v7637_v46 }
0x3821   :  { %6595 = vmatprep.subr.bf16.mxu1 %v7012_v1 }
0x3824   :  { %6597 = vmatpush3.bf16.msra.mxu1 %v7647_v51 }
0x3825   :  { %6598 = vmatprep.subr.bf16.mxu1 %v7012_v1 }
0x3828   :  { %6600 = vmatpush3.bf16.msra.mxu1 %v7657_v52 }
0x3829   :  { %6601 = vmatprep.subr.bf16.mxu1 %v7012_v1 }
0x382c   :  { %6603 = vmatpush3.bf16.msra.mxu1 %v7667_v61 }
0x382d   :  { %6604 = vmatprep.subr.bf16.mxu1 %v7012_v1 }
0x3830   :  { %6606 = vmatpush3.bf16.msra.mxu1 %v7677_v0 }
0x3831   :  { %6607 = vmatprep.subr.bf16.mxu1 %v7012_v1 }
0x3834   :  { %6609 = vmatpush3.bf16.msra.mxu1 %v7687_v7 }
0x3835   :  { %6610 = vmatprep.subr.bf16.mxu1 %v7012_v1 }
0x3838   :  { %6612 = vmatpush3.bf16.msra.mxu1 %v7697_v15 }
0x3839   :  { %6631 = vmatprep.subr.bf16.mxu1 %v7012_v1 }
0x38ed   :  { %v3560_v36 = vpop.f32.mrb[40].mxu0  ;;  %v3787_v63 = vpop.f32.mrb[32].mxu1 }
0x38ee   :  { %v6080_v33 = vpop.f32.mrb[41].mxu0  ;;  %v6107_v13 = vpop.f32.mrb[33].mxu1  ;;  %v3564_v17 = vsel %vm1580_vm12, %v3560_v36, -inf }
0x38ef   :  { %3565 = vmax.xlane.f32.xlu0 %v3564_v17 }
0x397c   :  { %v3566_v18 = vpop.xlane.xlu0 %3565 }
0x397d   :  { %v3567_v19 = vsub.f32 %v3560_v36, %v3566_v18 }
0x397f   :  { %v3568_v21 = vmul.f32 1.442695, %v3567_v19 }
0x3981   :  { %6804 = vpow2.f32 %v3568_v21 }
0x398b   :  { %v6805_v23 = vpop.eup %6804 }
0x398c   :  { %v3570_v40 = vsel %vm1580_vm12, %v6805_v23, 0.0 }
0x398d   :  { %3571 = vadd.xlane.f32.xlu1 %v3570_v40 }
0x3a1a   :  { %v3572_v27 = vpop.xlane.xlu1 %3571 }
0x3a1b   :  { %6806 = vrcp.f32 %v3572_v27 }
0x3a25   :  { %v6807_v25 = vpop.eup %6806 }
0x3a26   :  { %v3574_v29 = vmul.f32 %v6807_v25, %v6805_v23  ;;  %v8035_v25 = vld [vmem:[#allocation9] sm:$0x1] }
0x3a28   :  { %6084 = vmatmul.mubr.msk.f32.vlgmr.msra.gmra.mrb[42].mxu0 %vm1592_vm13, %v3574_v29 }
0x3a29   :  { %6573 = vmatpush3.bf16.msra.mxu0 %v7538_v56  ;;  %6094 = vmatprep.mubr.msk.f32.mxu0 %vm7013_vm0, %v7014_v8 }
0x3a2a   :  { %6574 = vmatprep.subr.bf16.mxu0 %v7012_v1 }
0x3a2d   :  { %6576 = vmatpush3.bf16.msra.mxu0 %v7544_v60 }
0x3a2e   :  { %6583 = vmatprep.subr.bf16.mxu0 %v7012_v1 }
0x3afb   :  { %v3644_v12 = vpop.f32.mrb[42].mxu0 }
0x3afc   :  { %v6085_v11 = vpop.f32.mrb[43].mxu0  ;;  %6095 = vmatmul.mubr.msk.f32.vlgmr.msra.gmra.mrb[44].mxu0 %vm232_vm2, %v3644_v12 }
0x3afd   :  { %6585 = vmatpush3.bf16.msra.mxu0 %v7588_v22  ;;  %6116 = vmatprep.mubr.msk.f32.mxu0 %vm7013_vm0, %v7014_v8 }
0x3afe   :  { %6586 = vmatprep.subr.bf16.mxu0 %v7012_v1 }
0x3b01   :  { %6588 = vmatpush3.bf16.msra.mxu0 %v7594_v24 }
0x3b02   :  { %6613 = vmatprep.subr.bf16.mxu0 %v7012_v1 }
0x3bcf   :  { %v3717_v16 = vpop.f32.mrb[44].mxu0 }
0x3bd0   :  { %v3788_v31 = vadd.f32 %v3787_v63, %v3717_v16  ;;  %v6096_v32 = vpop.f32.mrb[45].mxu0 }
0x3bd2   :  { %v3791_v4 = vadd.f32 %v3788_v31, %v7599_v26 }
0x3bd4   :  { %6808 = vtanh.f32 %v3791_v4 }
0x3bde   :  { %v6809_v10 = vpop.eup %6808 }
0x3bdf   :  { %6117 = vmatmul.mubr.msk.f32.vlgmr.msra.gmra.mrb[46].mxu0 %vm232_vm2, %v6809_v10 }
0x3be0   :  { %6615 = vmatpush3.bf16.msra.mxu0 %v7452_v50  ;;  %6162 = vmatprep.mubr.msk.f32.mxu0 %vm7013_vm0, %v7014_v8 }
0x3be1   :  { %6616 = vmatprep.subr.bf16.mxu0 %v7012_v1 }
0x3be4   :  { %6618 = vmatpush3.bf16.msra.mxu0 %v7464_v57 }
0x3be5   :  { %6619 = vmatprep.subr.bf16.mxu0 %v7012_v1 }
0x3cb2   :  { %v3862_v34 = vpop.f32.mrb[46].mxu0 }
0x3cb3   :  { %v7995_v41 = vadd.f32 %v3862_v34, %v7609_v43  ;;  %v6118_v26 = vpop.f32.mrb[47].mxu0 }
0x3cb5   :  { %v3866_v45 = vsel %vm1899_vm14, %v7995_v41, -inf }
0x3cb6   :  { %3867 = vmax.xlane.f32.xlu0 %v3866_v45 }
0x3d43   :  { %v7999_v38 = vpop.xlane.xlu0 %3867 }
0x3d44   :  { %vm3877_vm1 = vcmp.eq.f32.partialorder %v7995_v41, %v7999_v38 }
0x3d45   :  { %v3878_v44 = vsel %vm3877_vm1, %v7255_v35, 128 }
0x3d46   :  { %v3879_v5 = vsel %vm1899_vm14, %v3878_v44, 2147483647 }
0x3d47   :  { %v3881_v14 = vshra.s32 %v3879_v5, 16  ;;  %v3880_v55 = vand.u32 65535, %v3879_v5 }
0x3d49   :  { %v3883_v53 = vcvt.s32.f32 %v3881_v14  ;;  %v3882_v3 = vcvt.s32.f32 %v3880_v55 }
0x3d4b   :  { %3884 = vmin.xlane.f32.xlu0 %v3883_v53 }
0x3dd8   :  { %v3885_v43 = vpop.xlane.xlu0 %3884 }
0x3dd9   :  { %vm3886_vm3 = vcmp.eq.f32.partialorder %v3883_v53, %v3885_v43  ;;  %v3891_v36 = vcvt.f32.s32 %v3885_v43 }
0x3dda   :  { %v3887_v59 = vsel %vm3886_vm3, %v3882_v3, inf }
0x3ddb   :  { %3888 = vmin.xlane.f32.xlu1 %v3887_v59  ;;  %v3892_v33 = vshll.u32 %v3891_v36, 16 }
0x3e68   :  { %v3889_v63 = vpop.xlane.xlu1 %3888 }
0x3e69   :  { %v3890_v13 = vcvt.f32.s32 %v3889_v63 }
0x3e6b   :  { %v3893_v17 = vadd.s32 %v3892_v33, %v3890_v13 }
0x3e6d   :  { %v8009_v18 = vsel %vm3894_vm4, %v3893_v17, %v7908_v28  ;;  %vm3897_vm5 = vcmp.eq.s32.totalorder %v7255_v35, %v3893_v17  ;;  %v8030_v28 = vld [vmem:[#allocation2] sm:$0xff] }
0x3e6e   :  { %6152 = vmatmul.mubr.msk.f32.vlgmr.msra.gmra.mrb[34].mxu1 %vm3897_vm5, %v7015_v37 }
0x3e6f   :  { %6633 = vmatpush3.bf16.msra.mxu1 %v7555_v2  ;;  %6205 = vmatprep.mubr.msk.f32.mxu1 %vm7013_vm0, %v7014_v8 }
0x3e70   :  { %6634 = vmatprep.subr.bf16.mxu1 %v7012_v1 }
0x3e73   :  { %6636 = vmatpush3.bf16.msra.mxu1 %v7565_v9 }
0x3e74   :  { %6643 = vmatprep.subr.bf16.mxu1 %v7012_v1 }
0x3f41   :  { %v3966_v19 = vpop.f32.mrb[34].mxu1 }
0x3f42   :  { %v6153_v21 = vpop.f32.mrb[35].mxu1  ;;  %6163 = vmatmul.mubr.msk.f32.vlgmr.msra.gmra.mrb[48].mxu0 %vm232_vm2, %v3966_v19 }
0x3f43   :  { %6621 = vmatpush3.bf16.msra.mxu0 %v7460_v54  ;;  %6173 = vmatprep.mubr.msk.f32.mxu0 %vm7013_vm0, %v7014_v8 }
0x3f44   :  { %6622 = vmatprep.subr.bf16.mxu0 %v7012_v1 }
0x3f47   :  { %6624 = vmatpush3.bf16.msra.mxu0 %v7468_v58 }
0x3f48   :  { %6176 = vmatprep.subr.mxu0 %v7014_v8 }
0x3f4a   :  { %6174 = vmatmul.mubr.msk.f32.vlgmr.msra.gmra.mrb[50].mxu0 %vm232_vm2, %v7942_v6  ;;  %v8039_v6 = vld [vmem:[#allocation8] sm:$0x1] }
0x3f4b   :  { %6178 = vmatprep.mubr.msk.f32.mxu0 %vm7013_vm0, %v7014_v8 }
0x3f50   :  { %6177 = vmatpush3.xpose.msk.msra.mxu0 %vm232_vm2, %v8030_v28 }
0x3f51   :  { %6181 = vmatprep.subr.mxu0 %v7014_v8 }
0x4015   :  { %v4039_v23 = vpop.f32.mrb[48].mxu0 }
0x4016   :  { %v6164_v40 = vpop.f32.mrb[49].mxu0  ;;  %v4040_v11 = vadd.f32 %v8039_v6, %v4039_v23 }
0x401d   :  { %v4109_v27 = vpop.f32.mrb[50].mxu0 }
0x401e   :  { %v4110_v29 = vadd.f32 %v8035_v25, %v4109_v27  ;;  %v6175_v12 = vpop.f32.mrb[51].mxu0  ;;  %v8093_v27 = vld [vmem:[#allocation11] sm:$0x1] }
0x4020   :  { %4121 = vrot.lane.b32.xlu0 %v4110_v29, %s7016_s4  ;;  %v4113_v16 = vadd.f32 %v4110_v29, %v4040_v11 }
0x4022   :  { %v5281_v31 = vmul.f32 -1.442695, %v4113_v16  ;;  %v8103_v16 = vld [vmem:[#allocation12] sm:$0x1] }
0x4024   :  { %6810 = vpow2.f32 %v5281_v31 }
0x402e   :  { %v6811_v32 = vpop.eup %6810 }
0x402f   :  { %v4117_v4 = vadd.f32 1.0, %v6811_v32 }
0x4031   :  { %6812 = vrcp.f32 %v4117_v4 }
0x403b   :  { %v6813_v10 = vpop.eup %6812 }
0x403c   :  { %v4131_v14 = vsub.f32 1.0, %v6813_v10  ;;  %v4137_v55 = vmul.f32 %v6813_v10, %v7938_v62 }
0x4092   :  { %v4122_v34 = vpop.permute.xlu0 %4121 }
0x4093   :  { %v4124_v26 = vmul.f32 %v6813_v10, %v4122_v34 }
0x4095   :  { %4126 = vrot.lane.b32.xlu1 %v4124_v26, %s7016_s4 }
0x4107   :  { %v4127_v45 = vpop.permute.xlu1 %4126 }
0x4108   :  { %v4129_v44 = vadd.f32 %v4127_v45, %v4040_v11 }
0x410a   :  { %6814 = vtanh.f32 %v4129_v44 }
0x4114   :  { %v6815_v5 = vpop.eup %6814 }
0x4115   :  { %4133 = vrot.lane.b32.xlu1 %v6815_v5, %s7017_s5 }
0x4187   :  { %v4134_v53 = vpop.permute.xlu1 %4133 }
0x4188   :  { %v4136_v43 = vmul.f32 %v4134_v53, %v4131_v14 }
0x418a   :  { %v8045_v3 = vadd.f32 %v4137_v55, %v4136_v43 }
0x418c   :  { %4140 = vrot.lane.b32.xlu0 %v8045_v3, %s7017_s5 }
0x41fe   :  { %v8049_v59 = vpop.permute.xlu0 %4140 }
0x41ff   :  { %6179 = vmatmul.mubr.msk.f32.vlgmr.msra.gmra.mrb[52].mxu0 %vm232_vm2, %v8049_v59  ;;  %6206 = vmatmul.mubr.msk.f32.vlgmr.msra.gmra.mrb[36].mxu1 %vm232_vm2, %v8049_v59 }
0x4200   :  { %6182 = vmatpush3.msra.mxu0 %v8030_v28  ;;  %6183 = vmatprep.mubr.msk.f32.mxu0 %vm7013_vm0, %v7014_v8 }
0x4201   :  { %6625 = vmatprep.subr.bf16.mxu0 %v7012_v1  ;;  %6645 = vmatpush3.bf16.msra.mxu1 %v7631_v42 }
0x4202   :  { %6646 = vmatprep.subr.bf16.mxu1 %v7012_v1  ;;  %6251 = vmatprep.mubr.msk.f32.mxu1 %vm7013_vm0, %v7014_v8 }
0x4205   :  { %6648 = vmatpush3.bf16.msra.mxu1 %v7637_v46 }
0x4206   :  { %6649 = vmatprep.subr.bf16.mxu1 %v7012_v1 }
0x4209   :  { %6651 = vmatpush3.bf16.msra.mxu1 %v7647_v51 }
0x420a   :  { %6652 = vmatprep.subr.bf16.mxu1 %v7012_v1 }
0x420d   :  { %6654 = vmatpush3.bf16.msra.mxu1 %v7657_v52 }
0x420e   :  { %6655 = vmatprep.subr.bf16.mxu1 %v7012_v1 }
0x4211   :  { %6657 = vmatpush3.bf16.msra.mxu1 %v7667_v61 }
0x4212   :  { %6658 = vmatprep.subr.bf16.mxu1 %v7012_v1 }
0x4215   :  { %6660 = vmatpush3.bf16.msra.mxu1 %v7677_v0 }
0x4216   :  { %6661 = vmatprep.subr.bf16.mxu1 %v7012_v1 }
0x4219   :  { %6663 = vmatpush3.bf16.msra.mxu1 %v7687_v7 }
0x421a   :  { %6664 = vmatprep.subr.bf16.mxu1 %v7012_v1 }
0x421d   :  { %6666 = vmatpush3.bf16.msra.mxu1 %v7697_v15 }
0x421e   :  { %6685 = vmatprep.subr.bf16.mxu1 %v7012_v1 }
0x42d2   :  { %v4210_v42 = vpop.f32.mrb[52].mxu0  ;;  %v4437_v46 = vpop.f32.mrb[36].mxu1 }
0x42d3   :  { %v6180_v51 = vpop.f32.mrb[53].mxu0  ;;  %v6207_v52 = vpop.f32.mrb[37].mxu1  ;;  %v4214_v61 = vsel %vm1580_vm12, %v4210_v42, -inf }
0x42d4   :  { %4215 = vmax.xlane.f32.xlu1 %v4214_v61 }
0x4361   :  { %v4216_v62 = vpop.xlane.xlu1 %4215 }
0x4362   :  { %v4217_v36 = vsub.f32 %v4210_v42, %v4216_v62 }
0x4364   :  { %v4218_v0 = vmul.f32 1.442695, %v4217_v36 }
0x4366   :  { %6816 = vpow2.f32 %v4218_v0 }
0x4370   :  { %v6817_v63 = vpop.eup %6816 }
0x4371   :  { %v4220_v7 = vsel %vm1580_vm12, %v6817_v63, 0.0 }
0x4372   :  { %4221 = vadd.xlane.f32.xlu0 %v4220_v7 }
0x43ff   :  { %v4222_v33 = vpop.xlane.xlu0 %4221 }
0x4400   :  { %6818 = vrcp.f32 %v4222_v33 }
0x440a   :  { %v6819_v15 = vpop.eup %6818 }
0x440b   :  { %v4224_v13 = vmul.f32 %v6819_v15, %v6817_v63 }
0x440d   :  { %6184 = vmatmul.mubr.msk.f32.vlgmr.msra.gmra.mrb[54].mxu0 %vm1592_vm13, %v4224_v13 }
0x440e   :  { %6627 = vmatpush3.bf16.msra.mxu0 %v7538_v56  ;;  %6194 = vmatprep.mubr.msk.f32.mxu0 %vm7013_vm0, %v7014_v8 }
0x440f   :  { %6628 = vmatprep.subr.bf16.mxu0 %v7012_v1 }
0x4412   :  { %6630 = vmatpush3.bf16.msra.mxu0 %v7544_v60 }
0x4413   :  { %6637 = vmatprep.subr.bf16.mxu0 %v7012_v1 }
0x44e0   :  { %v4294_v17 = vpop.f32.mrb[54].mxu0 }
0x44e1   :  { %v6185_v19 = vpop.f32.mrb[55].mxu0  ;;  %6195 = vmatmul.mubr.msk.f32.vlgmr.msra.gmra.mrb[56].mxu0 %vm232_vm2, %v4294_v17 }
0x44e2   :  { %6639 = vmatpush3.bf16.msra.mxu0 %v7588_v22  ;;  %6216 = vmatprep.mubr.msk.f32.mxu0 %vm7013_vm0, %v7014_v8 }
0x44e3   :  { %6640 = vmatprep.subr.bf16.mxu0 %v7012_v1 }
0x44e6   :  { %6642 = vmatpush3.bf16.msra.mxu0 %v7594_v24 }
0x44e7   :  { %6667 = vmatprep.subr.bf16.mxu0 %v7012_v1 }
0x45b4   :  { %v4367_v21 = vpop.f32.mrb[56].mxu0 }
0x45b5   :  { %v4438_v23 = vadd.f32 %v4437_v46, %v4367_v21  ;;  %v6196_v40 = vpop.f32.mrb[57].mxu0 }
0x45b7   :  { %v4441_v29 = vadd.f32 %v8093_v27, %v4438_v23 }
0x45b9   :  { %6820 = vtanh.f32 %v4441_v29 }
0x45c3   :  { %v6821_v12 = vpop.eup %6820 }
0x45c4   :  { %6217 = vmatmul.mubr.msk.f32.vlgmr.msra.gmra.mrb[58].mxu0 %vm232_vm2, %v6821_v12 }
0x45c5   :  { %6669 = vmatpush3.bf16.msra.mxu0 %v7452_v50  ;;  %6262 = vmatprep.mubr.msk.f32.mxu0 %vm7013_vm0, %v7014_v8 }
0x45c6   :  { %6670 = vmatprep.subr.bf16.mxu0 %v7012_v1 }
0x45c9   :  { %6672 = vmatpush3.bf16.msra.mxu0 %v7464_v57 }
0x45ca   :  { %6673 = vmatprep.subr.bf16.mxu0 %v7012_v1 }
0x4697   :  { %v4512_v11 = vpop.f32.mrb[58].mxu0 }
0x4698   :  { %v8106_v31 = vadd.f32 %v8103_v16, %v4512_v11  ;;  %v6218_v32 = vpop.f32.mrb[59].mxu0 }
0x469a   :  { %v4516_v4 = vsel %vm1899_vm14, %v8106_v31, -inf }
0x469b   :  { %4517 = vmax.xlane.f32.xlu0 %v4516_v4  ;;  %v1903_v4 = vsub.f32 %v7612_v30, %v7616_v20 }
0x4728   :  { %v8110_v50 = vpop.xlane.xlu0 %4517 }
0x4729   :  { %vm4527_vm8 = vcmp.eq.f32.partialorder %v8106_v31, %v8110_v50 }
0x472a   :  { %v4528_v57 = vsel %vm4527_vm8, %v7255_v35, 128 }
0x472b   :  { %v4529_v10 = vsel %vm1899_vm14, %v4528_v57, 2147483647 }
0x472c   :  { %v4531_v34 = vshra.s32 %v4529_v10, 16  ;;  %v4530_v45 = vand.u32 65535, %v4529_v10 }
0x472e   :  { %v4533_v26 = vcvt.s32.f32 %v4531_v34  ;;  %v4532_v5 = vcvt.s32.f32 %v4530_v45  ;;  %v1904_v34 = vmul.f32 1.442695, %v1903_v4 }
0x4730   :  { %4534 = vmin.xlane.f32.xlu1 %v4533_v26 }
0x47bd   :  { %v4535_v44 = vpop.xlane.xlu1 %4534 }
0x47be   :  { %vm4536_vm9 = vcmp.eq.f32.partialorder %v4533_v26, %v4535_v44  ;;  %v4541_v53 = vcvt.f32.s32 %v4535_v44  ;;  %v4519_v44 = vsub.f32 %v8106_v31, %v8110_v50 }
0x47bf   :  { %v4537_v14 = vsel %vm4536_vm9, %v4532_v5, inf }
0x47c0   :  { %4538 = vmin.xlane.f32.xlu0 %v4537_v14  ;;  %v4542_v43 = vshll.u32 %v4541_v53, 16  ;;  %v4520_v5 = vmul.f32 1.442695, %v4519_v44 }
0x484d   :  { %v4539_v55 = vpop.xlane.xlu0 %4538 }
0x484e   :  { %v4540_v42 = vcvt.f32.s32 %v4539_v55 }
0x4850   :  { %v4543_v46 = vadd.s32 %v4542_v43, %v4540_v42 }
0x4852   :  { %v8120_v51 = vsel %vm4544_vm10, %v4543_v46, %v8009_v18  ;;  %vm4547_vm15 = vcmp.eq.s32.totalorder %v7255_v35, %v4543_v46 }
0x4853   :  { %6252 = vmatmul.mubr.msk.f32.vlgmr.msra.gmra.mrb[38].mxu1 %vm4547_vm15, %v7015_v37 }
0x4854   :  { %6687 = vmatpush3.bf16.msra.mxu1 %v7555_v2  ;;  %6305 = vmatprep.mubr.msk.f32.mxu1 %vm7013_vm0, %v7014_v8 }
0x4855   :  { %6688 = vmatprep.subr.bf16.mxu1 %v7012_v1 }
0x4858   :  { %6690 = vmatpush3.bf16.msra.mxu1 %v7565_v9 }
0x4926   :  { %v4616_v52 = vpop.f32.mrb[38].mxu1 }
0x4927   :  { %v6253_v61 = vpop.f32.mrb[39].mxu1  ;;  %6263 = vmatmul.mubr.msk.f32.vlgmr.msra.gmra.mrb[60].mxu0 %vm232_vm2, %v4616_v52 }
0x4928   :  { %6675 = vmatpush3.bf16.msra.mxu0 %v7460_v54  ;;  %6273 = vmatprep.mubr.msk.f32.mxu0 %vm7013_vm0, %v7014_v8 }
0x4929   :  { %6676 = vmatprep.subr.bf16.mxu0 %v7012_v1 }
0x492c   :  { %6678 = vmatpush3.bf16.msra.mxu0 %v7468_v58 }
0x492d   :  { %6276 = vmatprep.subr.mxu0 %v7014_v8 }
0x492f   :  { %6274 = vmatmul.mubr.msk.f32.vlgmr.msra.gmra.mrb[62].mxu0 %vm232_vm2, %v8049_v59 }
0x4930   :  { %6278 = vmatprep.mubr.msk.f32.mxu0 %vm7013_vm0, %v7014_v8 }
0x4935   :  { %6277 = vmatpush3.xpose.msk.msra.mxu0 %vm232_vm2, %v8030_v28 }
0x4936   :  { %6281 = vmatprep.subr.mxu0 %v7014_v8 }
0x49fa   :  { %v4689_v37 = vpop.f32.mrb[60].mxu0 }
0x49fb   :  { %v6264_v54 = vpop.f32.mrb[61].mxu0  ;;  %v4690_v58 = vadd.f32 %v8039_v6, %v4689_v37 }
0x4a02   :  { %v4759_v2 = vpop.f32.mrb[62].mxu0 }
0x4a03   :  { %v4760_v9 = vadd.f32 %v8035_v25, %v4759_v2  ;;  %v6275_v18 = vpop.f32.mrb[63].mxu0 }
0x4a05   :  { %4771 = vrot.lane.b32.xlu1 %v4760_v9, %s7016_s4  ;;  %v4763_v62 = vadd.f32 %v4760_v9, %v4690_v58 }
0x4a07   :  { %v5292_v59 = vmul.f32 -1.442695, %v4763_v62 }
0x4a09   :  { %6822 = vpow2.f32 %v5292_v59 }
0x4a13   :  { %v6823_v36 = vpop.eup %6822 }
0x4a14   :  { %v4767_v0 = vadd.f32 1.0, %v6823_v36 }
0x4a16   :  { %6824 = vrcp.f32 %v4767_v0 }
0x4a20   :  { %v6825_v63 = vpop.eup %6824 }
0x4a21   :  { %v4781_v17 = vsub.f32 1.0, %v6825_v63  ;;  %v4787_v6 = vmul.f32 %v6825_v63, %v8045_v3 }
0x4a77   :  { %v4772_v7 = vpop.permute.xlu1 %4771 }
0x4a78   :  { %v4774_v33 = vmul.f32 %v6825_v63, %v4772_v7 }
0x4a7a   :  { %4776 = vrot.lane.b32.xlu0 %v4774_v33, %s7016_s4 }
0x4aec   :  { %v4777_v15 = vpop.permute.xlu0 %4776 }
0x4aed   :  { %v4779_v13 = vadd.f32 %v4777_v15, %v4690_v58 }
0x4aef   :  { %6826 = vtanh.f32 %v4779_v13 }
0x4af9   :  { %v6827_v25 = vpop.eup %6826 }
0x4afa   :  { %4783 = vrot.lane.b32.xlu1 %v6827_v25, %s7017_s5 }
0x4b6c   :  { %v4784_v19 = vpop.permute.xlu1 %4783 }
0x4b6d   :  { %v4786_v21 = vmul.f32 %v4784_v19, %v4781_v17 }
0x4b6f   :  { %v4788_v23 = vadd.f32 %v4787_v6, %v4786_v21 }
0x4b71   :  { %4790 = vrot.lane.b32.xlu1 %v4788_v23, %s7017_s5 }
0x4be3   :  { %v4791_v40 = vpop.permute.xlu1 %4790 }
0x4be4   :  { %6279 = vmatmul.mubr.msk.f32.vlgmr.msra.gmra.mrb[64].mxu0 %vm232_vm2, %v4791_v40  ;;  %6306 = vmatmul.mubr.msk.f32.vlgmr.msra.gmra.mrb[40].mxu1 %vm232_vm2, %v4791_v40 }
0x4be5   :  { %6282 = vmatpush3.msra.mxu0 %v8030_v28  ;;  %6283 = vmatprep.mubr.msk.f32.mxu0 %vm7013_vm0, %v7014_v8  ;;  %v3219_v28 = vsub.f32 %v7894_v48, %v7898_v47 }
0x4be6   :  { %6679 = vmatprep.subr.bf16.mxu0 %v7012_v1 }
0x4be7   :  { %v3220_v45 = vmul.f32 1.442695, %v3219_v28 }
0x4cb7   :  { %v4860_v29 = vpop.f32.mrb[64].mxu0  ;;  %v5087_v12 = vpop.f32.mrb[40].mxu1 }
0x4cb8   :  { %v6280_v11 = vpop.f32.mrb[65].mxu0  ;;  %v6307_v3 = vpop.f32.mrb[41].mxu1  ;;  %v4864_v32 = vsel %vm1580_vm12, %v4860_v29, -inf }
0x4cb9   :  { %4865 = vmax.xlane.f32.xlu0 %v4864_v32 }
0x4d46   :  { %v4866_v57 = vpop.xlane.xlu0 %4865 }
0x4d47   :  { %v4867_v10 = vsub.f32 %v4860_v29, %v4866_v57 }
0x4d49   :  { %v4868_v26 = vmul.f32 1.442695, %v4867_v10 }
0x4d4b   :  { %6828 = vpow2.f32 %v4868_v26 }
0x4d4c   :  { %6830 = vpow2.f32 %v1904_v34 }
0x4d4d   :  { %6832 = vpow2.f32 %v3220_v45 }
0x4d4e   :  { %6834 = vpow2.f32 %v4520_v5 }
0x4d55   :  { %v6829_v14 = vpop.eup %6828 }
0x4d56   :  { %v4870_v53 = vsel %vm1580_vm12, %v6829_v14, 0.0  ;;  %v6831_v30 = vpop.eup %6830  ;;  %vm5194_vm12 = vcmp.eq.s32.totalorder %v7255_v35, 5 }
0x4d57   :  { %4871 = vadd.xlane.f32.xlu1 %v4870_v53  ;;  %v1906_v20 = vsel %vm1899_vm14, %v6831_v30, 0.0  ;;  %v6833_v55 = vpop.eup %6832 }
0x4d58   :  { %v3222_v48 = vsel %vm1899_vm14, %v6833_v55, 0.0  ;;  %v6835_v47 = vpop.eup %6834 }
0x4d59   :  { %v4522_v43 = vsel %vm1899_vm14, %v6835_v47, 0.0 }
0x4d5b   :  { %1907 = vadd.xlane.f32.xlu1 %v1906_v20 }
0x4d5f   :  { %3223 = vadd.xlane.f32.xlu1 %v3222_v48 }
0x4d63   :  { %4523 = vadd.xlane.f32.xlu1 %v4522_v43 }
0x4de4   :  { %v4872_v31 = vpop.xlane.xlu1 %4871 }
0x4de5   :  { %6836 = vrcp.f32 %v4872_v31 }
0x4de8   :  { %v1908_v13 = vpop.xlane.xlu1 %1907 }
0x4dec   :  { %v3224_v6 = vpop.xlane.xlu1 %3223 }
0x4def   :  { %v6837_v50 = vpop.eup %6836 }
0x4df0   :  { %v4874_v42 = vmul.f32 %v6837_v50, %v6829_v14  ;;  %v4524_v40 = vpop.xlane.xlu1 %4523 }
0x4df2   :  { %6284 = vmatmul.mubr.msk.f32.vlgmr.msra.gmra.mrb[66].mxu0 %vm1592_vm13, %v4874_v42 }
0x4df3   :  { %6681 = vmatpush3.bf16.msra.mxu0 %v7538_v56  ;;  %6294 = vmatprep.mubr.msk.f32.mxu0 %vm7013_vm0, %v7014_v8 }
0x4df4   :  { %6682 = vmatprep.subr.bf16.mxu0 %v7012_v1 }
0x4df7   :  { %6684 = vmatpush3.bf16.msra.mxu0 %v7544_v60 }
0x4df8   :  { %6691 = vmatprep.subr.bf16.mxu0 %v7012_v1 }
0x4ec5   :  { %v4944_v46 = vpop.f32.mrb[66].mxu0 }
0x4ec6   :  { %v6285_v52 = vpop.f32.mrb[67].mxu0  ;;  %6295 = vmatmul.mubr.msk.f32.vlgmr.msra.gmra.mrb[68].mxu0 %vm232_vm2, %v4944_v46 }
0x4ec7   :  { %6693 = vmatpush3.bf16.msra.mxu0 %v7588_v22  ;;  %6316 = vmatprep.mubr.msk.f32.mxu0 %vm7013_vm0, %v7014_v8 }
0x4ec8   :  { %6694 = vmatprep.subr.bf16.mxu0 %v7012_v1  ;;  %v2569_v1 = vsub.f32 %v7790_v39, %v7794_v49 }
0x4eca   :  { %v2570_v8 = vmul.f32 1.442695, %v2569_v1 }
0x4ecb   :  { %6696 = vmatpush3.bf16.msra.mxu0 %v7594_v24  ;;  %v3869_v24 = vsub.f32 %v7995_v41, %v7999_v38 }
0x4f99   :  { %v5017_v56 = vpop.f32.mrb[68].mxu0 }
0x4f9a   :  { %v5088_v61 = vadd.f32 %v5087_v12, %v5017_v56  ;;  %v6296_v37 = vpop.f32.mrb[69].mxu0 }
0x4f9c   :  { %v5091_v60 = vadd.f32 %v8093_v27, %v5088_v61  ;;  %v3870_v27 = vmul.f32 1.442695, %v3869_v24 }
0x4f9e   :  { %6838 = vtanh.f32 %v5091_v60 }
0x4f9f   :  { %6840 = vpow2.f32 %v2570_v8 }
0x4fa0   :  { %6842 = vpow2.f32 %v3870_v27 }
0x4fa8   :  { %v6839_v54 = vpop.eup %6838 }
0x4fa9   :  { %6317 = vmatmul.mubr.msk.f32.vlgmr.msra.gmra.mrb[70].mxu0 %vm232_vm2, %v6839_v54  ;;  %v6841_v7 = vpop.eup %6840 }
0x4faa   :  { %v2572_v39 = vsel %vm1899_vm14, %v6841_v7, 0.0  ;;  %v6843_v49 = vpop.eup %6842 }
0x4fab   :  { %v3872_v41 = vsel %vm1899_vm14, %v6843_v49, 0.0 }
0x507c   :  { %v5162_v2 = vpop.f32.mrb[70].mxu0 }
0x507d   :  { %v5163_v9 = vadd.f32 %v8103_v16, %v5162_v2  ;;  %v6318_v22 = vpop.f32.mrb[71].mxu0 }
0x507f   :  { %v5166_v18 = vsel %vm1899_vm14, %v5163_v9, -inf }
0x5080   :  { %5167 = vmax.xlane.f32.xlu0 %v5166_v18 }
0x510d   :  { %v5168_v58 = vpop.xlane.xlu0 %5167 }
0x510e   :  { %v5169_v62 = vsub.f32 %v5163_v9, %v5168_v58  ;;  %vm5177_vm0 = vcmp.eq.f32.partialorder %v5163_v9, %v5168_v58 }
0x510f   :  { %v5178_v59 = vsel %vm5177_vm0, %v7255_v35, 128 }
0x5110   :  { %v5170_v16 = vmul.f32 1.442695, %v5169_v62  ;;  %v5179_v36 = vsel %vm1899_vm14, %v5178_v59, 2147483647 }
0x5111   :  { %v5181_v0 = vshra.s32 %v5179_v36, 16  ;;  %v5180_v15 = vand.u32 65535, %v5179_v36 }
0x5112   :  { %6844 = vpow2.f32 %v5170_v16 }
0x5113   :  { %v5183_v63 = vcvt.s32.f32 %v5181_v0  ;;  %v5182_v17 = vcvt.s32.f32 %v5180_v15  ;;  %6846 = vrcp.f32 %v1908_v13 }
0x5115   :  { %5184 = vmin.xlane.f32.xlu0 %v5183_v63 }
0x5119   :  { %2573 = vadd.xlane.f32.xlu0 %v2572_v39 }
0x511c   :  { %v6845_v38 = vpop.eup %6844 }
0x511d   :  { %3873 = vadd.xlane.f32.xlu0 %v3872_v41  ;;  %v5172_v33 = vsel %vm1899_vm14, %v6845_v38, 0.0  ;;  %v6847_v29 = vpop.eup %6846 }
0x511e   :  { %v1930_v3 = vsel %vm1928_vm6, %v6847_v29, 0.0 }
0x5121   :  { %5173 = vadd.xlane.f32.xlu0 %v5172_v33 }
0x51a2   :  { %v5185_v25 = vpop.xlane.xlu0 %5184 }
0x51a3   :  { %vm5186_vm2 = vcmp.eq.f32.partialorder %v5183_v63, %v5185_v25  ;;  %v5191_v5 = vcvt.f32.s32 %v5185_v25 }
0x51a4   :  { %v5187_v19 = vsel %vm5186_vm2, %v5182_v17, inf }
0x51a5   :  { %5188 = vmin.xlane.f32.xlu1 %v5187_v19  ;;  %v5192_v53 = vshll.u32 %v5191_v5, 16 }
0x51a6   :  { %v2574_v21 = vpop.xlane.xlu0 %2573 }
0x51a7   :  { %6848 = vrcp.f32 %v2574_v21 }
0x51a8   :  { %6850 = vrcp.f32 %v3224_v6 }
0x51aa   :  { %v3874_v23 = vpop.xlane.xlu0 %3873 }
0x51ab   :  { %6852 = vrcp.f32 %v3874_v23 }
0x51ac   :  { %6854 = vrcp.f32 %v4524_v40 }
0x51ae   :  { %v5174_v12 = vpop.xlane.xlu0 %5173 }
0x51af   :  { %6856 = vrcp.f32 %v5174_v12 }
0x51b1   :  { %v6849_v11 = vpop.eup %6848 }
0x51b2   :  { %v2596_v32 = vsel %vm2594_vm7, %v6849_v11, %v1930_v3  ;;  %v6851_v4 = vpop.eup %6850 }
0x51b3   :  { %v3246_v10 = vsel %vm3244_vm11, %v6851_v4, %v2596_v32 }
0x51b5   :  { %v6853_v57 = vpop.eup %6852 }
0x51b6   :  { %v3896_v34 = vsel %vm3894_vm4, %v6853_v57, %v3246_v10  ;;  %v6855_v28 = vpop.eup %6854 }
0x51b7   :  { %v4546_v45 = vsel %vm4544_vm10, %v6855_v28, %v3896_v34 }
0x51b9   :  { %v6857_v26 = vpop.eup %6856 }
0x51ba   :  { %v5196_v44 = vsel %vm5194_vm12, %v6857_v26, %v4546_v45 }
0x51bb   :  { %5198 = vst [vmem:[%s8227_s16] sm:$0x1] %v5196_v44 }
0x5232   :  { %v5189_v14 = vpop.xlane.xlu1 %5188 }
0x5233   :  { %v5190_v30 = vcvt.f32.s32 %v5189_v14 }
0x5235   :  { %v5193_v20 = vadd.s32 %v5192_v53, %v5190_v30 }
0x5237   :  { %v5195_v55 = vsel %vm5194_vm12, %v5193_v20, %v8120_v51 }
0x5238   :  { %5197 = vst [vmem:[%s8231_s12] sm:$0x1] %v5195_v55 }
0x5239   :  { %5207 = vsyncpa [#allocation5], 1 }
0x523a   :  { %5208 = vsyncpa [#allocation7], 1 }
0x523b   :  { %5209 = vsyncpa [#allocation10], 1 }
0x523c   :  { %5210 = vsyncpa [#allocation13], 1 }

</bundles_post_ra>
